<compile_context>
chip_gen: v7x
topology: tpu7x:2x2x1
jax: 0.10.0
libtpu: 0.0.40
codegen_flags: <defaults>
</compile_context>

<pallas_src>
import functools
import math

import jax
import jax.numpy as jnp
from jax.experimental import pallas as pl
from jax.experimental.pallas import tpu as pltpu

_BF16 = jnp.bfloat16
_INV_SQRT2 = 1.0 / math.sqrt(2.0)
_NEG_BIG = -1e30


def _round_up(x, m):
    return ((x + m - 1) // m) * m


def _layernorm(v, eps):
    mu = jnp.mean(v, axis=-1, keepdims=True)
    var = jnp.mean((v - mu) ** 2, axis=-1, keepdims=True)
    return (v - mu) * jax.lax.rsqrt(var + eps)


def _vmem_limit_bytes():
    # Per-generation VMEM limit with headroom for Pallas double buffers
    # (~96 MiB on v5e/v6e, ~48 MiB on v7x).
    try:
        cap = pltpu.get_tpu_info().vmem_capacity_bytes
    except Exception:
        cap = 128 * 1024 * 1024
    return max(32 * 1024 * 1024, min(96 * 1024 * 1024, (cap * 3) // 4))


# ---------------------------------------------------------------------------
# The whole ViT forward in one kernel.  grid = (batch_blocks, layers).
# ---------------------------------------------------------------------------
def _vit_kernel(xp_ref, wconv_ref, pos_ref,
                g1_ref, g2_ref, wqkv_ref, bqkv_ref, wo_ref, bo_ref,
                lng_ref, lnb_ref, w1_ref, b1_ref, w2_ref, b2_ref,
                hg_ref, hb_ref, wfc_ref, bfc_ref,
                logits_ref,
                resid_ref,
                *, heads, s_real):
    layer = pl.program_id(1)
    n_layers = pl.num_programs(1)

    bblk, s_pad, kp = xp_ref.shape
    d = wconv_ref.shape[1]
    bt = bblk * s_pad
    hd = d // heads
    scale = 1.0 / math.sqrt(hd)

    # ---- layer 0: patch projection (conv-as-matmul) + cls/pos, seeds the
    # ---- VMEM-resident residual stream for this batch block.
    @pl.when(layer == 0)
    def _seed():
        xf = xp_ref[...].reshape(bt, kp)                       # bf16
        tok = jnp.dot(xf, wconv_ref[...],
                      preferred_element_type=jnp.float32)      # (BT, D)
        pos = jnp.concatenate([pos_ref[...]] * bblk, axis=0)   # (BT, D)
        resid_ref[...] = tok + pos
        # TODO(synk): nn.Dropout after pos-add is identity (eval mode).

    x = resid_ref[...]                                         # (BT, D) f32

    # ---------------- pre-norm 1 (LN, no bias, eps=1e-5) + MHA --------------
    h = (_layernorm(x, 1e-5) * g1_ref[0]).astype(_BF16)
    qkv = jnp.dot(h, wqkv_ref[0],
                  preferred_element_type=jnp.float32) + bqkv_ref[0]   # (BT,3D)
    q = qkv[:, 0 * d:1 * d] * scale
    k = qkv[:, 1 * d:2 * d]
    v = qkv[:, 2 * d:3 * d]

    def split_heads(t):                       # (BT, D) -> (heads*bblk, S, hd)
        t3 = t.reshape(bblk, s_pad, d)
        return jnp.concatenate(
            [t3[:, :, i * hd:(i + 1) * hd] for i in range(heads)], axis=0)

    qh = split_heads(q).astype(_BF16)
    kh = split_heads(k).astype(_BF16)
    vh = split_heads(v).astype(_BF16)

    s = jnp.einsum("gqd,gkd->gqk", qh, kh,
                   preferred_element_type=jnp.float32)         # (G, S, S)
    kmask = jax.lax.broadcasted_iota(jnp.int32, (1, 1, s_pad), 2) < s_real
    s = jnp.where(kmask, s, _NEG_BIG)                          # mask pad keys
    s = s - jnp.max(s, axis=-1, keepdims=True)
    p = jnp.exp(s)
    p = p * pl.reciprocal(jnp.sum(p, axis=-1, keepdims=True), approx=True)
    ctx = jnp.einsum("gqk,gkd->gqd", p.astype(_BF16), vh,
                     preferred_element_type=jnp.float32)       # (G, S, hd)
    ctx = jnp.concatenate(
        [ctx[i * bblk:(i + 1) * bblk] for i in range(heads)], axis=-1)
    ctx = ctx.reshape(bt, d)                                   # (BT, D)

    attn = jnp.dot(ctx.astype(_BF16), wo_ref[0],
                   preferred_element_type=jnp.float32) + bo_ref[0]
    x1 = x + attn                                              # residual 1

    # -------- pre-norm 2 + MLP (reference nests a LayerNorm inside MLP) -----
    h2 = _layernorm(x1, 1e-5) * g2_ref[0]
    h3 = _layernorm(h2, 1e-5) * lng_ref[0] + lnb_ref[0]
    a = jnp.dot(h3.astype(_BF16), w1_ref[0],
                preferred_element_type=jnp.float32) + b1_ref[0]
    # exact GELU (torch.nn.GELU default): 0.5*x*(1+erf(x/sqrt(2)))
    a = 0.5 * a * (1.0 + jax.lax.erf(a * _INV_SQRT2))
    m = jnp.dot(a.astype(_BF16), w2_ref[0],
                preferred_element_type=jnp.float32) + b2_ref[0]
    x2 = x1 + m                                                # residual 2
    resid_ref[...] = x2

    # ---- last layer: final LayerNorm(eps=1e-6) on CLS + classifier head ----
    @pl.when(layer == n_layers - 1)
    def _head():
        cls = x2.reshape(bblk, s_pad, d)[:, 0, :]              # (bblk, D)
        hc = _layernorm(cls, 1e-6) * hg_ref[...] + hb_ref[...]
        logits_ref[0] = (jnp.dot(hc.astype(_BF16), wfc_ref[...],
                                 preferred_element_type=jnp.float32)
                         + bfc_ref[...])


def vit_encoder(xp, pos_full, params, *, heads, s_real, batch_block=None):
    B, s_pad, kp = xp.shape
    D = pos_full.shape[1]
    bp = params["blocks"]
    hp = params["head"]
    L = bp["g1"].shape[0]
    HDIM = bp["w1"].shape[2]
    ncp = hp["wfc"].shape[1]

    if batch_block is None:
        # >=2 parallel batch blocks when possible (uses both v7x TensorCores)
        # while still amortizing weight DMAs over multiple batch elements.
        batch_block = B // 2 if (B % 2 == 0 and B >= 2) else B
    assert B % batch_block == 0
    nb = B // batch_block

    kernel = functools.partial(_vit_kernel, heads=heads, s_real=s_real)

    def lspec(*trailing):               # per-layer parameter block
        n = len(trailing)
        return pl.BlockSpec((1,) + trailing,
                            lambda b, l, _n=n: (l,) + (0,) * _n)

    def cspec(*dims):                   # grid-constant block (fetched once)
        n = len(dims)
        return pl.BlockSpec(dims, lambda b, l, _n=n: (0,) * _n)

    in_specs = [
        pl.BlockSpec((batch_block, s_pad, kp), lambda b, l: (b, 0, 0)),  # xp
        cspec(kp, D),                       # wconv (patch projection)
        cspec(s_pad, D),                    # cls+pos (padded)
        lspec(1, D), lspec(1, D),           # g1, g2
        lspec(D, 3 * D), lspec(1, 3 * D),   # wqkv, bqkv (lane-dense)
        lspec(D, D), lspec(1, D),           # wo, bo
        lspec(1, D), lspec(1, D),           # MLP-internal LayerNorm g, b
        lspec(D, HDIM), lspec(1, HDIM),     # w1, b1
        lspec(HDIM, D), lspec(1, D),        # w2, b2
        cspec(1, D), cspec(1, D),           # head LayerNorm g, b
        cspec(D, ncp), cspec(1, ncp),       # fc weight (128-padded), bias
    ]
    logits = pl.pallas_call(
        kernel,
        grid=(nb, L),
        in_specs=in_specs,
        out_specs=pl.BlockSpec((1, batch_block, ncp), lambda b, l: (b, 0, 0)),
        out_shape=jax.ShapeDtypeStruct((nb, batch_block, ncp), jnp.float32),
        scratch_shapes=[pltpu.VMEM((batch_block * s_pad, D), jnp.float32)],
        compiler_params=pltpu.CompilerParams(
            dimension_semantics=("parallel", "arbitrary"),
            vmem_limit_bytes=_vmem_limit_bytes()),
    )(xp, params["wconv_t"], pos_full,
      bp["g1"], bp["g2"], bp["wqkv"], bp["bqkv"], bp["wo"], bp["bo"],
      bp["lng"], bp["lnb"], bp["w1"], bp["b1"], bp["w2"], bp["b2"],
      hp["g"], hp["b"], hp["wfc"], hp["bfc"])
    return logits.reshape(B, ncp)


# ---------------------------------------------------------------------------
# Parameter init (deterministic, synthetic) + forward glue
# ---------------------------------------------------------------------------
def init_params(key, *, img_size, patch_size, in_channels, d_model, heads,
                h_dim, layers, num_classes):
    assert d_model % heads == 0
    n_patches = (img_size // patch_size) ** 2
    K = in_channels * patch_size * patch_size
    kp = _round_up(K, 128)                       # lane-padded im2col dim
    ncp = _round_up(num_classes, 128)            # lane-padded class dim
    s = 0.02
    ks = jax.random.split(key, 8)

    def nrm(k, shape, dtype=jnp.float32):
        return (jax.random.normal(k, shape, jnp.float32) * s).astype(dtype)

    # Conv2d(kernel=stride=P, bias=False) weight (D,C,P,P) -> (C*P*P, D),
    # zero-padded rows up to kp.
    wconv = jnp.zeros((kp, d_model), jnp.float32).at[:K].set(
        jax.random.normal(ks[0], (K, d_model), jnp.float32) * s)
    # fc weight (ncls, D) -> transposed, lane-padded to 128 output classes.
    wfc = jnp.zeros((d_model, ncp), jnp.float32).at[:, :num_classes].set(
        jax.random.normal(ks[7], (d_model, num_classes), jnp.float32) * s)

    return {
        "wconv_t": wconv.astype(_BF16),
        "cls": nrm(ks[1], (1, 1, d_model)),
        "pos": nrm(ks[2], (1, n_patches + 1, d_model)),
        "blocks": dict(
            # norm1 / norm2: LayerNorm(bias=False) -> scale only
            g1=jnp.ones((layers, 1, d_model), jnp.float32),
            g2=jnp.ones((layers, 1, d_model), jnp.float32),
            # MultiheadAttention in_proj: wqkv[l] == in_proj_weight[l].T
            wqkv=nrm(ks[3], (layers, d_model, 3 * d_model), _BF16),
            bqkv=jnp.zeros((layers, 1, 3 * d_model), jnp.float32),
            # out_proj: wo[l] == out_proj.weight[l].T
            wo=nrm(ks[4], (layers, d_model, d_model), _BF16),
            bo=jnp.zeros((layers, 1, d_model), jnp.float32),
            # MLP: LayerNorm (with bias) -> Linear -> GELU -> Linear
            lng=jnp.ones((layers, 1, d_model), jnp.float32),
            lnb=jnp.zeros((layers, 1, d_model), jnp.float32),
            w1=nrm(ks[5], (layers, d_model, h_dim), _BF16),
            b1=jnp.zeros((layers, 1, h_dim), jnp.float32),
            w2=nrm(ks[6], (layers, h_dim, d_model), _BF16),
            b2=jnp.zeros((layers, 1, d_model), jnp.float32),
        ),
        "head": dict(
            g=jnp.ones((1, d_model), jnp.float32),
            b=jnp.zeros((1, d_model), jnp.float32),
            wfc=wfc.astype(_BF16),
            bfc=jnp.zeros((1, ncp), jnp.float32),
        ),
    }


def vit_forward(x_nchw, params, *, patch_size, heads, num_classes,
                batch_block=None):
    B, C, H, W = x_nchw.shape
    P = patch_size
    D = params["wconv_t"].shape[1]
    kp = params["wconv_t"].shape[0]
    K = C * P * P
    N = (H // P) * (W // P)
    S = N + 1
    s_pad = _round_up(S, 8)

    # im2col: NCHW -> (B, N, K), row-major over the patch grid == Conv2d
    # (stride=P) + Flatten(start_dim=2) + permute(0, 2, 1).
    xp = x_nchw.reshape(B, C, H // P, P, W // P, P)
    xp = xp.transpose(0, 2, 4, 1, 3, 5).reshape(B, N, K)
    # Pad: a leading all-zero CLS row, trailing zero token rows up to s_pad,
    # and the im2col dim up to a lane multiple; pre-cast to bf16 (halves DMA).
    xp = jnp.pad(xp, ((0, 0), (1, s_pad - S), (0, kp - K))).astype(_BF16)

    # Positional table fused with the CLS token: row0 = cls + pos[0],
    # rows 1..N = pos[1..N], padded rows zero.
    pos_full = jnp.concatenate([
        params["cls"][0] + params["pos"][0, 0:1, :],
        params["pos"][0, 1:, :],
        jnp.zeros((s_pad - S, D), jnp.float32)], axis=0)

    logits = vit_encoder(xp, pos_full, params, heads=heads, s_real=S,
                         batch_block=batch_block)
    return logits[:, :num_classes]


# ---------------------------------------------------------------------------
if __name__ == "__main__":
    # Small config consistent with the module defaults: 28x28 image, patch 7
    # -> 16 patches (+ CLS = 17 tokens, padded to 24).  d_model lane-dense.
    B, C, IMG, P = 4, 1, 28, 7
    D, HEADS, HDIM, LAYERS, NCLS = 128, 4, 256, 2, 10

    key = jax.random.PRNGKey(0)
    k_params, k_x = jax.random.split(key)

    params = init_params(k_params, img_size=IMG, patch_size=P, in_channels=C,
                         d_model=D, heads=HEADS, h_dim=HDIM, layers=LAYERS,
                         num_classes=NCLS)
    x = jax.random.normal(k_x, (B, C, IMG, IMG), jnp.float32)

    logits = vit_forward(x, params, patch_size=P, heads=HEADS,
                         num_classes=NCLS)
    jax.block_until_ready(logits)
    assert logits.shape == (B, NCLS), logits.shape
    assert bool(jnp.all(jnp.isfinite(logits)))
    print("KERNEL_OK")
</pallas_src>

<mosaic_0001>
module attributes {stable_mosaic.version = 11 : i64} {
  func.func @_vit_kernel(%arg0: i32, %arg1: i32, %arg2: memref<2x24x128xbf16, #tpu.memory_space<vmem>>, %arg3: memref<128x128xbf16, #tpu.memory_space<vmem>>, %arg4: memref<24x128xf32, #tpu.memory_space<vmem>>, %arg5: memref<1x1x128xf32, #tpu.memory_space<vmem>>, %arg6: memref<1x1x128xf32, #tpu.memory_space<vmem>>, %arg7: memref<1x128x384xbf16, #tpu.memory_space<vmem>>, %arg8: memref<1x1x384xf32, #tpu.memory_space<vmem>>, %arg9: memref<1x128x128xbf16, #tpu.memory_space<vmem>>, %arg10: memref<1x1x128xf32, #tpu.memory_space<vmem>>, %arg11: memref<1x1x128xf32, #tpu.memory_space<vmem>>, %arg12: memref<1x1x128xf32, #tpu.memory_space<vmem>>, %arg13: memref<1x128x256xbf16, #tpu.memory_space<vmem>>, %arg14: memref<1x1x256xf32, #tpu.memory_space<vmem>>, %arg15: memref<1x256x128xbf16, #tpu.memory_space<vmem>>, %arg16: memref<1x1x128xf32, #tpu.memory_space<vmem>>, %arg17: memref<1x128xf32, #tpu.memory_space<vmem>>, %arg18: memref<1x128xf32, #tpu.memory_space<vmem>>, %arg19: memref<128x128xbf16, #tpu.memory_space<vmem>>, %arg20: memref<1x128xf32, #tpu.memory_space<vmem>>, %arg21: memref<1x2x128xf32, #tpu.memory_space<vmem>>, %arg22: memref<48x128xf32, #tpu.memory_space<vmem>>) attributes {dimension_semantics = [#tpu.dimension_semantics<parallel>, #tpu.dimension_semantics<arbitrary>], iteration_bounds = array<i64: 2, 2>, scalar_prefetch = 0 : i64, scratch_operands = 1 : i64, tpu.core_type = #tpu.core_type<tc>, window_params = [{transform_indices = @transform_0, window_bounds = array<i64: 2, 24, 128>}, {pipeline_mode = #tpu.pipeline_mode<synchronous>, transform_indices = @transform_1, window_bounds = array<i64: 128, 128>}, {pipeline_mode = #tpu.pipeline_mode<synchronous>, transform_indices = @transform_2, window_bounds = array<i64: 24, 128>}, {transform_indices = @transform_3, window_bounds = array<i64: 1, 1, 128>}, {transform_indices = @transform_4, window_bounds = array<i64: 1, 1, 128>}, {transform_indices = @transform_5, window_bounds = array<i64: 1, 128, 384>}, {transform_indices = @transform_6, window_bounds = array<i64: 1, 1, 384>}, {transform_indices = @transform_7, window_bounds = array<i64: 1, 128, 128>}, {transform_indices = @transform_8, window_bounds = array<i64: 1, 1, 128>}, {transform_indices = @transform_9, window_bounds = array<i64: 1, 1, 128>}, {transform_indices = @transform_10, window_bounds = array<i64: 1, 1, 128>}, {transform_indices = @transform_11, window_bounds = array<i64: 1, 128, 256>}, {transform_indices = @transform_12, window_bounds = array<i64: 1, 1, 256>}, {transform_indices = @transform_13, window_bounds = array<i64: 1, 256, 128>}, {transform_indices = @transform_14, window_bounds = array<i64: 1, 1, 128>}, {pipeline_mode = #tpu.pipeline_mode<synchronous>, transform_indices = @transform_15, window_bounds = array<i64: 1, 128>}, {pipeline_mode = #tpu.pipeline_mode<synchronous>, transform_indices = @transform_16, window_bounds = array<i64: 1, 128>}, {pipeline_mode = #tpu.pipeline_mode<synchronous>, transform_indices = @transform_17, window_bounds = array<i64: 128, 128>}, {pipeline_mode = #tpu.pipeline_mode<synchronous>, transform_indices = @transform_18, window_bounds = array<i64: 1, 128>}, {transform_indices = @transform_19, window_bounds = array<i64: 1, 2, 128>}]} {
    %c0_i32 = arith.constant 0 : i32
    %0 = arith.cmpi eq, %arg1, %c0_i32 : i32
    %1 = arith.extui %0 : i1 to i32
    %c0_i32_0 = arith.constant 0 : i32
    %2 = arith.cmpi ne, %1, %c0_i32_0 : i32
    scf.if %2 {
      %c0_68 = arith.constant 0 : index
      %c0_69 = arith.constant 0 : index
      %c0_70 = arith.constant 0 : index
      %172 = vector.load %arg2[%c0_68, %c0_69, %c0_70] : memref<2x24x128xbf16, #tpu.memory_space<vmem>>, vector<2x24x128xbf16>
      %173 = vector.shape_cast %172 : vector<2x24x128xbf16> to vector<48x128xbf16>
      %c0_71 = arith.constant 0 : index
      %c0_72 = arith.constant 0 : index
      %174 = vector.load %arg3[%c0_71, %c0_72] : memref<128x128xbf16, #tpu.memory_space<vmem>>, vector<128x128xbf16>
      %cst_73 = arith.constant dense<0.000000e+00> : vector<48x128xf32>
      %175 = tpu.matmul %173, %174, %cst_73 {dimension_numbers = #tpu.dot_dimension_numbers<[1], [0], [0], [1], [0, 0, 1, 1], [], []>} : vector<48x128xbf16>, vector<128x128xbf16>, vector<48x128xf32> -> vector<48x128xf32>
      %c0_74 = arith.constant 0 : index
      %c0_75 = arith.constant 0 : index
      %176 = vector.load %arg4[%c0_74, %c0_75] : memref<24x128xf32, #tpu.memory_space<vmem>>, vector<24x128xf32>
      %177 = tpu.concatenate %176, %176 in 0 : vector<24x128xf32>, vector<24x128xf32> -> vector<48x128xf32>
      %178 = arith.addf %175, %177 : vector<48x128xf32>
      %c0_76 = arith.constant 0 : index
      %c0_77 = arith.constant 0 : index
      %179 = vector.load %arg22[%c0_76, %c0_77] : memref<48x128xf32, #tpu.memory_space<vmem>>, vector<48x128xf32>
      tpu.vector_store %arg22[%c0_76, %c0_77], %178 {strides = array<i32>} : memref<48x128xf32, #tpu.memory_space<vmem>>, vector<48x128xf32>,
    } else {
    }
    %c0 = arith.constant 0 : index
    %c0_1 = arith.constant 0 : index
    %3 = vector.load %arg22[%c0, %c0_1] : memref<48x128xf32, #tpu.memory_space<vmem>>, vector<48x128xf32>
    %cst = arith.constant dense<0.000000e+00> : vector<48xf32>
    %4 = vector.multi_reduction <add>, %3, %cst [1] : vector<48x128xf32> to vector<48xf32>
    %5 = vector.shape_cast %4 : vector<48xf32> to vector<48x1xf32>
    %cst_2 = arith.constant 1.280000e+02 : f32
    %6 = vector.broadcast %cst_2 : f32 to vector<48x1xf32>
    %7 = arith.divf %5, %6 : vector<48x1xf32>
    %8 = vector.broadcast %7 : vector<48x1xf32> to vector<48x128xf32>
    %9 = arith.subf %3, %8 : vector<48x128xf32>
    %10 = arith.mulf %9, %9 : vector<48x128xf32>
    %cst_3 = arith.constant dense<0.000000e+00> : vector<48xf32>
    %11 = vector.multi_reduction <add>, %10, %cst_3 [1] : vector<48x128xf32> to vector<48xf32>
    %12 = vector.shape_cast %11 : vector<48xf32> to vector<48x1xf32>
    %cst_4 = arith.constant 1.280000e+02 : f32
    %13 = vector.broadcast %cst_4 : f32 to vector<48x1xf32>
    %14 = arith.divf %12, %13 : vector<48x1xf32>
    %15 = vector.broadcast %7 : vector<48x1xf32> to vector<48x128xf32>
    %16 = arith.subf %3, %15 : vector<48x128xf32>
    %cst_5 = arith.constant 9.99999974E-6 : f32
    %17 = vector.broadcast %cst_5 : f32 to vector<48x1xf32>
    %18 = arith.addf %14, %17 : vector<48x1xf32>
    %19 = math.rsqrt %18 : vector<48x1xf32>
    %20 = vector.broadcast %19 : vector<48x1xf32> to vector<48x128xf32>
    %21 = arith.mulf %16, %20 : vector<48x128xf32>
    %c0_6 = arith.constant 0 : index
    %c0_7 = arith.constant 0 : index
    %c0_8 = arith.constant 0 : index
    %22 = vector.load %arg5[%c0_6, %c0_7, %c0_8] : memref<1x1x128xf32, #tpu.memory_space<vmem>>, vector<1x1x128xf32>
    %23 = vector.shape_cast %22 : vector<1x1x128xf32> to vector<1x128xf32>
    %24 = vector.broadcast %23 : vector<1x128xf32> to vector<48x128xf32>
    %25 = arith.mulf %21, %24 : vector<48x128xf32>
    %26 = arith.truncf %25 : vector<48x128xf32> to vector<48x128xbf16>
    %c0_9 = arith.constant 0 : index
    %c0_10 = arith.constant 0 : index
    %c0_11 = arith.constant 0 : index
    %27 = vector.load %arg7[%c0_9, %c0_10, %c0_11] : memref<1x128x384xbf16, #tpu.memory_space<vmem>>, vector<1x128x384xbf16>
    %28 = vector.shape_cast %27 : vector<1x128x384xbf16> to vector<128x384xbf16>
    %cst_12 = arith.constant dense<0.000000e+00> : vector<48x384xf32>
    %29 = tpu.matmul %26, %28, %cst_12 {dimension_numbers = #tpu.dot_dimension_numbers<[1], [0], [0], [1], [0, 0, 1, 1], [], []>} : vector<48x128xbf16>, vector<128x384xbf16>, vector<48x384xf32> -> vector<48x384xf32>
    %c0_13 = arith.constant 0 : index
    %c0_14 = arith.constant 0 : index
    %c0_15 = arith.constant 0 : index
    %30 = vector.load %arg8[%c0_13, %c0_14, %c0_15] : memref<1x1x384xf32, #tpu.memory_space<vmem>>, vector<1x1x384xf32>
    %31 = vector.shape_cast %30 : vector<1x1x384xf32> to vector<1x384xf32>
    %32 = vector.broadcast %31 : vector<1x384xf32> to vector<48x384xf32>
    %33 = arith.addf %29, %32 : vector<48x384xf32>
    %34 = vector.extract_strided_slice %33 {offsets = [0, 0], sizes = [48, 128], strides = [1, 1]} : vector<48x384xf32> to vector<48x128xf32>
    %cst_16 = arith.constant 0.176776692 : f32
    %35 = vector.broadcast %cst_16 : f32 to vector<48x128xf32>
    %36 = arith.mulf %34, %35 : vector<48x128xf32>
    %37 = vector.extract_strided_slice %33 {offsets = [0, 128], sizes = [48, 128], strides = [1, 1]} : vector<48x384xf32> to vector<48x128xf32>
    %38 = vector.extract_strided_slice %33 {offsets = [0, 256], sizes = [48, 128], strides = [1, 1]} : vector<48x384xf32> to vector<48x128xf32>
    %39 = vector.shape_cast %36 : vector<48x128xf32> to vector<2x24x128xf32>
    %40 = vector.extract_strided_slice %39 {offsets = [0, 0, 0], sizes = [2, 24, 32], strides = [1, 1, 1]} : vector<2x24x128xf32> to vector<2x24x32xf32>
    %41 = vector.extract_strided_slice %39 {offsets = [0, 0, 32], sizes = [2, 24, 32], strides = [1, 1, 1]} : vector<2x24x128xf32> to vector<2x24x32xf32>
    %42 = vector.extract_strided_slice %39 {offsets = [0, 0, 64], sizes = [2, 24, 32], strides = [1, 1, 1]} : vector<2x24x128xf32> to vector<2x24x32xf32>
    %43 = vector.extract_strided_slice %39 {offsets = [0, 0, 96], sizes = [2, 24, 32], strides = [1, 1, 1]} : vector<2x24x128xf32> to vector<2x24x32xf32>
    %44 = tpu.concatenate %40, %41, %42, %43 in 0 : vector<2x24x32xf32>, vector<2x24x32xf32>, vector<2x24x32xf32>, vector<2x24x32xf32> -> vector<8x24x32xf32>
    %45 = arith.truncf %44 : vector<8x24x32xf32> to vector<8x24x32xbf16>
    %46 = vector.shape_cast %37 : vector<48x128xf32> to vector<2x24x128xf32>
    %47 = vector.extract_strided_slice %46 {offsets = [0, 0, 0], sizes = [2, 24, 32], strides = [1, 1, 1]} : vector<2x24x128xf32> to vector<2x24x32xf32>
    %48 = vector.extract_strided_slice %46 {offsets = [0, 0, 32], sizes = [2, 24, 32], strides = [1, 1, 1]} : vector<2x24x128xf32> to vector<2x24x32xf32>
    %49 = vector.extract_strided_slice %46 {offsets = [0, 0, 64], sizes = [2, 24, 32], strides = [1, 1, 1]} : vector<2x24x128xf32> to vector<2x24x32xf32>
    %50 = vector.extract_strided_slice %46 {offsets = [0, 0, 96], sizes = [2, 24, 32], strides = [1, 1, 1]} : vector<2x24x128xf32> to vector<2x24x32xf32>
    %51 = tpu.concatenate %47, %48, %49, %50 in 0 : vector<2x24x32xf32>, vector<2x24x32xf32>, vector<2x24x32xf32>, vector<2x24x32xf32> -> vector<8x24x32xf32>
    %52 = arith.truncf %51 : vector<8x24x32xf32> to vector<8x24x32xbf16>
    %53 = vector.shape_cast %38 : vector<48x128xf32> to vector<2x24x128xf32>
    %54 = vector.extract_strided_slice %53 {offsets = [0, 0, 0], sizes = [2, 24, 32], strides = [1, 1, 1]} : vector<2x24x128xf32> to vector<2x24x32xf32>
    %55 = vector.extract_strided_slice %53 {offsets = [0, 0, 32], sizes = [2, 24, 32], strides = [1, 1, 1]} : vector<2x24x128xf32> to vector<2x24x32xf32>
    %56 = vector.extract_strided_slice %53 {offsets = [0, 0, 64], sizes = [2, 24, 32], strides = [1, 1, 1]} : vector<2x24x128xf32> to vector<2x24x32xf32>
    %57 = vector.extract_strided_slice %53 {offsets = [0, 0, 96], sizes = [2, 24, 32], strides = [1, 1, 1]} : vector<2x24x128xf32> to vector<2x24x32xf32>
    %58 = tpu.concatenate %54, %55, %56, %57 in 0 : vector<2x24x32xf32>, vector<2x24x32xf32>, vector<2x24x32xf32>, vector<2x24x32xf32> -> vector<8x24x32xf32>
    %59 = arith.truncf %58 : vector<8x24x32xf32> to vector<8x24x32xbf16>
    "tpu.trace_start"() <{level = 10 : i32, message = "gqd,gkd->gqk"}> : () -> ()
    %cst_17 = arith.constant dense<0.000000e+00> : vector<8x24x24xf32>
    %60 = tpu.matmul %45, %52, %cst_17 {dimension_numbers = #tpu.dot_dimension_numbers<[2], [2], [1], [1], [0, 0, 0, 1, 1, 1], [0], [0]>} : vector<8x24x32xbf16>, vector<8x24x32xbf16>, vector<8x24x24xf32> -> vector<8x24x24xf32>
    "tpu.trace_stop"() : () -> ()
    %61 = tpu.iota {dimensions = array<i32: 2>} : vector<1x1x24xi32>
    %c17_i32 = arith.constant 17 : i32
    %62 = vector.broadcast %c17_i32 : i32 to vector<1x1x24xi32>
    %63 = arith.cmpi slt, %61, %62 : vector<1x1x24xi32>
    %cst_18 = arith.constant -1.000000e+30 : f32
    %64 = vector.shape_cast %63 : vector<1x1x24xi1> to vector<1x1x24xi1>
    %65 = vector.broadcast %64 : vector<1x1x24xi1> to vector<8x24x24xi1>
    %66 = vector.broadcast %cst_18 : f32 to vector<8x24x24xf32>
    %67 = arith.select %65, %60, %66 : vector<8x24x24xi1>, vector<8x24x24xf32>
    %cst_19 = arith.constant dense<0xFF800000> : vector<8x24xf32>
    %68 = vector.multi_reduction <maximumf>, %67, %cst_19 [2] : vector<8x24x24xf32> to vector<8x24xf32>
    %69 = vector.shape_cast %68 : vector<8x24xf32> to vector<8x24x1xf32>
    %70 = vector.broadcast %69 : vector<8x24x1xf32> to vector<8x24x24xf32>
    %71 = arith.subf %67, %70 : vector<8x24x24xf32>
    %72 = math.exp %71 : vector<8x24x24xf32>
    %cst_20 = arith.constant dense<0.000000e+00> : vector<8x24xf32>
    %73 = vector.multi_reduction <add>, %72, %cst_20 [2] : vector<8x24x24xf32> to vector<8x24xf32>
    %74 = vector.shape_cast %73 : vector<8x24xf32> to vector<8x24x1xf32>
    %75 = tpu.reciprocal %74 {approx = true} : vector<8x24x1xf32> -> vector<8x24x1xf32>
    %76 = vector.broadcast %75 : vector<8x24x1xf32> to vector<8x24x24xf32>
    %77 = arith.mulf %72, %76 : vector<8x24x24xf32>
    %78 = arith.truncf %77 : vector<8x24x24xf32> to vector<8x24x24xbf16>
    "tpu.trace_start"() <{level = 10 : i32, message = "gqk,gkd->gqd"}> : () -> ()
    %cst_21 = arith.constant dense<0.000000e+00> : vector<8x24x32xf32>
    %79 = tpu.matmul %78, %59, %cst_21 {dimension_numbers = #tpu.dot_dimension_numbers<[2], [1], [1], [2], [0, 0, 0, 1, 1, 2], [0], [0]>} : vector<8x24x24xbf16>, vector<8x24x32xbf16>, vector<8x24x32xf32> -> vector<8x24x32xf32>
    "tpu.trace_stop"() : () -> ()
    %80 = vector.extract_strided_slice %79 {offsets = [0, 0, 0], sizes = [2, 24, 32], strides = [1, 1, 1]} : vector<8x24x32xf32> to vector<2x24x32xf32>
    %81 = vector.extract_strided_slice %79 {offsets = [2, 0, 0], sizes = [2, 24, 32], strides = [1, 1, 1]} : vector<8x24x32xf32> to vector<2x24x32xf32>
    %82 = vector.extract_strided_slice %79 {offsets = [4, 0, 0], sizes = [2, 24, 32], strides = [1, 1, 1]} : vector<8x24x32xf32> to vector<2x24x32xf32>
    %83 = vector.extract_strided_slice %79 {offsets = [6, 0, 0], sizes = [2, 24, 32], strides = [1, 1, 1]} : vector<8x24x32xf32> to vector<2x24x32xf32>
    %84 = tpu.concatenate %80, %81, %82, %83 in 2 : vector<2x24x32xf32>, vector<2x24x32xf32>, vector<2x24x32xf32>, vector<2x24x32xf32> -> vector<2x24x128xf32>
    %85 = vector.shape_cast %84 : vector<2x24x128xf32> to vector<48x128xf32>
    %86 = arith.truncf %85 : vector<48x128xf32> to vector<48x128xbf16>
    %c0_22 = arith.constant 0 : index
    %c0_23 = arith.constant 0 : index
    %c0_24 = arith.constant 0 : index
    %87 = vector.load %arg9[%c0_22, %c0_23, %c0_24] : memref<1x128x128xbf16, #tpu.memory_space<vmem>>, vector<1x128x128xbf16>
    %88 = vector.shape_cast %87 : vector<1x128x128xbf16> to vector<128x128xbf16>
    %cst_25 = arith.constant dense<0.000000e+00> : vector<48x128xf32>
    %89 = tpu.matmul %86, %88, %cst_25 {dimension_numbers = #tpu.dot_dimension_numbers<[1], [0], [0], [1], [0, 0, 1, 1], [], []>} : vector<48x128xbf16>, vector<128x128xbf16>, vector<48x128xf32> -> vector<48x128xf32>
    %c0_26 = arith.constant 0 : index
    %c0_27 = arith.constant 0 : index
    %c0_28 = arith.constant 0 : index
    %90 = vector.load %arg10[%c0_26, %c0_27, %c0_28] : memref<1x1x128xf32, #tpu.memory_space<vmem>>, vector<1x1x128xf32>
    %91 = vector.shape_cast %90 : vector<1x1x128xf32> to vector<1x128xf32>
    %92 = vector.broadcast %91 : vector<1x128xf32> to vector<48x128xf32>
    %93 = arith.addf %89, %92 : vector<48x128xf32>
    %94 = arith.addf %3, %93 : vector<48x128xf32>
    %cst_29 = arith.constant dense<0.000000e+00> : vector<48xf32>
    %95 = vector.multi_reduction <add>, %94, %cst_29 [1] : vector<48x128xf32> to vector<48xf32>
    %96 = vector.shape_cast %95 : vector<48xf32> to vector<48x1xf32>
    %cst_30 = arith.constant 1.280000e+02 : f32
    %97 = vector.broadcast %cst_30 : f32 to vector<48x1xf32>
    %98 = arith.divf %96, %97 : vector<48x1xf32>
    %99 = vector.broadcast %98 : vector<48x1xf32> to vector<48x128xf32>
    %100 = arith.subf %94, %99 : vector<48x128xf32>
    %101 = arith.mulf %100, %100 : vector<48x128xf32>
    %cst_31 = arith.constant dense<0.000000e+00> : vector<48xf32>
    %102 = vector.multi_reduction <add>, %101, %cst_31 [1] : vector<48x128xf32> to vector<48xf32>
    %103 = vector.shape_cast %102 : vector<48xf32> to vector<48x1xf32>
    %cst_32 = arith.constant 1.280000e+02 : f32
    %104 = vector.broadcast %cst_32 : f32 to vector<48x1xf32>
    %105 = arith.divf %103, %104 : vector<48x1xf32>
    %106 = vector.broadcast %98 : vector<48x1xf32> to vector<48x128xf32>
    %107 = arith.subf %94, %106 : vector<48x128xf32>
    %cst_33 = arith.constant 9.99999974E-6 : f32
    %108 = vector.broadcast %cst_33 : f32 to vector<48x1xf32>
    %109 = arith.addf %105, %108 : vector<48x1xf32>
    %110 = math.rsqrt %109 : vector<48x1xf32>
    %111 = vector.broadcast %110 : vector<48x1xf32> to vector<48x128xf32>
    %112 = arith.mulf %107, %111 : vector<48x128xf32>
    %c0_34 = arith.constant 0 : index
    %c0_35 = arith.constant 0 : index
    %c0_36 = arith.constant 0 : index
    %113 = vector.load %arg6[%c0_34, %c0_35, %c0_36] : memref<1x1x128xf32, #tpu.memory_space<vmem>>, vector<1x1x128xf32>
    %114 = vector.shape_cast %113 : vector<1x1x128xf32> to vector<1x128xf32>
    %115 = vector.broadcast %114 : vector<1x128xf32> to vector<48x128xf32>
    %116 = arith.mulf %112, %115 : vector<48x128xf32>
    %cst_37 = arith.constant dense<0.000000e+00> : vector<48xf32>
    %117 = vector.multi_reduction <add>, %116, %cst_37 [1] : vector<48x128xf32> to vector<48xf32>
    %118 = vector.shape_cast %117 : vector<48xf32> to vector<48x1xf32>
    %cst_38 = arith.constant 1.280000e+02 : f32
    %119 = vector.broadcast %cst_38 : f32 to vector<48x1xf32>
    %120 = arith.divf %118, %119 : vector<48x1xf32>
    %121 = vector.broadcast %120 : vector<48x1xf32> to vector<48x128xf32>
    %122 = arith.subf %116, %121 : vector<48x128xf32>
    %123 = arith.mulf %122, %122 : vector<48x128xf32>
    %cst_39 = arith.constant dense<0.000000e+00> : vector<48xf32>
    %124 = vector.multi_reduction <add>, %123, %cst_39 [1] : vector<48x128xf32> to vector<48xf32>
    %125 = vector.shape_cast %124 : vector<48xf32> to vector<48x1xf32>
    %cst_40 = arith.constant 1.280000e+02 : f32
    %126 = vector.broadcast %cst_40 : f32 to vector<48x1xf32>
    %127 = arith.divf %125, %126 : vector<48x1xf32>
    %128 = vector.broadcast %120 : vector<48x1xf32> to vector<48x128xf32>
    %129 = arith.subf %116, %128 : vector<48x128xf32>
    %cst_41 = arith.constant 9.99999974E-6 : f32
    %130 = vector.broadcast %cst_41 : f32 to vector<48x1xf32>
    %131 = arith.addf %127, %130 : vector<48x1xf32>
    %132 = math.rsqrt %131 : vector<48x1xf32>
    %133 = vector.broadcast %132 : vector<48x1xf32> to vector<48x128xf32>
    %134 = arith.mulf %129, %133 : vector<48x128xf32>
    %c0_42 = arith.constant 0 : index
    %c0_43 = arith.constant 0 : index
    %c0_44 = arith.constant 0 : index
    %135 = vector.load %arg11[%c0_42, %c0_43, %c0_44] : memref<1x1x128xf32, #tpu.memory_space<vmem>>, vector<1x1x128xf32>
    %136 = vector.shape_cast %135 : vector<1x1x128xf32> to vector<1x128xf32>
    %137 = vector.broadcast %136 : vector<1x128xf32> to vector<48x128xf32>
    %138 = arith.mulf %134, %137 : vector<48x128xf32>
    %c0_45 = arith.constant 0 : index
    %c0_46 = arith.constant 0 : index
    %c0_47 = arith.constant 0 : index
    %139 = vector.load %arg12[%c0_45, %c0_46, %c0_47] : memref<1x1x128xf32, #tpu.memory_space<vmem>>, vector<1x1x128xf32>
    %140 = vector.shape_cast %139 : vector<1x1x128xf32> to vector<1x128xf32>
    %141 = vector.broadcast %140 : vector<1x128xf32> to vector<48x128xf32>
    %142 = arith.addf %138, %141 : vector<48x128xf32>
    %143 = arith.truncf %142 : vector<48x128xf32> to vector<48x128xbf16>
    %c0_48 = arith.constant 0 : index
    %c0_49 = arith.constant 0 : index
    %c0_50 = arith.constant 0 : index
    %144 = vector.load %arg13[%c0_48, %c0_49, %c0_50] : memref<1x128x256xbf16, #tpu.memory_space<vmem>>, vector<1x128x256xbf16>
    %145 = vector.shape_cast %144 : vector<1x128x256xbf16> to vector<128x256xbf16>
    %cst_51 = arith.constant dense<0.000000e+00> : vector<48x256xf32>
    %146 = tpu.matmul %143, %145, %cst_51 {dimension_numbers = #tpu.dot_dimension_numbers<[1], [0], [0], [1], [0, 0, 1, 1], [], []>} : vector<48x128xbf16>, vector<128x256xbf16>, vector<48x256xf32> -> vector<48x256xf32>
    %c0_52 = arith.constant 0 : index
    %c0_53 = arith.constant 0 : index
    %c0_54 = arith.constant 0 : index
    %147 = vector.load %arg14[%c0_52, %c0_53, %c0_54] : memref<1x1x256xf32, #tpu.memory_space<vmem>>, vector<1x1x256xf32>
    %148 = vector.shape_cast %147 : vector<1x1x256xf32> to vector<1x256xf32>
    %149 = vector.broadcast %148 : vector<1x256xf32> to vector<48x256xf32>
    %150 = arith.addf %146, %149 : vector<48x256xf32>
    %cst_55 = arith.constant 5.000000e-01 : f32
    %151 = vector.broadcast %cst_55 : f32 to vector<48x256xf32>
    %152 = arith.mulf %151, %150 : vector<48x256xf32>
    %cst_56 = arith.constant 0.707106769 : f32
    %153 = vector.broadcast %cst_56 : f32 to vector<48x256xf32>
    %154 = arith.mulf %150, %153 : vector<48x256xf32>
    %155 = math.erf %154 : vector<48x256xf32>
    %cst_57 = arith.constant 1.000000e+00 : f32
    %156 = vector.broadcast %cst_57 : f32 to vector<48x256xf32>
    %157 = arith.addf %156, %155 : vector<48x256xf32>
    %158 = arith.mulf %152, %157 : vector<48x256xf32>
    %159 = arith.truncf %158 : vector<48x256xf32> to vector<48x256xbf16>
    %c0_58 = arith.constant 0 : index
    %c0_59 = arith.constant 0 : index
    %c0_60 = arith.constant 0 : index
    %160 = vector.load %arg15[%c0_58, %c0_59, %c0_60] : memref<1x256x128xbf16, #tpu.memory_space<vmem>>, vector<1x256x128xbf16>
    %161 = vector.shape_cast %160 : vector<1x256x128xbf16> to vector<256x128xbf16>
    %cst_61 = arith.constant dense<0.000000e+00> : vector<48x128xf32>
    %162 = tpu.matmul %159, %161, %cst_61 {dimension_numbers = #tpu.dot_dimension_numbers<[1], [0], [0], [1], [0, 0, 1, 1], [], []>} : vector<48x256xbf16>, vector<256x128xbf16>, vector<48x128xf32> -> vector<48x128xf32>
    %c0_62 = arith.constant 0 : index
    %c0_63 = arith.constant 0 : index
    %c0_64 = arith.constant 0 : index
    %163 = vector.load %arg16[%c0_62, %c0_63, %c0_64] : memref<1x1x128xf32, #tpu.memory_space<vmem>>, vector<1x1x128xf32>
    %164 = vector.shape_cast %163 : vector<1x1x128xf32> to vector<1x128xf32>
    %165 = vector.broadcast %164 : vector<1x128xf32> to vector<48x128xf32>
    %166 = arith.addf %162, %165 : vector<48x128xf32>
    %167 = arith.addf %94, %166 : vector<48x128xf32>
    %c0_65 = arith.constant 0 : index
    %c0_66 = arith.constant 0 : index
    %168 = vector.load %arg22[%c0_65, %c0_66] : memref<48x128xf32, #tpu.memory_space<vmem>>, vector<48x128xf32>
    tpu.vector_store %arg22[%c0_65, %c0_66], %167 {strides = array<i32>} : memref<48x128xf32, #tpu.memory_space<vmem>>, vector<48x128xf32>,
    %c1_i32 = arith.constant 1 : i32
    %169 = arith.cmpi eq, %arg1, %c1_i32 : i32
    %170 = arith.extui %169 : i1 to i32
    %c0_i32_67 = arith.constant 0 : i32
    %171 = arith.cmpi ne, %170, %c0_i32_67 : i32
    scf.if %171 {
      %172 = vector.shape_cast %167 : vector<48x128xf32> to vector<2x24x128xf32>
      %173 = vector.extract_strided_slice %172 {offsets = [0, 0, 0], sizes = [2, 1, 128], strides = [1, 1, 1]} : vector<2x24x128xf32> to vector<2x1x128xf32>
      %174 = vector.shape_cast %173 : vector<2x1x128xf32> to vector<2x128xf32>
      %cst_68 = arith.constant dense<0.000000e+00> : vector<2xf32>
      %175 = vector.multi_reduction <add>, %174, %cst_68 [1] : vector<2x128xf32> to vector<2xf32>
      %176 = vector.shape_cast %175 : vector<2xf32> to vector<2x1xf32>
      %cst_69 = arith.constant 1.280000e+02 : f32
      %177 = vector.broadcast %cst_69 : f32 to vector<2x1xf32>
      %178 = arith.divf %176, %177 : vector<2x1xf32>
      %179 = vector.broadcast %178 : vector<2x1xf32> to vector<2x128xf32>
      %180 = arith.subf %174, %179 : vector<2x128xf32>
      %181 = arith.mulf %180, %180 : vector<2x128xf32>
      %cst_70 = arith.constant dense<0.000000e+00> : vector<2xf32>
      %182 = vector.multi_reduction <add>, %181, %cst_70 [1] : vector<2x128xf32> to vector<2xf32>
      %183 = vector.shape_cast %182 : vector<2xf32> to vector<2x1xf32>
      %cst_71 = arith.constant 1.280000e+02 : f32
      %184 = vector.broadcast %cst_71 : f32 to vector<2x1xf32>
      %185 = arith.divf %183, %184 : vector<2x1xf32>
      %186 = vector.broadcast %178 : vector<2x1xf32> to vector<2x128xf32>
      %187 = arith.subf %174, %186 : vector<2x128xf32>
      %cst_72 = arith.constant 9.99999997E-7 : f32
      %188 = vector.broadcast %cst_72 : f32 to vector<2x1xf32>
      %189 = arith.addf %185, %188 : vector<2x1xf32>
      %190 = math.rsqrt %189 : vector<2x1xf32>
      %191 = vector.broadcast %190 : vector<2x1xf32> to vector<2x128xf32>
      %192 = arith.mulf %187, %191 : vector<2x128xf32>
      %c0_73 = arith.constant 0 : index
      %c0_74 = arith.constant 0 : index
      %193 = vector.load %arg17[%c0_73, %c0_74] : memref<1x128xf32, #tpu.memory_space<vmem>>, vector<1x128xf32>
      %194 = vector.broadcast %193 : vector<1x128xf32> to vector<2x128xf32>
      %195 = arith.mulf %192, %194 : vector<2x128xf32>
      %c0_75 = arith.constant 0 : index
      %c0_76 = arith.constant 0 : index
      %196 = vector.load %arg18[%c0_75, %c0_76] : memref<1x128xf32, #tpu.memory_space<vmem>>, vector<1x128xf32>
      %197 = vector.broadcast %196 : vector<1x128xf32> to vector<2x128xf32>
      %198 = arith.addf %195, %197 : vector<2x128xf32>
      %199 = arith.truncf %198 : vector<2x128xf32> to vector<2x128xbf16>
      %c0_77 = arith.constant 0 : index
      %c0_78 = arith.constant 0 : index
      %200 = vector.load %arg19[%c0_77, %c0_78] : memref<128x128xbf16, #tpu.memory_space<vmem>>, vector<128x128xbf16>
      %cst_79 = arith.constant dense<0.000000e+00> : vector<2x128xf32>
      %201 = tpu.matmul %199, %200, %cst_79 {dimension_numbers = #tpu.dot_dimension_numbers<[1], [0], [0], [1], [0, 0, 1, 1], [], []>} : vector<2x128xbf16>, vector<128x128xbf16>, vector<2x128xf32> -> vector<2x128xf32>
      %c0_80 = arith.constant 0 : index
      %c0_81 = arith.constant 0 : index
      %202 = vector.load %arg20[%c0_80, %c0_81] : memref<1x128xf32, #tpu.memory_space<vmem>>, vector<1x128xf32>
      %203 = vector.broadcast %202 : vector<1x128xf32> to vector<2x128xf32>
      %204 = arith.addf %201, %203 : vector<2x128xf32>
      %c0_82 = arith.constant 0 : index
      %c0_83 = arith.constant 0 : index
      %c0_84 = arith.constant 0 : index
      %205 = vector.load %arg21[%c0_82, %c0_83, %c0_84] : memref<1x2x128xf32, #tpu.memory_space<vmem>>, vector<1x2x128xf32>
      %206 = vector.shape_cast %205 : vector<1x2x128xf32> to vector<2x128xf32>
      %207 = vector.shape_cast %204 : vector<2x128xf32> to vector<1x2x128xf32>
      tpu.vector_store %arg21[%c0_82, %c0_83, %c0_84], %207 {strides = array<i32>} : memref<1x2x128xf32, #tpu.memory_space<vmem>>, vector<1x2x128xf32>,
    } else {
    }
    return
  }
  func.func @transform_0(%arg0: i32, %arg1: i32) -> (i32, i32, i32) {
    %c0_i32 = arith.constant 0 : i32
    %c0_i32_0 = arith.constant 0 : i32
    %c0_i32_1 = arith.constant 0 : i32
    return %arg0, %c0_i32, %c0_i32_0 : i32, i32, i32
  }
  func.func @transform_1(%arg0: i32, %arg1: i32) -> (i32, i32) {
    %c0_i32 = arith.constant 0 : i32
    %c0_i32_0 = arith.constant 0 : i32
    %c0_i32_1 = arith.constant 0 : i32
    return %c0_i32, %c0_i32_0 : i32, i32
  }
  func.func @transform_2(%arg0: i32, %arg1: i32) -> (i32, i32) {
    %c0_i32 = arith.constant 0 : i32
    %c0_i32_0 = arith.constant 0 : i32
    %c0_i32_1 = arith.constant 0 : i32
    return %c0_i32, %c0_i32_0 : i32, i32
  }
  func.func @transform_3(%arg0: i32, %arg1: i32) -> (i32, i32, i32) {
    %c0_i32 = arith.constant 0 : i32
    %c0_i32_0 = arith.constant 0 : i32
    %c0_i32_1 = arith.constant 0 : i32
    return %arg1, %c0_i32, %c0_i32_0 : i32, i32, i32
  }
  func.func @transform_4(%arg0: i32, %arg1: i32) -> (i32, i32, i32) {
    %c0_i32 = arith.constant 0 : i32
    %c0_i32_0 = arith.constant 0 : i32
    %c0_i32_1 = arith.constant 0 : i32
    return %arg1, %c0_i32, %c0_i32_0 : i32, i32, i32
  }
  func.func @transform_5(%arg0: i32, %arg1: i32) -> (i32, i32, i32) {
    %c0_i32 = arith.constant 0 : i32
    %c0_i32_0 = arith.constant 0 : i32
    %c0_i32_1 = arith.constant 0 : i32
    return %arg1, %c0_i32, %c0_i32_0 : i32, i32, i32
  }
  func.func @transform_6(%arg0: i32, %arg1: i32) -> (i32, i32, i32) {
    %c0_i32 = arith.constant 0 : i32
    %c0_i32_0 = arith.constant 0 : i32
    %c0_i32_1 = arith.constant 0 : i32
    return %arg1, %c0_i32, %c0_i32_0 : i32, i32, i32
  }
  func.func @transform_7(%arg0: i32, %arg1: i32) -> (i32, i32, i32) {
    %c0_i32 = arith.constant 0 : i32
    %c0_i32_0 = arith.constant 0 : i32
    %c0_i32_1 = arith.constant 0 : i32
    return %arg1, %c0_i32, %c0_i32_0 : i32, i32, i32
  }
  func.func @transform_8(%arg0: i32, %arg1: i32) -> (i32, i32, i32) {
    %c0_i32 = arith.constant 0 : i32
    %c0_i32_0 = arith.constant 0 : i32
    %c0_i32_1 = arith.constant 0 : i32
    return %arg1, %c0_i32, %c0_i32_0 : i32, i32, i32
  }
  func.func @transform_9(%arg0: i32, %arg1: i32) -> (i32, i32, i32) {
    %c0_i32 = arith.constant 0 : i32
    %c0_i32_0 = arith.constant 0 : i32
    %c0_i32_1 = arith.constant 0 : i32
    return %arg1, %c0_i32, %c0_i32_0 : i32, i32, i32
  }
  func.func @transform_10(%arg0: i32, %arg1: i32) -> (i32, i32, i32) {
    %c0_i32 = arith.constant 0 : i32
    %c0_i32_0 = arith.constant 0 : i32
    %c0_i32_1 = arith.constant 0 : i32
    return %arg1, %c0_i32, %c0_i32_0 : i32, i32, i32
  }
  func.func @transform_11(%arg0: i32, %arg1: i32) -> (i32, i32, i32) {
    %c0_i32 = arith.constant 0 : i32
    %c0_i32_0 = arith.constant 0 : i32
    %c0_i32_1 = arith.constant 0 : i32
    return %arg1, %c0_i32, %c0_i32_0 : i32, i32, i32
  }
  func.func @transform_12(%arg0: i32, %arg1: i32) -> (i32, i32, i32) {
    %c0_i32 = arith.constant 0 : i32
    %c0_i32_0 = arith.constant 0 : i32
    %c0_i32_1 = arith.constant 0 : i32
    return %arg1, %c0_i32, %c0_i32_0 : i32, i32, i32
  }
  func.func @transform_13(%arg0: i32, %arg1: i32) -> (i32, i32, i32) {
    %c0_i32 = arith.constant 0 : i32
    %c0_i32_0 = arith.constant 0 : i32
    %c0_i32_1 = arith.constant 0 : i32
    return %arg1, %c0_i32, %c0_i32_0 : i32, i32, i32
  }
  func.func @transform_14(%arg0: i32, %arg1: i32) -> (i32, i32, i32) {
    %c0_i32 = arith.constant 0 : i32
    %c0_i32_0 = arith.constant 0 : i32
    %c0_i32_1 = arith.constant 0 : i32
    return %arg1, %c0_i32, %c0_i32_0 : i32, i32, i32
  }
  func.func @transform_15(%arg0: i32, %arg1: i32) -> (i32, i32) {
    %c0_i32 = arith.constant 0 : i32
    %c0_i32_0 = arith.constant 0 : i32
    %c0_i32_1 = arith.constant 0 : i32
    return %c0_i32, %c0_i32_0 : i32, i32
  }
  func.func @transform_16(%arg0: i32, %arg1: i32) -> (i32, i32) {
    %c0_i32 = arith.constant 0 : i32
    %c0_i32_0 = arith.constant 0 : i32
    %c0_i32_1 = arith.constant 0 : i32
    return %c0_i32, %c0_i32_0 : i32, i32
  }
  func.func @transform_17(%arg0: i32, %arg1: i32) -> (i32, i32) {
    %c0_i32 = arith.constant 0 : i32
    %c0_i32_0 = arith.constant 0 : i32
    %c0_i32_1 = arith.constant 0 : i32
    return %c0_i32, %c0_i32_0 : i32, i32
  }
  func.func @transform_18(%arg0: i32, %arg1: i32) -> (i32, i32) {
    %c0_i32 = arith.constant 0 : i32
    %c0_i32_0 = arith.constant 0 : i32
    %c0_i32_1 = arith.constant 0 : i32
    return %c0_i32, %c0_i32_0 : i32, i32
  }
  func.func @transform_19(%arg0: i32, %arg1: i32) -> (i32, i32, i32) {
    %c0_i32 = arith.constant 0 : i32
    %c0_i32_0 = arith.constant 0 : i32
    %c0_i32_1 = arith.constant 0 : i32
    return %arg0, %c0_i32, %c0_i32_0 : i32, i32, i32
  }
}

</mosaic_0001>

<bundles_post_ra>
// kernel: tpu_custom_call.1
= control target key start
LH: loop header
LB: loop body
LE: loop exit
PB: predicated region body
PF: predicated region fallthrough
CT: control target
= control target key end

     0   :  { %s8340_s0 = inlined_call_operand.hbm [shape: bf16[4,24,128], index: 0, kind: input, shape index: {}]   ;;  %s8341_s1 = inlined_call_operand.hbm [shape: bf16[128,128], index: 1, kind: input, shape index: {}]   ;;  %s8342_s2 = inlined_call_operand.hbm [shape: f32[24,128], index: 2, kind: input, shape index: {}]   ;;  %s8343_s3 = inlined_call_operand.hbm [shape: f32[2,1,128], index: 3, kind: input, shape index: {}]   ;;  %s8344_s4 = inlined_call_operand.hbm [shape: f32[2,1,128], index: 4, kind: input, shape index: {}]   ;;  %s8345_s5 = inlined_call_operand.hbm [shape: bf16[2,128,384], index: 5, kind: input, shape index: {}]   ;;  %s8346_s6 = inlined_call_operand.hbm [shape: f32[2,1,384], index: 6, kind: input, shape index: {}]   ;;  %s8347_s7 = inlined_call_operand.hbm [shape: bf16[2,128,128], index: 7, kind: input, shape index: {}]   ;;  %s8348_s8 = inlined_call_operand.hbm [shape: f32[2,1,128], index: 8, kind: input, shape index: {}]   ;;  %s8349_s9 = inlined_call_operand.hbm [shape: f32[2,1,128], index: 9, kind: input, shape index: {}]   ;;  %s8350_s10 = inlined_call_operand.hbm [shape: f32[2,1,128], index: 10, kind: input, shape index: {}]   ;;  %s8351_s11 = inlined_call_operand.hbm [shape: bf16[2,128,256], index: 11, kind: input, shape index: {}]   ;;  %s8352_s12 = inlined_call_operand.hbm [shape: f32[2,1,256], index: 12, kind: input, shape index: {}]   ;;  %s8353_s13 = inlined_call_operand.hbm [shape: bf16[2,256,128], index: 13, kind: input, shape index: {}]   ;;  %s8354_s14 = inlined_call_operand.hbm [shape: f32[2,1,128], index: 14, kind: input, shape index: {}]   ;;  %s8355_s15 = inlined_call_operand.hbm [shape: f32[1,128], index: 15, kind: input, shape index: {}]   ;;  %s8356_s16 = inlined_call_operand.hbm [shape: f32[1,128], index: 16, kind: input, shape index: {}]   ;;  %s8357_s17 = inlined_call_operand.hbm [shape: bf16[128,128], index: 17, kind: input, shape index: {}]   ;;  %s8358_s18 = inlined_call_operand.hbm [shape: f32[1,128], index: 18, kind: input, shape index: {}]   ;;  %s8359_s19 = inlined_call_operand.hbm [shape: f32[2,2,128], index: 19, kind: output, shape index: {}]  }
   0x1   :  { %8418 = sst [smem:[#allocation57_spill]] %s8340_s0 }
   0x2   :  { %8419 = sst [smem:[#allocation58_spill]] %s8341_s1 }
   0x3   :  { %8420 = sst [smem:[#allocation59_spill]] %s8342_s2 }
   0x4   :  { %8421 = sst [smem:[#allocation60_spill]] %s8343_s3 }
   0x5   :  { %8422 = sst [smem:[#allocation61_spill]] %s8344_s4 }
   0x6   :  { %8423 = sst [smem:[#allocation62_spill]] %s8345_s5 }
   0x7   :  { %8424 = sst [smem:[#allocation63_spill]] %s8346_s6 }
   0x8   :  { %8425 = sst [smem:[#allocation64_spill]] %s8347_s7 }
   0x9   :  { %8426 = sst [smem:[#allocation65_spill]] %s8348_s8 }
   0xa   :  { %8427 = sst [smem:[#allocation66_spill]] %s8349_s9 }
   0xb   :  { %8428 = sst [smem:[#allocation67_spill]] %s8350_s10 }
   0xc   :  { %8429 = sst [smem:[#allocation68_spill]] %s8351_s11 }
   0xd   :  { %8430 = sst [smem:[#allocation69_spill]] %s8352_s12 }
   0xe   :  { %8431 = sst [smem:[#allocation70_spill]] %s8353_s13 }
   0xf   :  { %8432 = sst [smem:[#allocation71_spill]] %s8354_s14 }
  0x10   :  { %8433 = sst [smem:[#allocation72_spill]] %s8355_s15 }
  0x11   :  { %8434 = sst [smem:[#allocation73_spill]] %s8356_s16 }
  0x12   :  { %8435 = sst [smem:[#allocation74_spill]] %s8357_s17 }
  0x13   :  { %8436 = sst [smem:[#allocation75_spill]] %s8358_s18 }
  0x14   :  { %8437 = sst [smem:[#allocation76_spill]] %s8359_s19 }
  0x15   :  { %24 = vsyncpa [#allocation4], 0 }
  0x16   :  { %26 = vsyncpa [#allocation4 + $0x1], 0 }
  0x17   :  { %27 = vsyncpa [#allocation7], 0 }
  0x18   :  { %28 = vsyncpa [#allocation10], 0 }
  0x19   :  { %30 = vsyncpa [#allocation10 + $0x1], 0 }
  0x1a   :  { %31 = vsyncpa [#allocation13], 0 }
  0x1b   :  { %33 = vsyncpa [#allocation13 + $0x1], 0 }
  0x1c   :  { %34 = vsyncpa [#allocation16], 0 }
  0x1d   :  { %36 = vsyncpa [#allocation16 + $0x1], 0 }
  0x1e   :  { %37 = vsyncpa [#allocation19], 0 }
  0x1f   :  { %39 = vsyncpa [#allocation19 + $0x1], 0 }
  0x20   :  { %40 = vsyncpa [#allocation22], 0 }
  0x21   :  { %42 = vsyncpa [#allocation22 + $0x1], 0 }
  0x22   :  { %43 = vsyncpa [#allocation25], 0 }
  0x23   :  { %45 = vsyncpa [#allocation25 + $0x1], 0 }
  0x24   :  { %46 = vsyncpa [#allocation28], 0 }
  0x25   :  { %47 = vsyncpa [#allocation31], 0 }
  0x26   :  { %48 = vsyncpa [#allocation5], 0 }
  0x27   :  { %50 = vsyncpa [#allocation5 + $0x1], 0  ;;  %s6697_s0 = smov 0   ;;  %s6699_s30 = smov 0  }
  0x28   :  { %s6701_s20 = smov 0   ;;  %s6703_s21 = smov 0  }
  0x29   :  { %s6705_s1 = smov 0   ;;  %s6707_s22 = smov 0  }
  0x2a   :  { %s6709_s2 = smov 0   ;;  %s6711_s23 = smov 0  }
  0x2b   :  { %s6713_s24 = smov 0   ;;  %s6715_s25 = smov 0  }
  0x2c   :  { %s6717_s3 = smov 0  }
  0x2d LB: > { %8438 = sst [smem:[#allocation45_spill]] %s6523_s30  ;;  %s6751_s26 = sadd.s32 4294967295, %s6559_s3   ;;  %s6559_s3 = sphi %s6717_s3, %s56_s3   ;;  %s6555_s25 = sphi %s6715_s25, %s8540_s25   ;;  %s6551_s24 = sphi %s6713_s24, %s8545_s24   ;;  %s6547_s23 = sphi %s6711_s23, %s8538_s23   ;;  %s6543_s2 = sphi %s6709_s2, %s8544_s2   ;;  %s6539_s22 = sphi %s6707_s22, %s8543_s22   ;;  %s6535_s1 = sphi %s6705_s1, %s8537_s1   ;;  %s6531_s21 = sphi %s6703_s21, %s8536_s21   ;;  %s6527_s20 = sphi %s6701_s20, %s8542_s20   ;;  %s6523_s30 = sphi %s6699_s30, %s8541_s30   ;;  %s6519_s0 = sphi %s6697_s0, %s8535_s0  }
  0x2e   : > { %8439 = sst [smem:[#allocation46_spill]] %s6531_s21  ;;  %p8376_p0 = scmp.eq.s32.totalorder %s6559_s3, 0 }
  0x2f   : > { %8440 = sst [smem:[#allocation47_spill]] %s6535_s1  ;;  %p8375_p1 = scmp.eq.s32.totalorder %s6751_s26, 0 }
  0x30   : > { %8441 = sst [smem:[#allocation48_spill]] %s6539_s22  ;;  %p150_p2 = scmp.ne.s32.totalorder %s6527_s20, %s6523_s30 }
  0x31   : > { %8442 = sst [smem:[#allocation49_spill]] %s6543_s2  ;;  %p156_p3 = scmp.ne.s32.totalorder %s6523_s30, %s6519_s0 }
  0x32   : > { %8443 = sst [smem:[#allocation50_spill]] %s6547_s23  ;;  %p4583_p4 = scmp.ge.s32.totalorder %s6559_s3, 1 }
  0x33   : > { %8444 = sst [smem:[#allocation51_spill]] %s6555_s25  ;;  %p152_p5 = por %p150_p2, %p8376_p0 }
  0x34   : > { %8445 = sst [smem:[#allocation52_spill]] %s6751_s26  ;;  %p563_p6 = scmp.lt.s32.totalorder %s6559_s3, 5 }
  0x35   : > { %p6764_p7 = por %p156_p3, %p8375_p1  ;;  %s6561_s29 = smov [#allocation6]  }
  0x36   : > { %p6768_p8 = pnand %p4583_p4, %p563_p6  ;;  %s575_s19 = sshll.u32 %s6561_s29, 4  ;;  %s576_s19 = int_to_ptr.vmem [resolvable:$true] %s575_s19 }
  0x37   : > { %s8446_s27 = scalar_select %p6764_p7, 1, 0 }
  0x38   : > { %s8448_s28 = scalar_select %p6768_p8, 1, 0 }
  0x39   : > { %8447 = sst [smem:[#allocation53_spill]] %s8446_s27  ;;  %p5233_p9 = pneg %p6768_p8 }
  0x3a   : > { %8449 = sst [smem:[#allocation54_spill]] %s8448_s28  ;;  %p8374_p11 = scmp.lt.s32.totalorder %s6559_s3, 4 }
  0x3b   : > { %p6776_p10 = pnand %p5233_p9, %p8375_p1  ;;  %s8452_s30 = sld [smem:[#allocation58_spill]] }
  0x3c   : > { %p6783_p12 = pnand %p8374_p11, %p152_p5 }
  0x3d   : > { %s8450_s0 = scalar_select %p6776_p10, 1, 0 }
  0x3e   : > { %s8451_s23 = scalar_select %p6783_p12, 1, 0 }
  0x3f   : > { %p6795_p2 = pneg %p6776_p10 }
  0x41   : > { %s8453_s14 = smov %s8452_s30  ;;  %s5843_s12 = scalar_lea.hbm %s8452_s30, 1024 }
  0x42   : > { %p5844_p13 = scmp.ne.s32.totalorder %s8453_s14, %s5843_s12  ;;  %p5850_p5 = scmp.lt.u32.totalorder %s5843_s12, %s8453_s14 }
  0x43   : > { %s8454_s10 = scalar_select %p6795_p2, 1, 0 }
  0x44   : > { %p5846_p3 = pnand %p6795_p2, %p5844_p13 }
  0x46   : > { %p5847_p4 = pneg %p5846_p3 }
  0x48   : > { %p5852_p6 = pnand %p5850_p5, %p5847_p4 }
  0x4a   : > { %5855 = shalt.err (!%p5852_p6)
}
  0x4b   : > { %s5856_s30 = scalar_lea.vmem %s576_s19, 1024  ;;  %p5864_p0 = scmp.lt.s32.totalorder %s576_s19, %s576_s19 }
  0x4c   : > { %p5857_p9 = scmp.ne.s32.totalorder %s576_s19, %s5856_s30  ;;  %p5865_p7 = scmp.lt.s32.totalorder %s5856_s30, %s5856_s30 }
  0x4e   : > { %p5859_p11 = pnand %p5857_p9, %p6795_p2  ;;  %p5866_p8 = por %p5865_p7, %p5864_p0 }
  0x50   : > { %p5860_p1 = pneg %p5859_p11 }
  0x52   : > { %p5867_p12 = pnand %p5866_p8, %p5860_p1 }
  0x54   : > { %5870 = shalt.err (!%p5867_p12)
}
  0x55   : > { %s8389_s2 = smov 64   ;;  %s8395_s27 = smov 4  }
  0x56   : > { %5236 = dma.hbm_to_vmem [thread:$0]  (!%p6776_p10), %s8453_s14, 1024, %s576_s19, [#allocation7], %s8389_s2, %s8389_s2, %s8395_s27  }
  0x57   : > { %s6564_s12 = smov [#allocation27]   ;;  %s6565_s29 = smov [#allocation30]  }
  0x58   : > { %s602_s28 = sshll.u32 %s6564_s12, 4  ;;  %s623_s30 = sshll.u32 %s6565_s29, 4  ;;  %s603_s28 = int_to_ptr.vmem [resolvable:$true] %s602_s28  ;;  %s624_s30 = int_to_ptr.vmem [resolvable:$true] %s623_s30 }
  0x59   : > { %s8455_s15 = sld [smem:[#allocation72_spill]] }
  0x5f   : > { %s5871_s21 = scalar_lea.hbm %s8455_s15, 16 }
  0x60   : > { %p5872_p0 = scmp.ne.s32.totalorder %s8455_s15, %s5871_s21  ;;  %p5878_p8 = scmp.lt.u32.totalorder %s5871_s21, %s8455_s15 }
  0x62   : > { %p5874_p1 = pnand %p5872_p0, %p6795_p2 }
  0x64   : > { %p5875_p7 = pneg %p5874_p1 }
  0x66   : > { %p5880_p11 = pnand %p5878_p8, %p5875_p7 }
  0x68   : > { %5883 = shalt.err (!%p5880_p11)
}
  0x69   : > { %s5884_s19 = scalar_lea.vmem %s603_s28, 16  ;;  %s5891_s4 = scalar_lea.vmem %s603_s28, 32 }
  0x6a   : > { %p5885_p12 = scmp.ne.s32.totalorder %s603_s28, %s5884_s19  ;;  %p5892_p4 = scmp.lt.s32.totalorder %s603_s28, %s603_s28 }
  0x6b   : > { %p5893_p5 = scmp.lt.s32.totalorder %s5891_s4, %s5884_s19 }
  0x6c   : > { %p5887_p13 = pnand %p5885_p12, %p6795_p2 }
  0x6d   : > { %p5894_p6 = por %p5893_p5, %p5892_p4 }
  0x6e   : > { %p5888_p3 = pneg %p5887_p13 }
  0x70   : > { %p5895_p9 = pnand %p5894_p6, %p5888_p3 }
  0x72   : > { %5898 = shalt.err (!%p5895_p9)
}
  0x73   : > { %5242 = dma.hbm_to_vmem [thread:$0]  (!%p6776_p10), %s8455_s15, 16, %s603_s28, [#allocation28]  }
  0x74   : > { %s8456_s17 = sld [smem:[#allocation74_spill]] }
  0x7a   : > { %s5899_s25 = scalar_lea.hbm %s8456_s17, 1024 }
  0x7b   : > { %p5900_p0 = scmp.ne.s32.totalorder %s8456_s17, %s5899_s25  ;;  %p5906_p8 = scmp.lt.u32.totalorder %s5899_s25, %s8456_s17 }
  0x7d   : > { %p5902_p1 = pnand %p5900_p0, %p6795_p2 }
  0x7f   : > { %p5903_p7 = pneg %p5902_p1 }
  0x81   : > { %p5908_p11 = pnand %p5906_p8, %p5903_p7 }
  0x83   : > { %5911 = shalt.err (!%p5908_p11)
}
  0x84   : > { %s5912_s29 = scalar_lea.vmem %s624_s30, 1024  ;;  %p5920_p4 = scmp.lt.s32.totalorder %s624_s30, %s624_s30 }
  0x85   : > { %p5913_p12 = scmp.ne.s32.totalorder %s624_s30, %s5912_s29  ;;  %p5921_p5 = scmp.lt.s32.totalorder %s5912_s29, %s5912_s29 }
  0x87   : > { %p5915_p13 = pnand %p5913_p12, %p6795_p2  ;;  %p5922_p6 = por %p5921_p5, %p5920_p4 }
  0x89   : > { %p5916_p3 = pneg %p5915_p13 }
  0x8b   : > { %p5923_p9 = pnand %p5922_p6, %p5916_p3 }
  0x8d   : > { %5926 = shalt.err (!%p5923_p9)
}
  0x8e   : > { %5248 = dma.hbm_to_vmem [thread:$0]  (!%p6776_p10), %s8456_s17, 1024, %s624_s30, [#allocation31], %s8389_s2, %s8389_s2, %s8395_s27  }
  0x8f   : > { %s6854_s4 = sand.u32 1, %s6559_s3   ;;  %s6857_s1 = sand.u32 1, %s6527_s20  }
  0x90   : > { %s6860_s22 = sshll.u32 %s6551_s24, 4  ;;  %s8457_s25 = sld [smem:[#allocation60_spill]] }
  0x91   : > { %s673_s8 = scalar_lea.vmem [#allocation9], %s6857_s1  ;;  %s8398_s12 = scalar_lea.sflag [#allocation10], %s6854_s4 }
  0x92   : > { %s680_s30 = sshll.u32 %s673_s8, 4  ;;  %p8459_p1 = scmp.ne.s32.totalorder %s8451_s23, 0  ;;  %s6869_s30 = int_to_ptr.vmem [resolvable:$true] %s680_s30 }
  0x94   : > { %p6876_p7 = pneg %p8459_p1 }
  0x96   : > { %s8458_s26 = smov %s8457_s25  ;;  %s6866_s6 = scalar_lea.hbm %s8457_s25, %s6860_s22 }
  0x97   : > { %s5927_s29 = scalar_lea.hbm %s6866_s6, 16  ;;  %s5932_s21 = scalar_lea.hbm %s8458_s26, 32 }
  0x98   : > { %p5928_p0 = scmp.ne.s32.totalorder %s6866_s6, %s5927_s29  ;;  %p5933_p12 = scmp.lt.u32.totalorder %s6866_s6, %s8458_s26 }
  0x99   : > { %s8460_s28 = scalar_select %p6876_p7, 1, 0 }
  0x9a   : > { %p5930_p8 = pnand %p6876_p7, %p5928_p0  ;;  %p5934_p13 = scmp.lt.u32.totalorder %s5932_s21, %s5927_s29 }
  0x9b   : > { %p5936_p4 = scmp.lt.u32.totalorder %s5927_s29, %s6866_s6 }
  0x9c   : > { %p5931_p11 = pneg %p5930_p8  ;;  %p5935_p3 = por %p5934_p13, %p5933_p12 }
  0x9e   : > { %p5937_p5 = por %p5936_p4, %p5935_p3 }
  0xa0   : > { %p5938_p6 = pnand %p5937_p5, %p5931_p11 }
  0xa2   : > { %5941 = shalt.err (!%p5938_p6)
}
  0xa3   : > { %s5942_s2 = scalar_lea.vmem %s6869_s30, 16  ;;  %s6566_s19 = smov [#allocation9]  }
  0xa4   : > { %p5943_p9 = scmp.ne.s32.totalorder %s6869_s30, %s5942_s2  ;;  %s5947_s18 = sshll.u32 %s6566_s19, 4  ;;  %s5948_s18 = int_to_ptr.vmem [resolvable:$false] %s5947_s18 }
  0xa5   : > { %s5949_s25 = scalar_lea.vmem %s5948_s18, 32  ;;  %p5950_p10 = scmp.lt.s32.totalorder %s6869_s30, %s5948_s18 }
  0xa6   : > { %p5945_p0 = pnand %p5943_p9, %p6876_p7  ;;  %p5951_p2 = scmp.lt.s32.totalorder %s5949_s25, %s5942_s2 }
  0xa8   : > { %p5946_p8 = pneg %p5945_p0  ;;  %p5952_p12 = por %p5951_p2, %p5950_p10 }
  0xaa   : > { %p5953_p13 = pnand %p5952_p12, %p5946_p8 }
  0xac   : > { %5956 = shalt.err (!%p5953_p13)
}
  0xad   : > { %5258 = dma.hbm_to_vmem [thread:$0]  (!%p8459_p1), %s6866_s6, 16, %s6869_s30, %s8398_s12  }
  0xae   : > { %s5174_s29 = smul.u32 192, %s6857_s1  ;;  %s8461_s5 = sld [smem:[#allocation62_spill]] }
  0xaf   : > { %s5175_s21 = smul.u32 3072, %s6551_s24  ;;  %s4598_s27 = sshll.u32 %s6857_s1, 6 }
  0xb0   : > { %s708_s18 = scalar_lea.vmem [#allocation12], %s5174_s29  ;;  %s8400_s14 = scalar_lea.sflag [#allocation13], %s6854_s4 }
  0xb1   : > { %s715_s25 = sshll.u32 %s708_s18, 4  ;;  %s6908_s25 = int_to_ptr.vmem [resolvable:$true] %s715_s25 }
  0xb4   : > { %s6906_s2 = scalar_lea.hbm %s8461_s5, %s5175_s21  ;;  %s5962_s21 = scalar_lea.hbm %s8461_s5, 6144 }
  0xb5   : > { %s5957_s15 = scalar_lea.hbm %s6906_s2, 3072  ;;  %p5963_p3 = scmp.lt.u32.totalorder %s6906_s2, %s8461_s5 }
  0xb6   : > { %p5958_p10 = scmp.ne.s32.totalorder %s6906_s2, %s5957_s15  ;;  %p5964_p4 = scmp.lt.u32.totalorder %s5962_s21, %s5957_s15 }
  0xb7   : > { %p5966_p6 = scmp.lt.u32.totalorder %s5957_s15, %s6906_s2 }
  0xb8   : > { %p5960_p2 = pnand %p5958_p10, %p6876_p7  ;;  %p5965_p5 = por %p5964_p4, %p5963_p3 }
  0xba   : > { %p5961_p11 = pneg %p5960_p2  ;;  %p5967_p9 = por %p5966_p6, %p5965_p5 }
  0xbc   : > { %p5968_p0 = pnand %p5967_p9, %p5961_p11 }
  0xbe   : > { %5971 = shalt.err (!%p5968_p0)
}
  0xbf   : > { %s5972_s29 = scalar_lea.vmem %s6908_s25, 3072  ;;  %s6567_s18 = smov [#allocation12]  }
  0xc0   : > { %p5973_p8 = scmp.ne.s32.totalorder %s6908_s25, %s5972_s29  ;;  %s5977_s6 = sshll.u32 %s6567_s18, 4  ;;  %s5978_s6 = int_to_ptr.vmem [resolvable:$false] %s5977_s6 }
  0xc1   : > { %s5979_s30 = scalar_lea.vmem %s5978_s6, 6144  ;;  %p5980_p10 = scmp.lt.s32.totalorder %s6908_s25, %s5978_s6 }
  0xc2   : > { %p5975_p12 = pnand %p5973_p8, %p6876_p7  ;;  %p5981_p2 = scmp.lt.s32.totalorder %s5979_s30, %s5972_s29 }
  0xc4   : > { %p5976_p13 = pneg %p5975_p12  ;;  %p5982_p3 = por %p5981_p2, %p5980_p10 }
  0xc6   : > { %p5983_p4 = pnand %p5982_p3, %p5976_p13 }
  0xc8   : > { %5986 = shalt.err (!%p5983_p4)
}
  0xc9   : > { %s6568_s15 = smov 192   ;;  %s6569_s21 = smov 12  }
  0xca   : > { %5264 = dma.hbm_to_vmem [thread:$0]  (!%p8459_p1), %s6906_s2, 3072, %s6908_s25, %s8400_s14, %s6568_s15, %s6568_s15, %s6569_s21  }
  0xcb   : > { %s4756_s8 = sshll.u32 %s6551_s24, 10  ;;  %s8462_s7 = sld [smem:[#allocation64_spill]] }
  0xcc   : > { %s748_s6 = scalar_lea.vmem [#allocation15], %s4598_s27  ;;  %s8399_s12 = scalar_lea.sflag [#allocation16], %s6854_s4 }
  0xcd   : > { %s755_s30 = sshll.u32 %s748_s6, 4  ;;  %s6943_s30 = int_to_ptr.vmem [resolvable:$true] %s755_s30 }
  0xd1   : > { %s6939_s29 = scalar_lea.hbm %s8462_s7, %s4756_s8  ;;  %s5992_s15 = scalar_lea.hbm %s8462_s7, 2048 }
  0xd2   : > { %s5987_s5 = scalar_lea.hbm %s6939_s29, 1024  ;;  %p5993_p9 = scmp.lt.u32.totalorder %s6939_s29, %s8462_s7 }
  0xd3   : > { %p5988_p11 = scmp.ne.s32.totalorder %s6939_s29, %s5987_s5  ;;  %p5994_p0 = scmp.lt.u32.totalorder %s5992_s15, %s5987_s5 }
  0xd4   : > { %p5996_p12 = scmp.lt.u32.totalorder %s5987_s5, %s6939_s29 }
  0xd5   : > { %p5990_p5 = pnand %p5988_p11, %p6876_p7  ;;  %p5995_p8 = por %p5994_p0, %p5993_p9 }
  0xd7   : > { %p5991_p6 = pneg %p5990_p5  ;;  %p5997_p13 = por %p5996_p12, %p5995_p8 }
  0xd9   : > { %p5998_p10 = pnand %p5997_p13, %p5991_p6 }
  0xdb   : > { %6001 = shalt.err (!%p5998_p10)
}
  0xdc   : > { %s6002_s27 = scalar_lea.vmem %s6943_s30, 1024  ;;  %s6570_s19 = smov [#allocation15]  }
  0xdd   : > { %p6003_p2 = scmp.ne.s32.totalorder %s6943_s30, %s6002_s27  ;;  %s6007_s18 = sshll.u32 %s6570_s19, 4  ;;  %s6008_s18 = int_to_ptr.vmem [resolvable:$false] %s6007_s18 }
  0xde   : > { %s6009_s6 = scalar_lea.vmem %s6008_s18, 2048  ;;  %p6010_p11 = scmp.lt.s32.totalorder %s6943_s30, %s6008_s18 }
  0xdf   : > { %p6005_p3 = pnand %p6003_p2, %p6876_p7  ;;  %p6011_p5 = scmp.lt.s32.totalorder %s6009_s6, %s6002_s27 }
  0xe1   : > { %p6006_p4 = pneg %p6005_p3  ;;  %p6012_p9 = por %p6011_p5, %p6010_p11 }
  0xe3   : > { %p6013_p0 = pnand %p6012_p9, %p6006_p4 }
  0xe5   : > { %6016 = shalt.err (!%p6013_p0)
}
  0xe6   : > { %s8463_s5 = smov 4   ;;  %s8464_s2 = smov 64  }
  0xe7   : > { %5270 = dma.hbm_to_vmem [thread:$0]  (!%p8459_p1), %s6939_s29, 1024, %s6943_s30, %s8399_s12, %s8464_s2, %s8464_s2, %s8463_s5  }
  0xe8   : > { %s8465_s9 = sld [smem:[#allocation66_spill]]  ;;  %s785_s8 = scalar_lea.vmem [#allocation18], %s6857_s1 }
  0xe9   : > { %s792_s27 = sshll.u32 %s785_s8, 4  ;;  %s8402_s19 = scalar_lea.sflag [#allocation19], %s6854_s4  ;;  %s793_s27 = int_to_ptr.vmem [resolvable:$true] %s792_s27 }
  0xee   : > { %s6976_s21 = scalar_lea.hbm %s8465_s9, %s6860_s22  ;;  %s6022_s30 = scalar_lea.hbm %s8465_s9, 32 }
  0xef   : > { %s6017_s18 = scalar_lea.hbm %s6976_s21, 16  ;;  %p6023_p13 = scmp.lt.u32.totalorder %s6976_s21, %s8465_s9 }
  0xf0   : > { %p6018_p6 = scmp.ne.s32.totalorder %s6976_s21, %s6017_s18  ;;  %p6024_p10 = scmp.lt.u32.totalorder %s6022_s30, %s6017_s18 }
  0xf1   : > { %p6026_p3 = scmp.lt.u32.totalorder %s6017_s18, %s6976_s21 }
  0xf2   : > { %p6020_p8 = pnand %p6018_p6, %p6876_p7  ;;  %p6025_p2 = por %p6024_p10, %p6023_p13 }
  0xf4   : > { %p6021_p12 = pneg %p6020_p8  ;;  %p6027_p4 = por %p6026_p3, %p6025_p2 }
  0xf6   : > { %p6028_p11 = pnand %p6027_p4, %p6021_p12 }
  0xf8   : > { %6031 = shalt.err (!%p6028_p11)
}
  0xf9   : > { %s6032_s8 = scalar_lea.vmem %s793_s27, 16  ;;  %s6571_s12 = smov [#allocation18]  }
  0xfa   : > { %p6033_p5 = scmp.ne.s32.totalorder %s793_s27, %s6032_s8  ;;  %s6037_s14 = sshll.u32 %s6571_s12, 4  ;;  %s6038_s14 = int_to_ptr.vmem [resolvable:$false] %s6037_s14 }
  0xfb   : > { %s6039_s6 = scalar_lea.vmem %s6038_s14, 32  ;;  %p6040_p6 = scmp.lt.s32.totalorder %s793_s27, %s6038_s14 }
  0xfc   : > { %p6035_p9 = pnand %p6033_p5, %p6876_p7  ;;  %p6041_p8 = scmp.lt.s32.totalorder %s6039_s6, %s6032_s8 }
  0xfe   : > { %p6036_p0 = pneg %p6035_p9  ;;  %p6042_p1 = por %p6041_p8, %p6040_p6 }
 0x100   : > { %p6043_p10 = pnand %p6042_p1, %p6036_p0 }
 0x102   : > { %6046 = shalt.err (!%p6043_p10)
}
 0x103   : > { %p8466_p13 = scmp.ne.s32.totalorder %s8451_s23, 0  ;;  %s4604_s12 = sshll.u32 %s6857_s1, 7 }
 0x104   : > { %s4757_s18 = sshll.u32 %s6551_s24, 11  ;;  %s8467_s11 = sld [smem:[#allocation68_spill]] }
 0x105   : > { %5276 = dma.hbm_to_vmem [thread:$0]  (!%p8466_p13), %s6976_s21, 16, %s793_s27, %s8402_s19  }
 0x106   : > { %s820_s25 = scalar_lea.vmem [#allocation21], %s4604_s12  ;;  %s8403_s8 = scalar_lea.sflag [#allocation22], %s6854_s4 }
 0x107   : > { %s827_s15 = sshll.u32 %s820_s25, 4  ;;  %s7010_s15 = int_to_ptr.vmem [resolvable:$true] %s827_s15 }
 0x10a   : > { %s7006_s30 = scalar_lea.hbm %s8467_s11, %s4757_s18  ;;  %s6052_s14 = scalar_lea.hbm %s8467_s11, 4096 }
 0x10b   : > { %s6047_s6 = scalar_lea.hbm %s7006_s30, 2048  ;;  %p6053_p3 = scmp.lt.u32.totalorder %s7006_s30, %s8467_s11 }
 0x10c   : > { %p6048_p1 = scmp.ne.s32.totalorder %s7006_s30, %s6047_s6  ;;  %p6054_p4 = scmp.lt.u32.totalorder %s6052_s14, %s6047_s6 }
 0x10d   : > { %p6056_p5 = scmp.lt.u32.totalorder %s6047_s6, %s7006_s30 }
 0x10e   : > { %p6050_p12 = pnand %p6048_p1, %p6876_p7  ;;  %p6055_p11 = por %p6054_p4, %p6053_p3 }
 0x110   : > { %p6051_p2 = pneg %p6050_p12  ;;  %p6057_p9 = por %p6056_p5, %p6055_p11 }
 0x112   : > { %p6058_p0 = pnand %p6057_p9, %p6051_p2 }
 0x114   : > { %6061 = shalt.err (!%p6058_p0)
}
 0x115   : > { %s6062_s25 = scalar_lea.vmem %s7010_s15, 2048  ;;  %s6572_s21 = smov [#allocation21]  }
 0x116   : > { %p6063_p6 = scmp.ne.s32.totalorder %s7010_s15, %s6062_s25  ;;  %s6067_s27 = sshll.u32 %s6572_s21, 4  ;;  %s6068_s27 = int_to_ptr.vmem [resolvable:$false] %s6067_s27 }
 0x117   : > { %s6069_s19 = scalar_lea.vmem %s6068_s27, 4096  ;;  %p6070_p1 = scmp.lt.s32.totalorder %s7010_s15, %s6068_s27 }
 0x118   : > { %p6065_p8 = pnand %p6063_p6, %p6876_p7  ;;  %p6071_p12 = scmp.lt.s32.totalorder %s6069_s19, %s6062_s25 }
 0x11a   : > { %p6066_p10 = pneg %p6065_p8  ;;  %p6072_p3 = por %p6071_p12, %p6070_p1 }
 0x11c   : > { %p6073_p4 = pnand %p6072_p3, %p6066_p10 }
 0x11e   : > { %6076 = shalt.err (!%p6073_p4)
}
 0x11f   : > { %s6573_s6 = smov 128   ;;  %s6574_s14 = smov 8  }
 0x120   : > { %5282 = dma.hbm_to_vmem [thread:$0]  (!%p8466_p13), %s7006_s30, 2048, %s7010_s15, %s8403_s8, %s6573_s6, %s6573_s6, %s6574_s14  }
 0x121   : > { %s8468_s13 = sld [smem:[#allocation70_spill]]  ;;  %s860_s27 = scalar_lea.vmem [#allocation24], %s4604_s12 }
 0x122   : > { %s867_s19 = sshll.u32 %s860_s27, 4  ;;  %s6575_s7 = smov [#allocation8]   ;;  %s7048_s19 = int_to_ptr.vmem [resolvable:$true] %s867_s19 }
 0x123   : > { %s7050_s9 = sshll.u32 %s6575_s7, 4  ;;  %s8405_s11 = scalar_lea.sflag [#allocation25], %s6854_s4  ;;  %s589_s9 = int_to_ptr.vmem [resolvable:$true] %s7050_s9 }
 0x127   : > { %s7044_s21 = scalar_lea.hbm %s8468_s13, %s4757_s18  ;;  %s6082_s29 = scalar_lea.hbm %s8468_s13, 4096 }
 0x128   : > { %s6077_s30 = scalar_lea.hbm %s7044_s21, 2048  ;;  %p6083_p9 = scmp.lt.u32.totalorder %s7044_s21, %s8468_s13 }
 0x129   : > { %p6078_p2 = scmp.ne.s32.totalorder %s7044_s21, %s6077_s30  ;;  %p6084_p0 = scmp.lt.u32.totalorder %s6082_s29, %s6077_s30 }
 0x12a   : > { %p6086_p8 = scmp.lt.u32.totalorder %s6077_s30, %s7044_s21 }
 0x12b   : > { %p6080_p11 = pnand %p6078_p2, %p6876_p7  ;;  %p6085_p6 = por %p6084_p0, %p6083_p9 }
 0x12d   : > { %p6081_p5 = pneg %p6080_p11  ;;  %p6087_p10 = por %p6086_p8, %p6085_p6 }
 0x12f   : > { %p6088_p1 = pnand %p6087_p10, %p6081_p5 }
 0x131   : > { %6091 = shalt.err (!%p6088_p1)
}
 0x132   : > { %s6092_s7 = scalar_lea.vmem %s7048_s19, 2048  ;;  %s6576_s12 = smov [#allocation24]  }
 0x133   : > { %p6093_p12 = scmp.ne.s32.totalorder %s7048_s19, %s6092_s7  ;;  %s6097_s27 = sshll.u32 %s6576_s12, 4  ;;  %s6098_s27 = int_to_ptr.vmem [resolvable:$false] %s6097_s27 }
 0x134   : > { %s6099_s8 = scalar_lea.vmem %s6098_s27, 4096  ;;  %p6100_p2 = scmp.lt.s32.totalorder %s7048_s19, %s6098_s27 }
 0x135   : > { %p6095_p3 = pnand %p6093_p12, %p6876_p7  ;;  %p6101_p11 = scmp.lt.s32.totalorder %s6099_s8, %s6092_s7 }
 0x137   : > { %p6096_p4 = pneg %p6095_p3  ;;  %p6102_p9 = por %p6101_p11, %p6100_p2 }
 0x139   : > { %p6103_p0 = pnand %p6102_p9, %p6096_p4 }
 0x13b   : > { %6106 = shalt.err (!%p6103_p0)
}
 0x13c   : > { %5288 = dma.hbm_to_vmem [thread:$0]  (!%p8466_p13), %s7044_s21, 2048, %s7048_s19, %s8405_s11, %s8464_s2, %s8464_s2, %s8463_s5  }
 0x13d   : > { %s8469_s15 = sld [smem:[#allocation59_spill]]  ;;  %p8470_p6 = scmp.ne.s32.totalorder %s8454_s10, 0 }
 0x143   : > { %s6107_s29 = scalar_lea.hbm %s8469_s15, 384 }
 0x144   : > { %p6108_p5 = scmp.ne.s32.totalorder %s8469_s15, %s6107_s29  ;;  %p6114_p1 = scmp.lt.u32.totalorder %s6107_s29, %s8469_s15 }
 0x146   : > { %p6110_p8 = pnand %p6108_p5, %p8470_p6 }
 0x148   : > { %p6111_p10 = pneg %p6110_p8 }
 0x14a   : > { %p6116_p12 = pnand %p6114_p1, %p6111_p10 }
 0x14c   : > { %6119 = shalt.err (!%p6116_p12)
}
 0x14d   : > { %s6120_s8 = scalar_lea.vmem %s589_s9, 384  ;;  %p6128_p11 = scmp.lt.s32.totalorder %s589_s9, %s589_s9 }
 0x14e   : > { %p6121_p3 = scmp.ne.s32.totalorder %s589_s9, %s6120_s8  ;;  %p6129_p9 = scmp.lt.s32.totalorder %s6120_s8, %s6120_s8 }
 0x150   : > { %p6123_p4 = pnand %p6121_p3, %p8470_p6  ;;  %p6130_p0 = por %p6129_p9, %p6128_p11 }
 0x152   : > { %p6124_p2 = pneg %p6123_p4 }
 0x154   : > { %p6131_p13 = pnand %p6130_p0, %p6124_p2 }
 0x156   : > { %6134 = shalt.err (!%p6131_p13)
}
 0x157   : > { %p8471_p5 = scmp.ne.s32.totalorder %s8450_s0, 0  ;;  %s6577_s30 = smov [#allocation29]  }
 0x158   : > { %s613_s18 = sshll.u32 %s6577_s30, 4  ;;  %s6578_s29 = smov [#allocation32]   ;;  %s614_s18 = int_to_ptr.vmem [resolvable:$true] %s613_s18 }
 0x159   : > { %5239 = dma.hbm_to_vmem [thread:$0]  (!%p8471_p5), %s8469_s15, 384, %s589_s9, [#allocation7], %s6573_s6, %s6573_s6, %s6574_s14  }
 0x15a   : > { %s637_s25 = sshll.u32 %s6578_s29, 4  ;;  %s8472_s16 = sld [smem:[#allocation73_spill]]  ;;  %s638_s25 = int_to_ptr.vmem [resolvable:$true] %s637_s25 }
 0x160   : > { %s6135_s27 = scalar_lea.hbm %s8472_s16, 16 }
 0x161   : > { %p6136_p13 = scmp.ne.s32.totalorder %s8472_s16, %s6135_s27  ;;  %p6142_p1 = scmp.lt.u32.totalorder %s6135_s27, %s8472_s16 }
 0x163   : > { %p6138_p8 = pnand %p6136_p13, %p8470_p6 }
 0x165   : > { %p6139_p10 = pneg %p6138_p8 }
 0x167   : > { %p6144_p12 = pnand %p6142_p1, %p6139_p10 }
 0x169   : > { %6147 = shalt.err (!%p6144_p12)
}
 0x16a   : > { %s6148_s9 = scalar_lea.vmem %s614_s18, 16  ;;  %s6155_s6 = scalar_lea.vmem %s614_s18, 32 }
 0x16b   : > { %p6149_p3 = scmp.ne.s32.totalorder %s614_s18, %s6148_s9  ;;  %p6156_p11 = scmp.lt.s32.totalorder %s614_s18, %s614_s18 }
 0x16c   : > { %p6157_p9 = scmp.lt.s32.totalorder %s6155_s6, %s6148_s9 }
 0x16d   : > { %p6151_p4 = pnand %p6149_p3, %p8470_p6 }
 0x16e   : > { %p6158_p0 = por %p6157_p9, %p6156_p11 }
 0x16f   : > { %p6152_p2 = pneg %p6151_p4 }
 0x171   : > { %p6159_p7 = pnand %p6158_p0, %p6152_p2 }
 0x173   : > { %6162 = shalt.err (!%p6159_p7)
}
 0x174   : > { %5245 = dma.hbm_to_vmem [thread:$0]  (!%p8471_p5), %s8472_s16, 16, %s614_s18, [#allocation28]  }
 0x175   : > { %s8473_s30 = sld [smem:[#allocation75_spill]] }
 0x17b   : > { %s8474_s29 = smov %s8473_s30  ;;  %s6163_s7 = scalar_lea.hbm %s8473_s30, 16 }
 0x17c   : > { %p6164_p13 = scmp.ne.s32.totalorder %s8474_s29, %s6163_s7  ;;  %p6170_p7 = scmp.lt.u32.totalorder %s6163_s7, %s8474_s29 }
 0x17e   : > { %p6166_p8 = pnand %p6164_p13, %p8470_p6 }
 0x180   : > { %p6167_p10 = pneg %p6166_p8 }
 0x182   : > { %p6172_p1 = pnand %p6170_p7, %p6167_p10 }
 0x184   : > { %6175 = shalt.err (!%p6172_p1)
}
 0x185   : > { %s6176_s9 = scalar_lea.vmem %s638_s25, 16  ;;  %s6183_s18 = scalar_lea.vmem %s638_s25, 32 }
 0x186   : > { %p6177_p12 = scmp.ne.s32.totalorder %s638_s25, %s6176_s9  ;;  %p6184_p2 = scmp.lt.s32.totalorder %s638_s25, %s638_s25 }
 0x187   : > { %p6185_p11 = scmp.lt.s32.totalorder %s6183_s18, %s6176_s9 }
 0x188   : > { %p6179_p3 = pnand %p6177_p12, %p8470_p6 }
 0x189   : > { %p6186_p9 = por %p6185_p11, %p6184_p2 }
 0x18a   : > { %p6180_p4 = pneg %p6179_p3 }
 0x18c   : > { %p6187_p0 = pnand %p6186_p9, %p6180_p4 }
 0x18e   : > { %6190 = shalt.err (!%p6187_p0)
}
 0x18f   : > { %s8475_s14 = sld [smem:[#allocation51_spill]]  ;;  %s8476_s13 = sld [smem:[#allocation48_spill]] }
 0x190   : > { %s8477_s19 = sld [smem:[#allocation47_spill]]  ;;  %s8478_s10 = sld [smem:[#allocation46_spill]] }
 0x191   : > { %s8479_s30 = sld [smem:[#allocation52_spill]]  ;;  %s4582_s0 = sadd.s32 4294967294, %s6559_s3  }
 0x192   : > { %5251 = dma.hbm_to_vmem [thread:$0]  (!%p8471_p5), %s8474_s29, 16, %s638_s25, [#allocation31]  }
 0x193   : > { %s65_s7 = sadd.s32 1, %s6551_s24  ;;  %p8481_p5 = scmp.eq.s32.totalorder %s6559_s3, 0 }
 0x194   : > { %p66_p6 = scmp.ge.s32.totalorder %s65_s7, 2  ;;  %s143_s9 = sadd.s32 1, %s6527_s20 }
 0x195   : > { %s68_s12 = sadd.s32 1, %s8475_s14  ;;  %s75_s27 = sadd.s32 1, %s8476_s13 }
 0x196   : > { %p82_p13 = scmp.ne.s32.totalorder %s8476_s13, %s8477_s19  ;;  %p88_p8 = scmp.ne.s32.totalorder %s8477_s19, %s8478_s10 }
 0x197   : > { %s8547_s7 = smov (%p66_p6, %s65_s7), 0  ;;  %s8549_s12 = smov (!%p66_p6, %s68_s12), %s8475_s14 }
 0x198   : > { %8480 = sst [smem:[#allocation55_spill]] %s8547_s7  ;;  %p7153_p10 = por %p8481_p5, %p82_p13 }
 0x199   : > { %p8483_p7 = scmp.eq.s32.totalorder %s8479_s30, 0  ;;  %p70_p12 = scmp.ge.s32.totalorder %s8549_s12, 2 }
 0x19a   : > { %s140_s21 = ssub.s32 %s6551_s24, %s8547_s7  ;;  %p550_p4 = scmp.eq.s32.totalorder %s8479_s30, 3 }
 0x19b   : > { %p7162_p1 = por %p8483_p7, %p88_p8  ;;  %p141_p3 = scmp.eq.s32.totalorder %s140_s21, 0 }
 0x19c   : > { %s8551_s12 = smov (%p70_p12, %s8549_s12), 0  ;;  %p556_p11 = scmp.eq.s32.totalorder %s4582_s0, 3 }
 0x19d   : > { %s8484_s8 = scalar_select %p7162_p1, 1, 0 }
 0x19e   : > { %8485 = sst [smem:[#allocation56_spill]] %s8551_s12  ;;  %s72_s6 = ssub.s32 %s8475_s14, %s8551_s12 }
 0x19f   : > { %s7172_s18 = scalar_select %p141_p3, %s6527_s20, %s143_s9  }
 0x1a0   : > { %p73_p2 = scmp.eq.s32.totalorder %s72_s6, 0  ;;  %p7180_p9 = por %p550_p4, %p82_p13 }
 0x1a1   : > { %s648_s15 = sand.u32 1, %s8476_s13   ;;  %p7191_p0 = por %p556_p11, %p88_p8 }
 0x1a2   : > { %s8486_s11 = scalar_select %p7180_p9, 1, 0 }
 0x1a3   : > { %s8553_s13 = smov (!%p73_p2, %s8476_s13), %s75_s27  ;;  %s5172_s9 = smul.u32 24, %s648_s15 }
 0x1a4   : > { %s8487_s21 = scalar_select %p7191_p0, 1, 0 }
 0x1a5   : > { %p8488_p6 = scmp.lt.s32.totalorder %s6559_s3, 4  ;;  %s5173_s0 = smul.u32 384, %s8475_s14 }
 0x1a6   : > { %s8490_s17 = sld [smem:[#allocation57_spill]]  ;;  %s652_s19 = scalar_lea.vmem [#allocation3], %s5172_s9 }
 0x1a7   : > { %p7199_p5 = pnand %p8488_p6, %p7153_p10  ;;  %s660_s10 = sshll.u32 %s652_s19, 4  ;;  %s7209_s10 = int_to_ptr.vmem [resolvable:$true] %s660_s10 }
 0x1a8   : > { %s8491_s29 = sld [smem:[#allocation61_spill]]  ;;  %s7217_s7 = scalar_lea.sflag [#allocation4], %s648_s15 }
 0x1a9   : > { %p6193_p8 = pneg %p7199_p5 }
 0x1ac   : > { %s7207_s27 = scalar_lea.hbm %s8490_s17, %s5173_s0  ;;  %s6196_s0 = scalar_lea.hbm %s8490_s17, 768 }
 0x1ad   : > { %s6191_s14 = scalar_lea.hbm %s7207_s27, 384  ;;  %p6197_p12 = scmp.lt.u32.totalorder %s7207_s27, %s8490_s17 }
 0x1ae   : > { %s7215_s12 = scalar_lea.hbm %s8491_s29, %s6860_s22  ;;  %p6192_p13 = scmp.ne.s32.totalorder %s7207_s27, %s6191_s14 }
 0x1af   : > { %p6198_p3 = scmp.lt.u32.totalorder %s6196_s0, %s6191_s14  ;;  %p6200_p2 = scmp.lt.u32.totalorder %s6191_s14, %s7207_s27 }
 0x1b0   : > { %p6194_p10 = pnand %p6193_p8, %p6192_p13 }
 0x1b1   : > { %p6199_p4 = por %p6198_p3, %p6197_p12 }
 0x1b2   : > { %p6195_p7 = pneg %p6194_p10 }
 0x1b3   : > { %p6201_p11 = por %p6200_p2, %p6199_p4 }
 0x1b5   : > { %p6202_p6 = pnand %p6201_p11, %p6195_p7 }
 0x1b7   : > { %6205 = shalt.err (!%p6202_p6)
}
 0x1b8   : > { %s6206_s26 = scalar_lea.vmem %s7209_s10, 384  ;;  %s6579_s15 = smov [#allocation3]  }
 0x1b9   : > { %p6207_p13 = scmp.ne.s32.totalorder %s7209_s10, %s6206_s26  ;;  %s6211_s25 = sshll.u32 %s6579_s15, 4  ;;  %s6212_s25 = int_to_ptr.vmem [resolvable:$false] %s6211_s25 }
 0x1ba   : > { %s6213_s16 = scalar_lea.vmem %s6212_s25, 768  ;;  %p6214_p9 = scmp.lt.s32.totalorder %s7209_s10, %s6212_s25 }
 0x1bb   : > { %p6209_p10 = pnand %p6207_p13, %p6193_p8  ;;  %p6215_p12 = scmp.lt.s32.totalorder %s6213_s16, %s6206_s26 }
 0x1bd   : > { %p6210_p0 = pneg %p6209_p10  ;;  %p6216_p3 = por %p6215_p12, %p6214_p9 }
 0x1bf   : > { %p6217_p4 = pnand %p6216_p3, %p6210_p0 }
 0x1c1   : > { %6220 = shalt.err (!%p6217_p4)
}
 0x1c2   : > { %5255 = dma.hbm_to_vmem [thread:$0]  (!%p7199_p5), %s7207_s27, 384, %s7209_s10, %s7217_s7, %s8464_s2, %s8464_s2, %s8463_s5  }
 0x1c3   : > { %s690_s14 = scalar_lea.vmem [#allocation11], %s6857_s1  ;;  %s5176_s0 = smul.u32 3, %s6857_s1 }
 0x1c4   : > { %s697_s9 = sshll.u32 %s690_s14, 4  ;;  %s5177_s30 = smul.u32 48, %s6551_s24  ;;  %s698_s9 = int_to_ptr.vmem [resolvable:$true] %s697_s9 }
 0x1c5   : > { %s6221_s6 = scalar_lea.hbm %s7215_s12, 16  ;;  %p8492_p0 = scmp.ne.s32.totalorder %s8460_s28, 0 }
 0x1c6   : > { %p6222_p9 = scmp.ne.s32.totalorder %s7215_s12, %s6221_s6  ;;  %s6226_s15 = scalar_lea.hbm %s8491_s29, 32 }
 0x1c7   : > { %p6227_p2 = scmp.lt.u32.totalorder %s7215_s12, %s8491_s29  ;;  %p6228_p11 = scmp.lt.u32.totalorder %s6226_s15, %s6221_s6 }
 0x1c8   : > { %p6224_p8 = pnand %p6222_p9, %p8492_p0  ;;  %p6230_p6 = scmp.lt.u32.totalorder %s6221_s6, %s7215_s12 }
 0x1c9   : > { %p6229_p5 = por %p6228_p11, %p6227_p2 }
 0x1ca   : > { %p6225_p7 = pneg %p6224_p8 }
 0x1cb   : > { %p6231_p13 = por %p6230_p6, %p6229_p5 }
 0x1cd   : > { %p6232_p10 = pnand %p6231_p13, %p6225_p7 }
 0x1cf   : > { %6235 = shalt.err (!%p6232_p10)
}
 0x1d0   : > { %s6236_s5 = scalar_lea.vmem %s698_s9, 16  ;;  %s6580_s2 = smov [#allocation11]  }
 0x1d1   : > { %p6237_p12 = scmp.ne.s32.totalorder %s698_s9, %s6236_s5  ;;  %s6241_s7 = sshll.u32 %s6580_s2, 4  ;;  %s6242_s7 = int_to_ptr.vmem [resolvable:$false] %s6241_s7 }
 0x1d2   : > { %s6243_s27 = scalar_lea.vmem %s6242_s7, 32  ;;  %p6244_p9 = scmp.lt.s32.totalorder %s698_s9, %s6242_s7 }
 0x1d3   : > { %p6239_p3 = pnand %p6237_p12, %p8492_p0  ;;  %p6245_p8 = scmp.lt.s32.totalorder %s6243_s27, %s6236_s5 }
 0x1d5   : > { %p6240_p4 = pneg %p6239_p3  ;;  %p6246_p1 = por %p6245_p8, %p6244_p9 }
 0x1d7   : > { %p6247_p2 = pnand %p6246_p1, %p6240_p4 }
 0x1d9   : > { %6250 = shalt.err (!%p6247_p2)
}
 0x1da   : > { %p8493_p11 = scmp.ne.s32.totalorder %s8451_s23, 0  ;;  %s8494_s10 = scalar_lea.sflag [#allocation10], %s6854_s4 }
 0x1db   : > { %s8495_s19 = sld [smem:[#allocation63_spill]]  ;;  %s729_s15 = scalar_lea.vmem [#allocation14], %s5176_s0 }
 0x1dc   : > { %5261 = dma.hbm_to_vmem [thread:$0]  (!%p8493_p11), %s7215_s12, 16, %s698_s9, %s8494_s10  }
 0x1dd   : > { %s737_s25 = sshll.u32 %s729_s15, 4  ;;  %s8496_s2 = sld [smem:[#allocation65_spill]]  ;;  %s738_s25 = int_to_ptr.vmem [resolvable:$true] %s737_s25 }
 0x1e1   : > { %s7273_s26 = scalar_lea.hbm %s8495_s19, %s5177_s30  ;;  %s6256_s30 = scalar_lea.hbm %s8495_s19, 96 }
 0x1e2   : > { %s6251_s17 = scalar_lea.hbm %s7273_s26, 48  ;;  %p6257_p6 = scmp.lt.u32.totalorder %s7273_s26, %s8495_s19 }
 0x1e3   : > { %s8497_s7 = smov %s8496_s2  ;;  %s7281_s27 = scalar_lea.hbm %s8496_s2, %s6860_s22 }
 0x1e4   : > { %p6252_p1 = scmp.ne.s32.totalorder %s7273_s26, %s6251_s17  ;;  %p6258_p13 = scmp.lt.u32.totalorder %s6256_s30, %s6251_s17 }
 0x1e5   : > { %p6260_p12 = scmp.lt.u32.totalorder %s6251_s17, %s7273_s26 }
 0x1e6   : > { %p6254_p7 = pnand %p6252_p1, %p8492_p0  ;;  %p6259_p10 = por %p6258_p13, %p6257_p6 }
 0x1e8   : > { %p6255_p5 = pneg %p6254_p7  ;;  %p6261_p3 = por %p6260_p12, %p6259_p10 }
 0x1ea   : > { %p6262_p4 = pnand %p6261_p3, %p6255_p5 }
 0x1ec   : > { %6265 = shalt.err (!%p6262_p4)
}
 0x1ed   : > { %s6266_s0 = scalar_lea.vmem %s738_s25, 48  ;;  %s6581_s6 = smov [#allocation14]  }
 0x1ee   : > { %p6267_p9 = scmp.ne.s32.totalorder %s738_s25, %s6266_s0  ;;  %s6271_s15 = sshll.u32 %s6581_s6, 4  ;;  %s6272_s15 = int_to_ptr.vmem [resolvable:$false] %s6271_s15 }
 0x1ef   : > { %s6273_s16 = scalar_lea.vmem %s6272_s15, 96  ;;  %p6274_p1 = scmp.lt.s32.totalorder %s738_s25, %s6272_s15 }
 0x1f0   : > { %p6269_p8 = pnand %p6267_p9, %p8492_p0  ;;  %p6275_p7 = scmp.lt.s32.totalorder %s6273_s16, %s6266_s0 }
 0x1f2   : > { %p6270_p2 = pneg %p6269_p8  ;;  %p6276_p11 = por %p6275_p7, %p6274_p1 }
 0x1f4   : > { %p6277_p6 = pnand %p6276_p11, %p6270_p2 }
 0x1f6   : > { %6280 = shalt.err (!%p6277_p6)
}
 0x1f7   : > { %p8498_p13 = scmp.ne.s32.totalorder %s8451_s23, 0  ;;  %s8499_s17 = scalar_lea.sflag [#allocation13], %s6854_s4 }
 0x1f8   : > { %s768_s5 = scalar_lea.vmem [#allocation17], %s6857_s1  ;;  %s8500_s30 = sld [smem:[#allocation67_spill]] }
 0x1f9   : > { %5267 = dma.hbm_to_vmem [thread:$0]  (!%p8498_p13), %s7273_s26, 48, %s738_s25, %s8499_s17  }
 0x1fa   : > { %s775_s2 = sshll.u32 %s768_s5, 4  ;;  %s6281_s0 = scalar_lea.hbm %s7281_s27, 16  ;;  %s776_s2 = int_to_ptr.vmem [resolvable:$true] %s775_s2 }
 0x1fb   : > { %p6282_p11 = scmp.ne.s32.totalorder %s7281_s27, %s6281_s0  ;;  %s6286_s16 = scalar_lea.hbm %s8497_s7, 32 }
 0x1fc   : > { %p6287_p12 = scmp.lt.u32.totalorder %s7281_s27, %s8497_s7  ;;  %p6288_p3 = scmp.lt.u32.totalorder %s6286_s16, %s6281_s0 }
 0x1fd   : > { %p6284_p5 = pnand %p6282_p11, %p8492_p0  ;;  %p6290_p9 = scmp.lt.u32.totalorder %s6281_s0, %s7281_s27 }
 0x1fe   : > { %s8501_s10 = smov %s8500_s30  ;;  %s7307_s14 = scalar_lea.hbm %s8500_s30, %s6860_s22 }
 0x1ff   : > { %p6285_p10 = pneg %p6284_p5  ;;  %p6289_p4 = por %p6288_p3, %p6287_p12 }
 0x201   : > { %p6291_p8 = por %p6290_p9, %p6289_p4 }
 0x203   : > { %p6292_p2 = pnand %p6291_p8, %p6285_p10 }
 0x205   : > { %6295 = shalt.err (!%p6292_p2)
}
 0x206   : > { %s6296_s26 = scalar_lea.vmem %s776_s2, 16  ;;  %s6582_s25 = smov [#allocation17]  }
 0x207   : > { %p6297_p1 = scmp.ne.s32.totalorder %s776_s2, %s6296_s26  ;;  %s6301_s17 = sshll.u32 %s6582_s25, 4  ;;  %s6302_s17 = int_to_ptr.vmem [resolvable:$false] %s6301_s17 }
 0x208   : > { %s6303_s5 = scalar_lea.vmem %s6302_s17, 32  ;;  %p6304_p11 = scmp.lt.s32.totalorder %s776_s2, %s6302_s17 }
 0x209   : > { %p6299_p7 = pnand %p6297_p1, %p8492_p0  ;;  %p6305_p5 = scmp.lt.s32.totalorder %s6303_s5, %s6296_s26 }
 0x20b   : > { %p6300_p6 = pneg %p6299_p7  ;;  %p6306_p13 = por %p6305_p5, %p6304_p11 }
 0x20d   : > { %p6307_p3 = pnand %p6306_p13, %p6300_p6 }
 0x20f   : > { %6310 = shalt.err (!%p6307_p3)
}
 0x210   : > { %p8502_p12 = scmp.ne.s32.totalorder %s8451_s23, 0  ;;  %s8503_s29 = scalar_lea.sflag [#allocation16], %s6854_s4 }
 0x211   : > { %s802_s19 = scalar_lea.vmem [#allocation20], %s6857_s1  ;;  %s4607_s9 = sshll.u32 %s6857_s1, 1 }
 0x212   : > { %5273 = dma.hbm_to_vmem [thread:$0]  (!%p8502_p12), %s7281_s27, 16, %s776_s2, %s8503_s29  }
 0x213   : > { %s809_s12 = sshll.u32 %s802_s19, 4  ;;  %s6311_s30 = scalar_lea.hbm %s7307_s14, 16  ;;  %s810_s12 = int_to_ptr.vmem [resolvable:$true] %s809_s12 }
 0x214   : > { %p6312_p13 = scmp.ne.s32.totalorder %s7307_s14, %s6311_s30  ;;  %s6316_s15 = scalar_lea.hbm %s8501_s10, 32 }
 0x215   : > { %p6317_p9 = scmp.lt.u32.totalorder %s7307_s14, %s8501_s10  ;;  %p6318_p8 = scmp.lt.u32.totalorder %s6316_s15, %s6311_s30 }
 0x216   : > { %p6314_p10 = pnand %p6312_p13, %p8492_p0  ;;  %p6320_p1 = scmp.lt.u32.totalorder %s6311_s30, %s7307_s14 }
 0x217   : > { %p6319_p2 = por %p6318_p8, %p6317_p9 }
 0x218   : > { %p6315_p4 = pneg %p6314_p10 }
 0x219   : > { %p6321_p7 = por %p6320_p1, %p6319_p2 }
 0x21b   : > { %p6322_p6 = pnand %p6321_p7, %p6315_p4 }
 0x21d   : > { %6325 = shalt.err (!%p6322_p6)
}
 0x21e   : > { %s6326_s27 = scalar_lea.vmem %s810_s12, 16  ;;  %s6583_s2 = smov [#allocation20]  }
 0x21f   : > { %p6327_p11 = scmp.ne.s32.totalorder %s810_s12, %s6326_s27  ;;  %s6331_s25 = sshll.u32 %s6583_s2, 4  ;;  %s6332_s25 = int_to_ptr.vmem [resolvable:$false] %s6331_s25 }
 0x220   : > { %s6333_s17 = scalar_lea.vmem %s6332_s25, 32  ;;  %p6334_p13 = scmp.lt.s32.totalorder %s810_s12, %s6332_s25 }
 0x221   : > { %p6329_p5 = pnand %p6327_p11, %p8492_p0  ;;  %p6335_p10 = scmp.lt.s32.totalorder %s6333_s17, %s6326_s27 }
 0x223   : > { %p6330_p3 = pneg %p6329_p5  ;;  %p6336_p12 = por %p6335_p10, %p6334_p13 }
 0x225   : > { %p6337_p8 = pnand %p6336_p12, %p6330_p3 }
 0x227   : > { %6340 = shalt.err (!%p6337_p8)
}
 0x228   : > { %p8504_p9 = scmp.ne.s32.totalorder %s8451_s23, 0  ;;  %s8505_s5 = scalar_lea.sflag [#allocation19], %s6854_s4 }
 0x229   : > { %s4758_s29 = sshll.u32 %s6551_s24, 5  ;;  %s841_s19 = scalar_lea.vmem [#allocation23], %s4607_s9 }
 0x22a   : > { %5279 = dma.hbm_to_vmem [thread:$0]  (!%p8504_p9), %s7307_s14, 16, %s810_s12, %s8505_s5  }
 0x22b   : > { %s849_s30 = sshll.u32 %s841_s19, 4  ;;  %s8506_s15 = sld [smem:[#allocation69_spill]]  ;;  %s850_s30 = int_to_ptr.vmem [resolvable:$true] %s849_s30 }
 0x231   : > { %s847_s16 = scalar_lea.hbm %s8506_s15, %s4758_s29  ;;  %s6346_s25 = scalar_lea.hbm %s8506_s15, 64 }
 0x232   : > { %s6341_s26 = scalar_lea.hbm %s847_s16, 32  ;;  %p6347_p1 = scmp.lt.u32.totalorder %s847_s16, %s8506_s15 }
 0x233   : > { %p6342_p12 = scmp.ne.s32.totalorder %s847_s16, %s6341_s26  ;;  %p6348_p7 = scmp.lt.u32.totalorder %s6346_s25, %s6341_s26 }
 0x234   : > { %p6350_p11 = scmp.lt.u32.totalorder %s6341_s26, %s847_s16 }
 0x235   : > { %p6344_p4 = pnand %p6342_p12, %p8492_p0  ;;  %p6349_p6 = por %p6348_p7, %p6347_p1 }
 0x237   : > { %p6345_p2 = pneg %p6344_p4  ;;  %p6351_p5 = por %p6350_p11, %p6349_p6 }
 0x239   : > { %p6352_p3 = pnand %p6351_p5, %p6345_p2 }
 0x23b   : > { %6355 = shalt.err (!%p6352_p3)
}
 0x23c   : > { %s6356_s12 = scalar_lea.vmem %s850_s30, 32  ;;  %s6584_s9 = smov [#allocation23]  }
 0x23d   : > { %p6357_p13 = scmp.ne.s32.totalorder %s850_s30, %s6356_s12  ;;  %s6361_s5 = sshll.u32 %s6584_s9, 4  ;;  %s6362_s5 = int_to_ptr.vmem [resolvable:$false] %s6361_s5 }
 0x23e   : > { %s6363_s29 = scalar_lea.vmem %s6362_s5, 64  ;;  %p6364_p12 = scmp.lt.s32.totalorder %s850_s30, %s6362_s5 }
 0x23f   : > { %p6359_p10 = pnand %p6357_p13, %p8492_p0  ;;  %p6365_p4 = scmp.lt.s32.totalorder %s6363_s29, %s6356_s12 }
 0x241   : > { %p6360_p8 = pneg %p6359_p10  ;;  %p6366_p9 = por %p6365_p4, %p6364_p12 }
 0x243   : > { %p6367_p1 = pnand %p6366_p9, %p6360_p8 }
 0x245   : > { %6370 = shalt.err (!%p6367_p1)
}
 0x246   : > { %p8507_p7 = scmp.ne.s32.totalorder %s8451_s23, 0  ;;  %s8508_s19 = scalar_lea.sflag [#allocation22], %s6854_s4 }
 0x247   : > { %s8509_s26 = sld [smem:[#allocation71_spill]]  ;;  %s880_s2 = scalar_lea.vmem [#allocation26], %s6857_s1 }
 0x248   : > { %5285 = dma.hbm_to_vmem [thread:$0]  (!%p8507_p7), %s847_s16, 32, %s850_s30, %s8508_s19  }
 0x249   : > { %s887_s25 = sshll.u32 %s880_s2, 4  ;;  %s888_s25 = int_to_ptr.vmem [resolvable:$true] %s887_s25 }
 0x24d   : > { %s7373_s27 = scalar_lea.hbm %s8509_s26, %s6860_s22  ;;  %s6376_s30 = scalar_lea.hbm %s8509_s26, 32 }
 0x24e   : > { %s6371_s17 = scalar_lea.hbm %s7373_s27, 16  ;;  %p6377_p11 = scmp.lt.u32.totalorder %s7373_s27, %s8509_s26 }
 0x24f   : > { %p6372_p9 = scmp.ne.s32.totalorder %s7373_s27, %s6371_s17  ;;  %p6378_p5 = scmp.lt.u32.totalorder %s6376_s30, %s6371_s17 }
 0x250   : > { %p6380_p13 = scmp.lt.u32.totalorder %s6371_s17, %s7373_s27 }
 0x251   : > { %p6374_p2 = pnand %p6372_p9, %p8492_p0  ;;  %p6379_p3 = por %p6378_p5, %p6377_p11 }
 0x253   : > { %p6375_p6 = pneg %p6374_p2  ;;  %p6381_p10 = por %p6380_p13, %p6379_p3 }
 0x255   : > { %p6382_p8 = pnand %p6381_p10, %p6375_p6 }
 0x257   : > { %6385 = shalt.err (!%p6382_p8)
}
 0x258   : > { %s6386_s1 = scalar_lea.vmem %s888_s25, 16  ;;  %s6585_s22 = smov [#allocation26]  }
 0x259   : > { %p6387_p12 = scmp.ne.s32.totalorder %s888_s25, %s6386_s1  ;;  %s6391_s5 = sshll.u32 %s6585_s22, 4  ;;  %s6392_s5 = int_to_ptr.vmem [resolvable:$false] %s6391_s5 }
 0x25a   : > { %s6393_s29 = scalar_lea.vmem %s6392_s5, 32  ;;  %p6394_p9 = scmp.lt.s32.totalorder %s888_s25, %s6392_s5 }
 0x25b   : > { %p6389_p4 = pnand %p6387_p12, %p8492_p0  ;;  %p6395_p2 = scmp.lt.s32.totalorder %s6393_s29, %s6386_s1 }
 0x25d   : > { %p6390_p1 = pneg %p6389_p4  ;;  %p6396_p7 = por %p6395_p2, %p6394_p9 }
 0x25f   : > { %p6397_p5 = pnand %p6396_p7, %p6390_p1 }
 0x261   : > { %6400 = shalt.err (!%p6397_p5)
}
 0x262   : > { %p8510_p11 = scmp.ne.s32.totalorder %s8451_s23, 0  ;;  %s8511_s19 = scalar_lea.sflag [#allocation25], %s6854_s4 }
 0x263   : > { %s8512_s0 = sld [smem:[#allocation54_spill]] }
 0x264   : > { %5291 = dma.hbm_to_vmem [thread:$0]  (!%p8510_p11), %s7373_s27, 16, %s888_s25, %s8511_s19  }
 0x269   : > { %p8513_p6 = scmp.ne.s32.totalorder %s8512_s0, 0 }
 0x26a   : > { %s8514_s28 = sld [smem:[#allocation47_spill]] (!%p8513_p6)  ;;  %p8515_p0 = scmp.ne.s32.totalorder (!%p8513_p6), %s8484_s8, 0 }
 0x26b   : > { %896 = sbr.rel (%p8513_p6) target bundleno = 4398 (0x112e), region = 96 }
 0x270   : > { %s7398_s6 = sand.u32 (!%p8513_p6), 1, %s8514_s28  }
 0x271   : > { %s5178_s2 = smul.u32 (!%p8513_p6), 24, %s7398_s6  ;;  %s899_s17 = scalar_lea.sflag (!%p8513_p6), [#allocation4], %s7398_s6 }
 0x273   : > { %s7402_s14 = scalar_lea.vmem [#allocation3], %s5178_s2 }
 0x274   : > { %6474 = dma.done.wait (%p8515_p0), %s899_s17, 384  }
 0x275   : > { %6476 = vsyncadd (%p8515_p0), %s899_s17, 4294966912  ;;  %s8516_s23 = sld [smem:[#allocation52_spill]] }
 0x27b   : > { %p8517_p7 = scmp.eq.s32.totalorder %s8516_s23, 0 }
 0x27d   : > { %6478 = dma.done.wait (%p8517_p7), [#allocation7], 1408   ;;  %p8518_p3 = pmov %p8517_p7 }
 0x27e   : > { %s8519_s4 = sld [smem:[#allocation45_spill]]  ;;  %s8520_s27 = sld [smem:[#allocation53_spill]] }
 0x27f   : > { %6480 = vsyncadd (%p8518_p3), [#allocation7], 4294965888  ;;  %s7413_s25 = sand.u32 1, %s8516_s23  }
 0x280   : > { %s916_s30 = scalar_lea.sflag [#allocation10], %s7413_s25 }
 0x284   : > { %s7416_s12 = sand.u32 1, %s8519_s4   ;;  %p8521_p13 = scmp.ne.s32.totalorder %s8520_s27, 0 }
 0x285   : > { %s918_s16 = scalar_lea.vmem [#allocation9], %s7416_s12 }
 0x286   : > { %6482 = dma.done.wait (%p8521_p13), %s916_s30, 32  }
 0x287   : > { %6484 = vsyncadd (%p8521_p13), %s916_s30, 4294967264  ;;  %s5179_s8 = smul.u32 192, %s7416_s12  ;;  %s926_s9 = scalar_lea.vmem [#allocation11], %s7416_s12 }
 0x288   : > { %s932_s1 = scalar_lea.sflag [#allocation13], %s7413_s25 }
 0x289   : > { %s7427_s22 = scalar_lea.vmem [#allocation12], %s5179_s8 }
 0x28a   : > { %6486 = dma.done.wait (%p8521_p13), %s932_s1, 3120  }
 0x28b   : > { %6488 = vsyncadd (%p8521_p13), %s932_s1, 4294964176  ;;  %s5180_s5 = smul.u32 3, %s7416_s12  ;;  %s4617_s29 = sshll.u32 %s7416_s12, 6 }
 0x28c   : > { %s950_s0 = scalar_lea.sflag [#allocation16], %s7413_s25  ;;  %s7438_s28 = scalar_lea.vmem [#allocation15], %s4617_s29 }
 0x28d   : > { %s7435_s19 = scalar_lea.vmem [#allocation14], %s5180_s5 }
 0x28e   : > { %6490 = dma.done.wait (%p8521_p13), %s950_s0, 1040  }
 0x28f   : > { %6492 = vsyncadd (%p8521_p13), %s950_s0, 4294966256  ;;  %s961_s2 = scalar_lea.vmem [#allocation17], %s7416_s12  ;;  %s967_s17 = scalar_lea.sflag [#allocation19], %s7413_s25 }
 0x290   : > { %6494 = dma.done.wait (%p8521_p13), %s967_s17, 32  }
 0x291   : > { %6496 = vsyncadd (%p8521_p13), %s967_s17, 4294967264  ;;  %s4618_s30 = sshll.u32 %s7416_s12, 7  ;;  %s983_s1 = scalar_lea.sflag [#allocation22], %s7413_s25 }
 0x292   : > { %s7454_s5 = scalar_lea.vmem [#allocation21], %s4618_s30 }
 0x293   : > { %6498 = dma.done.wait (%p8521_p13), %s983_s1, 2080  }
 0x294   : > { %6500 = vsyncadd (%p8521_p13), %s983_s1, 4294965216  ;;  %s4619_s29 = sshll.u32 %s7416_s12, 1  ;;  %s1001_s17 = scalar_lea.sflag [#allocation25], %s7413_s25 }
 0x295   : > { %s7461_s0 = scalar_lea.vmem [#allocation23], %s4619_s29  ;;  %s7464_s4 = scalar_lea.vmem [#allocation24], %s4618_s30 }
 0x296   : > { %6502 = dma.done.wait (%p8521_p13), %s1001_s17, 2064  }
 0x297   : > { %6504 = vsyncadd (%p8521_p13), %s1001_s17, 4294965232  ;;  %s1012_s8 = scalar_lea.vmem [#allocation26], %s7416_s12  ;;  %p8522_p10 = pmov %p8518_p3 }
 0x298   : > { %p8523_p8 = pmov %p8518_p3 }
 0x299   : > { %6506 = dma.done.wait (%p8522_p10), [#allocation28], 32  }
 0x29a   : > { %6508 = vsyncadd (%p8523_p8), [#allocation28], 4294967264  ;;  %p8524_p12 = pmov %p8518_p3 }
 0x29b   : > { %p8525_p4 = pmov %p8518_p3 }
 0x29c   : > { %6510 = dma.done.wait (%p8524_p12), [#allocation31], 1040  }
 0x29d   : > { %6512 = vsyncadd (%p8525_p4), [#allocation31], 4294966256  ;;  %s4625_s25 = sshll.u32 %s7398_s6, 1  ;;  %s8526_s27 = sld [smem:[#allocation49_spill]] }
 0x29e   : > { %s7480_s30 = scalar_lea.vmem [#allocation33], %s4625_s25 }
 0x2a3   : > { %p4626_p1 = scmp.ne.s32.totalorder %s8526_s27, 0 }
 0x2a4   : > { %v5420_v0 = vld [vmem:[#allocation6] sm:$0xff] (!%p4626_p1)   ;;  %v6586_v1 = vmov (!%p4626_p1), 0.0   ;;  %v5421_v2 = vld [vmem:[#allocation6 + $0x8] sm:$0xff] (!%p4626_p1)   ;;  %vm6587_vm0 = vmmov (!%p4626_p1), 0   ;;  %v5422_v3 = vld [vmem:[#allocation6 + $0x10] sm:$0xff] (!%p4626_p1)  }
 0x2a5   : > { %1142 = sbr.rel (%p4626_p1) target bundleno = 934 (0x3a6), region = 176  ;;  %5132 = vmatprep.subr.bf16.mxu1 (!%p4626_p1), %v6586_v1  ;;  %4900 = vmatprep.subr.bf16.mxu0 (!%p4626_p1), %v6586_v1  ;;  %v5423_v4 = vld [vmem:[#allocation6 + $0x18] sm:$0xff] (!%p4626_p1)   ;;  %v5424_v5 = vld [vmem:[#allocation6 + $0x20] sm:$0xff] (!%p4626_p1)   ;;  %v5425_v6 = vld [vmem:[#allocation6 + $0x28] sm:$0xff] (!%p4626_p1)  }
 0x2a6   : > { %5140 = vmatpush3.bf16.msra.mxu1 (!%p4626_p1), %v5420_v0  ;;  %4901 = vmatpush3.bf16.msra.mxu0 (!%p4626_p1), %v5420_v0  ;;  %v5426_v7 = vld [vmem:[#allocation6 + $0x30] sm:$0xff] (!%p4626_p1)   ;;  %v5427_v8 = vld [vmem:[#allocation6 + $0x38] sm:$0xff] (!%p4626_p1)   ;;  %v1165_v14 = vld [vmem:[#allocation8] sm:$0xff] (!%p4626_p1) }
 0x2a7   : > { %5133 = vmatprep.subr.bf16.mxu1 (!%p4626_p1), %v6586_v1  ;;  %4902 = vmatprep.subr.bf16.mxu0 (!%p4626_p1), %v6586_v1  ;;  %v5428_v9 = vld [vmem:[%s7402_s14 + $0x8] sm:$0xff] (!%p4626_p1)   ;;  %v5429_v10 = vld [vmem:[%s7402_s14] sm:$0xff] (!%p4626_p1)   ;;  %v5430_v11 = vld [vmem:[%s7402_s14 + $0x10] sm:$0xff] (!%p4626_p1)  }
 0x2a8   : > { %4920 = vmatprep.mubr.msk.bf16.mxu1 (!%p4626_p1), %vm6587_vm0, %v6586_v1  ;;  %4916 = vmatprep.mubr.msk.bf16.mxu0 (!%p4626_p1), %vm6587_vm0, %v6586_v1  ;;  %v1167_v12 = vld [vmem:[#allocation8 + $0x10] sm:$0xff] (!%p4626_p1)  ;;  %v1166_v16 = vld [vmem:[#allocation8 + $0x8] sm:$0xff] (!%p4626_p1) }
 0x2aa   : > { %5141 = vmatpush3.bf16.msra.mxu1 (!%p4626_p1), %v5421_v2  ;;  %4903 = vmatpush3.bf16.msra.mxu0 (!%p4626_p1), %v5421_v2 }
 0x2ab   : > { %5134 = vmatprep.subr.bf16.mxu1 (!%p4626_p1), %v6586_v1  ;;  %4904 = vmatprep.subr.bf16.mxu0 (!%p4626_p1), %v6586_v1 }
 0x2ae   : > { %5142 = vmatpush3.bf16.msra.mxu1 %v5422_v3  ;;  %4905 = vmatpush3.bf16.msra.mxu0 %v5422_v3 }
 0x2af   : > { %5135 = vmatprep.subr.bf16.mxu1 %v6586_v1  ;;  %4906 = vmatprep.subr.bf16.mxu0 %v6586_v1 }
 0x2b2   : > { %5143 = vmatpush3.bf16.msra.mxu1 %v5423_v4  ;;  %4907 = vmatpush3.bf16.msra.mxu0 %v5423_v4 }
 0x2b3   : > { %5136 = vmatprep.subr.bf16.mxu1 %v6586_v1  ;;  %4908 = vmatprep.subr.bf16.mxu0 %v6586_v1 }
 0x2b6   : > { %5144 = vmatpush3.bf16.msra.mxu1 %v5424_v5  ;;  %4909 = vmatpush3.bf16.msra.mxu0 %v5424_v5 }
 0x2b7   : > { %5137 = vmatprep.subr.bf16.mxu1 %v6586_v1  ;;  %4910 = vmatprep.subr.bf16.mxu0 %v6586_v1 }
 0x2ba   : > { %5145 = vmatpush3.bf16.msra.mxu1 %v5425_v6  ;;  %4911 = vmatpush3.bf16.msra.mxu0 %v5425_v6 }
 0x2bb   : > { %5138 = vmatprep.subr.bf16.mxu1 %v6586_v1  ;;  %4912 = vmatprep.subr.bf16.mxu0 %v6586_v1 }
 0x2be   : > { %5146 = vmatpush3.bf16.msra.mxu1 %v5426_v7  ;;  %4913 = vmatpush3.bf16.msra.mxu0 %v5426_v7 }
 0x2bf   : > { %5139 = vmatprep.subr.bf16.mxu1 %v6586_v1  ;;  %4914 = vmatprep.subr.bf16.mxu0 %v6586_v1 }
 0x2c2   : > { %5147 = vmatpush3.bf16.msra.mxu1 %v5427_v8  ;;  %4915 = vmatpush3.bf16.msra.mxu0 %v5427_v8 }
 0x2c5   : > { %4921 = vmatmul.mubr.bf16.vlgmr.msra.gmra.mrb[0].mxu1 %v5428_v9  ;;  %4917 = vmatmul.mubr.bf16.vlgmr.msra.gmra.mrb[0].mxu0 %v5429_v10 }
 0x2c6   : > { %4924 = vmatprep.mubr.msk.bf16.mxu1 %vm6587_vm0, %v6586_v1 }
 0x2cd   : > { %4925 = vmatmul.mubr.bf16.gmra.mrb[4].mxu1 %v5430_v11 }
 0x398   : > { %v1276_v13 = vpop.f32.mrb[0].mxu1  ;;  %v1268_v15 = vpop.f32.mrb[0].mxu0 }
 0x399   : > { %v1277_v17 = vadd.f32 %v1276_v13, %v1167_v12  ;;  %v4922_v18 = vpop.f32.mrb[1].mxu1  ;;  %v1269_v19 = vadd.f32 %v1268_v15, %v1165_v14  ;;  %v4918_v20 = vpop.f32.mrb[1].mxu0 }
 0x39a   : > { %v1279_v21 = vpop.f32.mrb[2].mxu1  ;;  %v1271_v22 = vpop.f32.mrb[2].mxu0 }
 0x39b   : > { %1293 = vst [vmem:[#allocation2 + $0x10] sm:$0xff] %v1277_v17  ;;  %v1280_v23 = vadd.f32 %v1279_v21, %v1165_v14  ;;  %v4923_v24 = vpop.f32.mrb[3].mxu1  ;;  %1291 = vst [vmem:[#allocation2] sm:$0xff] %v1269_v19  ;;  %v1272_v25 = vadd.f32 %v1271_v22, %v1166_v16  ;;  %v4919_v26 = vpop.f32.mrb[3].mxu0 }
 0x39d   : > { %1294 = vst [vmem:[#allocation2 + $0x18] sm:$0xff] %v1280_v23  ;;  %1292 = vst [vmem:[#allocation2 + $0x8] sm:$0xff] %v1272_v25 }
 0x3a0   : > { %v1284_v27 = vpop.f32.mrb[4].mxu1 }
 0x3a1   : > { %v1285_v28 = vadd.f32 %v1284_v27, %v1166_v16  ;;  %v4926_v29 = vpop.f32.mrb[5].mxu1 }
 0x3a2   : > { %v1287_v30 = vpop.f32.mrb[6].mxu1 }
 0x3a3   : > { %1295 = vst [vmem:[#allocation2 + $0x20] sm:$0xff] %v1285_v28  ;;  %v1288_v31 = vadd.f32 %v1287_v30, %v1167_v12  ;;  %v4927_v32 = vpop.f32.mrb[7].mxu1 }
 0x3a5   : > { %1296 = vst [vmem:[#allocation2 + $0x28] sm:$0xff] %v1288_v31 }
 0x3a6 PF: > { %v1297_v33 = vld [vmem:[#allocation2] sm:$0xff]  ;;  %v1299_v34 = vld [vmem:[#allocation2 + $0x10] sm:$0xff]  ;;  %v1298_v35 = vld [vmem:[#allocation2 + $0x8] sm:$0xff]  ;;  %v6588_v41 = vmov 0.0   ;;  %v6589_v24 = vmov 0   ;;  %vm6590_vm1 = vmmov 0  }
 0x3a7   : > { %1303 = vadd.xlane.f32.xlu0 %v1297_v33  ;;  %1307 = vadd.xlane.f32.xlu1 %v1299_v34  ;;  %v1300_v36 = vld [vmem:[#allocation2 + $0x18] sm:$0xff]  ;;  %v5591_v39 = vld [vmem:[%s7427_s22 + $0x4] ss:$12 sps:$4 sm:$0xff]   ;;  %v5594_v42 = vld [vmem:[%s7427_s22 + $0x8] ss:$12 sps:$4 sm:$0xff]   ;;  %vm1917_vm2 = vcmask 261120  }
 0x3a8   : > { %v5593_v40 = vld [vmem:[%s7427_s22] ss:$12 sps:$4 sm:$0xff]   ;;  %4928 = vmatprep.subr.bf16.mxu1 %v6588_v41  ;;  %v5595_v43 = vld [vmem:[%s7427_s22 + $0x1c] ss:$12 sps:$4 sm:$0xff]   ;;  %1563 = vmatprep.subr.bf16.mxu0 %v5591_v39  ;;  %v5597_v44 = vld [vmem:[%s7427_s22 + $0x18] ss:$12 sps:$4 sm:$0xff]  }
 0x3a9   : > { %1564 = vmatpush1.bf16.msra.mxu0 %v5593_v40  ;;  %4929 = vmatpush3.bf16.msra.mxu1 %v5594_v42  ;;  %v5598_v45 = vld [vmem:[%s7427_s22 + $0x20] ss:$12 sps:$4 sm:$0xff]   ;;  %v5601_v7 = vld [vmem:[%s7427_s22 + $0x30] ss:$12 sps:$4 sm:$0xff]   ;;  %v5602_v8 = vld [vmem:[%s7427_s22 + $0x38] ss:$12 sps:$4 sm:$0xff]  }
 0x3aa   : > { %v1301_v37 = vld [vmem:[#allocation2 + $0x20] sm:$0xff]  ;;  %1565 = vmatprep.subr.bf16.mxu0 %v5595_v43  ;;  %4930 = vmatprep.subr.bf16.mxu1 %v6588_v41  ;;  %v5599_v6 = vld [vmem:[%s7427_s22 + $0x34] ss:$12 sps:$4 sm:$0xff]   ;;  %v5603_v9 = vld [vmem:[%s7427_s22 + $0x4c] ss:$12 sps:$4 sm:$0xff]   ;;  %s6591_s14 = smov 96  }
 0x3ab   : > { %1305 = vadd.xlane.f32.xlu0 %v1298_v35  ;;  %1309 = vadd.xlane.f32.xlu1 %v1300_v36  ;;  %v5605_v10 = vld [vmem:[%s7427_s22 + $0x48] ss:$12 sps:$4 sm:$0xff]   ;;  %v5606_v11 = vld [vmem:[%s7427_s22 + $0x50] ss:$12 sps:$4 sm:$0xff]   ;;  %v5609_v13 = vld [vmem:[%s7427_s22 + $0x60] ss:$12 sps:$4 sm:$0xff]  }
 0x3ac   : > { %v1302_v38 = vld [vmem:[#allocation2 + $0x28] sm:$0xff]  ;;  %v5610_v14 = vld [vmem:[%s7427_s22 + $0x68] ss:$12 sps:$4 sm:$0xff]   ;;  %v5613_v16 = vld [vmem:[%s7427_s22 + $0x78] ss:$12 sps:$4 sm:$0xff]   ;;  %1595 = vmatprep.mubr.bf16.mxu0 %v6589_v24  ;;  %4944 = vmatprep.mubr.msk.bf16.mxu1 %vm6590_vm1, %v6588_v41  ;;  %s6592_s23 = smov 64  }
 0x3ad   : > { %1566 = vmatpush1.bf16.msra.mxu0 %v5597_v44  ;;  %4931 = vmatpush3.bf16.msra.mxu1 %v5598_v45  ;;  %v5607_v12 = vld [vmem:[%s7427_s22 + $0x64] ss:$12 sps:$4 sm:$0xff]   ;;  %v5611_v15 = vld [vmem:[%s7427_s22 + $0x7c] ss:$12 sps:$4 sm:$0xff]   ;;  %v5614_v17 = vld [vmem:[%s7427_s22 + $0x80] ss:$12 sps:$4 sm:$0xff]  }
 0x3ae   : > { %4932 = vmatprep.subr.bf16.mxu1 %v6588_v41  ;;  %1567 = vmatprep.subr.bf16.mxu0 %v5599_v6  ;;  %v5615_v18 = vld [vmem:[%s7427_s22 + $0x94] ss:$12 sps:$4 sm:$0xff]   ;;  %v5617_v19 = vld [vmem:[%s7427_s22 + $0x90] ss:$12 sps:$4 sm:$0xff]   ;;  %v5618_v20 = vld [vmem:[%s7427_s22 + $0x98] ss:$12 sps:$4 sm:$0xff]  }
 0x3af   : > { %1311 = vadd.xlane.f32.xlu0 %v1301_v37  ;;  %1313 = vadd.xlane.f32.xlu1 %v1302_v38  ;;  %v5619_v21 = vld [vmem:[%s7427_s22 + $0xac] ss:$12 sps:$4 sm:$0xff]   ;;  %v5621_v22 = vld [vmem:[%s7427_s22 + $0xa8] ss:$12 sps:$4 sm:$0xff]   ;;  %v5622_v23 = vld [vmem:[%s7427_s22 + $0xb0] ss:$12 sps:$4 sm:$0xff]  }
 0x3b0   : > { %v1418_v6 = vld [vmem:[%s7435_s19] sm:$0x7]  ;;  %vm2714_vm3 = vcmask 1043456   ;;  %vm2427_vm5 = vcmask 195584   ;;  %vm3243_vm6 = vcmask 523264   ;;  %vm3250_vm7 = vcmask 785408  }
 0x3b1   : > { %1568 = vmatpush1.bf16.msra.mxu0 %v5601_v7  ;;  %4933 = vmatpush3.bf16.msra.mxu1 %v5602_v8  ;;  %s8528_s22 = scalar_lea.vmem [#allocation20], %s7416_s12 }
 0x3b2   : > { %4934 = vmatprep.subr.bf16.mxu1 %v6588_v41  ;;  %1569 = vmatprep.subr.bf16.mxu0 %v5603_v9 }
 0x3b5   : > { %1570 = vmatpush1.bf16.msra.mxu0 %v5605_v10  ;;  %4935 = vmatpush3.bf16.msra.mxu1 %v5606_v11 }
 0x3b6   : > { %4936 = vmatprep.subr.bf16.mxu1 %v6588_v41  ;;  %1571 = vmatprep.subr.bf16.mxu0 %v5607_v12 }
 0x3b9   : > { %1572 = vmatpush1.bf16.msra.mxu0 %v5609_v13  ;;  %4937 = vmatpush3.bf16.msra.mxu1 %v5610_v14 }
 0x3ba   : > { %4938 = vmatprep.subr.bf16.mxu1 %v6588_v41  ;;  %1573 = vmatprep.subr.bf16.mxu0 %v5611_v15 }
 0x3bd   : > { %1574 = vmatpush1.bf16.msra.mxu0 %v5613_v16  ;;  %4939 = vmatpush3.bf16.msra.mxu1 %v5614_v17 }
 0x3be   : > { %4940 = vmatprep.subr.bf16.mxu1 %v6588_v41  ;;  %1575 = vmatprep.subr.bf16.mxu0 %v5615_v18 }
 0x3c1   : > { %1576 = vmatpush1.bf16.msra.mxu0 %v5617_v19  ;;  %4941 = vmatpush3.bf16.msra.mxu1 %v5618_v20 }
 0x3c2   : > { %1577 = vmatprep.subr.bf16.mxu0 %v5619_v21  ;;  %4942 = vmatprep.subr.bf16.mxu1 %v6588_v41 }
 0x3c5   : > { %1578 = vmatpush1.bf16.msra.mxu0 %v5621_v22  ;;  %4943 = vmatpush3.bf16.msra.mxu1 %v5622_v23 }
 0x434   : > { %v1304_v46 = vpop.xlane.xlu0 %1303  ;;  %v1308_v47 = vpop.xlane.xlu1 %1307 }
 0x435   : > { %v1316_v48 = vmul.f32 0.0078125, %v1304_v46  ;;  %v1318_v49 = vmul.f32 0.0078125, %v1308_v47  ;;  %v4638_v47 = vld [vmem:[%s918_s16] ss:$0 sm:$0xff]  ;;  %s6593_s16 = smov 32  }
 0x437   : > { %v7498_v50 = vsub.f32 %v1297_v33, %v1316_v48  ;;  %v7500_v51 = vsub.f32 %v1299_v34, %v1318_v49 }
 0x438   : > { %v1306_v52 = vpop.xlane.xlu0 %1305  ;;  %v1310_v53 = vpop.xlane.xlu1 %1309 }
 0x439   : > { %v1317_v54 = vmul.f32 0.0078125, %v1306_v52  ;;  %v1328_v55 = vmul.f32 %v7498_v50, %v7498_v50  ;;  %v1319_v56 = vmul.f32 0.0078125, %v1310_v53  ;;  %v1330_v57 = vmul.f32 %v7500_v51, %v7500_v51 }
 0x43b   : > { %1334 = vadd.xlane.f32.xlu0 %v1328_v55  ;;  %v7506_v58 = vsub.f32 %v1298_v35, %v1317_v54  ;;  %v7508_v59 = vsub.f32 %v1300_v36, %v1319_v56 }
 0x43c   : > { %v1312_v60 = vpop.xlane.xlu0 %1311  ;;  %v1314_v61 = vpop.xlane.xlu1 %1313 }
 0x43d   : > { %v1320_v62 = vmul.f32 0.0078125, %v1312_v60  ;;  %v1329_v63 = vmul.f32 %v7506_v58, %v7506_v58  ;;  %v1321_v0 = vmul.f32 0.0078125, %v1314_v61  ;;  %v1331_v1 = vmul.f32 %v7508_v59, %v7508_v59 }
 0x43f   : > { %1338 = vadd.xlane.f32.xlu0 %v1330_v57  ;;  %1336 = vadd.xlane.f32.xlu1 %v1329_v63  ;;  %v7514_v2 = vsub.f32 %v1301_v37, %v1320_v62  ;;  %v7516_v3 = vsub.f32 %v1302_v38, %v1321_v0 }
 0x441   : > { %v1332_v4 = vmul.f32 %v7514_v2, %v7514_v2  ;;  %v1333_v5 = vmul.f32 %v7516_v3, %v7516_v3 }
 0x443   : > { %1340 = vadd.xlane.f32.xlu1 %v1331_v1  ;;  %1342 = vadd.xlane.f32.xlu0 %v1332_v4  ;;  %v1420_v4 = vlaneseq }
 0x447   : > { %1344 = vadd.xlane.f32.xlu1 %v1333_v5  ;;  %v7563_v5 = vshrl.u32 %v1420_v4, 7 }
 0x449   : > { %v1430_v7 = vsub.s32 2, %v7563_v5 }
 0x44b   : > { %v7573_v9 = vrot.slane %v1418_v6, %v1430_v7 }
 0x4c8   : > { %v1335_v25 = vpop.xlane.xlu0 %1334 }
 0x4c9   : > { %v1346_v26 = vmul.f32 0.0078125, %v1335_v25 }
 0x4cb   : > { %v1352_v27 = vadd.f32 1e-05, %v1346_v26 }
 0x4cc   : > { %v1337_v28 = vpop.xlane.xlu1 %1336  ;;  %v1339_v29 = vpop.xlane.xlu0 %1338 }
 0x4cd   : > { %5671 = vrsqrt.f32 %v1352_v27  ;;  %v1347_v30 = vmul.f32 0.0078125, %v1337_v28  ;;  %v1348_v31 = vmul.f32 0.0078125, %v1339_v29 }
 0x4cf   : > { %v1353_v32 = vadd.f32 1e-05, %v1347_v30  ;;  %v1354_v33 = vadd.f32 1e-05, %v1348_v31 }
 0x4d0   : > { %v1341_v34 = vpop.xlane.xlu1 %1340  ;;  %v1343_v36 = vpop.xlane.xlu0 %1342 }
 0x4d1   : > { %5673 = vrsqrt.f32 %v1353_v32  ;;  %v1349_v35 = vmul.f32 0.0078125, %v1341_v34  ;;  %v1350_v39 = vmul.f32 0.0078125, %v1343_v36 }
 0x4d2   : > { %5675 = vrsqrt.f32 %v1354_v33 }
 0x4d3   : > { %v1355_v37 = vadd.f32 1e-05, %v1349_v35  ;;  %v1356_v44 = vadd.f32 1e-05, %v1350_v39 }
 0x4d4   : > { %v1345_v38 = vpop.xlane.xlu1 %1344 }
 0x4d5   : > { %5677 = vrsqrt.f32 %v1355_v37  ;;  %v1351_v40 = vmul.f32 0.0078125, %v1345_v38 }
 0x4d7   : > { %v5672_v42 = vpop.eup %5671  ;;  %v1357_v43 = vadd.f32 1e-05, %v1351_v40 }
 0x4d8   : > { %v1364_v45 = vmul.f32 %v5672_v42, %v7498_v50 }
 0x4d9   : > { %5679 = vrsqrt.f32 %v1357_v43 }
 0x4da   : > { %5681 = vrsqrt.f32 %v1356_v44  ;;  %v1377_v52 = vmul.f32 %v4638_v47, %v1364_v45 }
 0x4db   : > { %v5674_v46 = vpop.eup %5673 }
 0x4dc   : > { %v1365_v48 = vmul.f32 %v5674_v46, %v7506_v58  ;;  %v5676_v49 = vpop.eup %5675 }
 0x4dd   : > { %v1366_v57 = vmul.f32 %v5676_v49, %v7500_v51 }
 0x4de   : > { %v1378_v53 = vmul.f32 %v4638_v47, %v1365_v48 }
 0x4df   : > { %v5678_v54 = vpop.eup %5677  ;;  %v1379_v58 = vmul.f32 %v4638_v47, %v1366_v57 }
 0x4e0   : > { %v1383_v55 = vpack.c.bf16 %v1378_v53, %v1377_v52  ;;  %v1367_v56 = vmul.f32 %v5678_v54, %v7508_v59 }
 0x4e2   : > { %1596 = vmatmul.mubr.bf16.vlgmr.msra.gmra.mrb[0].mxu0 %v1383_v55  ;;  %4945 = vmatmul.mubr.bf16.vlgmr.msra.gmra.mrb[0].mxu1 %v1383_v55  ;;  %v1380_v50 = vmul.f32 %v4638_v47, %v1367_v56 }
 0x4e3   : > { %1605 = vmatprep.mubr.bf16.mxu0 %v6589_v24  ;;  %4948 = vmatprep.mubr.msk.bf16.mxu1 %vm6590_vm1, %v6588_v41  ;;  %v5680_v60 = vpop.eup %5679 }
 0x4e4   : > { %v5682_v61 = vpop.eup %5681  ;;  %v1384_v62 = vpack.c.bf16 %v1380_v50, %v1379_v58  ;;  %v1369_v63 = vmul.f32 %v5680_v60, %v7516_v3  ;;  %v1422_v3 = vsub.s32 0, %v7563_v5 }
 0x4e5   : > { %v1368_v59 = vmul.f32 %v5682_v61, %v7514_v2  ;;  %v1426_v2 = vsub.s32 1, %v7563_v5 }
 0x4e6   : > { %v1382_v51 = vmul.f32 %v4638_v47, %v1369_v63  ;;  %v7571_v8 = vrot.slane %v1418_v6, %v1422_v3 }
 0x4e7   : > { %v1381_v0 = vmul.f32 %v4638_v47, %v1368_v59  ;;  %v7577_v12 = vrot.slane %v1418_v6, %v1426_v2 }
 0x4e9   : > { %v1385_v1 = vpack.c.bf16 %v1382_v51, %v1381_v0 }
 0x4ea   : > { %1606 = vmatmul.mubr.bf16.gmra.mrb[4].mxu0 %v1384_v62  ;;  %4949 = vmatmul.mubr.bf16.gmra.mrb[4].mxu1 %v1384_v62 }
 0x4eb   : > { %1615 = vmatprep.mubr.bf16.mxu0 %v6589_v24  ;;  %4952 = vmatprep.mubr.msk.bf16.mxu1 %vm6590_vm1, %v6588_v41 }
 0x4f2   : > { %1616 = vmatmul.mubr.bf16.gmra.mrb[8].mxu0 %v1385_v1  ;;  %4953 = vmatmul.mubr.bf16.gmra.mrb[8].mxu1 %v1385_v1 }
 0x5b5   : > { %v1597_v10 = vpop.f32.mrb[0].mxu0  ;;  %v1660_v11 = vpop.f32.mrb[0].mxu1 }
 0x5b6   : > { %v1598_v13 = vadd.f32 %v1597_v10, %v7571_v8  ;;  %v1599_v14 = vpop.f32.mrb[1].mxu0  ;;  %v4946_v15 = vpop.f32.mrb[1].mxu1  ;;  %v1661_v18 = vadd.f32 %v1660_v11, %v7573_v9 }
 0x5b7   : > { %v1601_v16 = vpop.f32.mrb[2].mxu0  ;;  %v1663_v17 = vpop.f32.mrb[2].mxu1  ;;  %v1600_v25 = vadd.f32 %v1599_v14, %v7577_v12 }
 0x5b8   : > { %v1602_v19 = vadd.f32 %v1601_v16, %v7571_v8  ;;  %v1664_v20 = vadd.f32 %v1663_v17, %v7573_v9  ;;  %v1603_v21 = vpop.f32.mrb[3].mxu0  ;;  %v4947_v22 = vpop.f32.mrb[3].mxu1  ;;  %v7583_v23 = vmul.f32 0.17677669, %v1598_v13 }
 0x5b9   : > { %v1604_v26 = vadd.f32 %v1603_v21, %v7577_v12 }
 0x5ba   : > { %v7587_v27 = vmul.f32 0.17677669, %v1602_v19  ;;  %v7589_v28 = vpack.i.bf16 %v1664_v20, %v1661_v18  ;;  %v7597_v33 = vpack.c.bf16 %v1664_v20, %v1661_v18 }
 0x5bb   : > { %v7591_v29 = vpack.i.bf16 %v1604_v26, %v1600_v25  ;;  %v1825_v30 = vpack.c.bf16 %v1604_v26, %v1600_v25 }
 0x5bc   : > { %v1749_v31 = vpack.c.bf16 %v7587_v27, %v7583_v23  ;;  %v5501_v32 = vpack.i.bf16 %v7587_v27, %v7583_v23 }
 0x5bd   : > { %5432 = vrot.lane.b32.xlu0 %v7591_v29, %s6591_s14  ;;  %v1607_v34 = vpop.f32.mrb[4].mxu0  ;;  %v7601_v35 = vpop.f32.mrb[4].mxu1  ;;  %5148 = vmatprep.subr.msk.bf16.mxu1 %vm1917_vm2, %v1825_v30  ;;  %v1925_v36 = vsel %vm1917_vm2, %v1825_v30, 0 }
 0x5be   : > { %v1608_v37 = vadd.f32 %v1607_v34, %v7571_v8  ;;  %v1609_v38 = vpop.f32.mrb[5].mxu0  ;;  %v4950_v39 = vpop.f32.mrb[5].mxu1  ;;  %4957 = vmatpush3.bf16.xpose.msra.mxu1 %v1925_v36  ;;  %4960 = vmatprep.mubr.msk.bf16.mxu1 %vm1917_vm2, %v1749_v31  ;;  %v7648_v26 = vadd.f32 %v7601_v35, %v7573_v9 }
 0x5bf   : > { %v1610_v40 = vadd.f32 %v1609_v38, %v7577_v12  ;;  %v1611_v42 = vpop.f32.mrb[6].mxu0  ;;  %v1671_v43 = vpop.f32.mrb[6].mxu1 }
 0x5c0   : > { %v1685_v44 = vmul.f32 0.17677669, %v1608_v37  ;;  %v1613_v45 = vpop.f32.mrb[7].mxu0  ;;  %v4951_v46 = vpop.f32.mrb[7].mxu1  ;;  %v1612_v53 = vadd.f32 %v1611_v42, %v7571_v8  ;;  %v1672_v57 = vadd.f32 %v1671_v43, %v7573_v9 }
 0x5c1   : > { %v1614_v47 = vadd.f32 %v1613_v45, %v7577_v12  ;;  %5452 = vrot.lane.b32.xlu0 %v7591_v29, %s6592_s23  ;;  %v1826_v48 = vpack.c.bf16 %v1610_v40, %v1610_v40 }
 0x5c2   : > { %v5446_v49 = vpack.i.bf16 %v1685_v44, %v7587_v27  ;;  %v1686_v51 = vmul.f32 0.17677669, %v1612_v53  ;;  %v1750_v18 = vpack.c.bf16 %v1685_v44, %v1685_v44 }
 0x5c3   : > { %5149 = vmatprep.subr.msk.bf16.mxu1 %vm1917_vm2, %v1826_v48  ;;  %v5461_v52 = vpack.i.bf16 %v1614_v47, %v1610_v40  ;;  %v1928_v56 = vsel %vm1917_vm2, %v1826_v48, 0 }
 0x5c5   : > { %5462 = vrot.lane.b32.xlu0 %v5461_v52, %s6592_s23  ;;  %5437 = vrot.lane.b32.xlu1 %v5461_v52, %s6591_s14  ;;  %v1617_v54 = vpop.f32.mrb[8].mxu0  ;;  %v1676_v55 = vpop.f32.mrb[8].mxu1 }
 0x5c6   : > { %v1618_v50 = vadd.f32 %v1617_v54, %v7571_v8  ;;  %v1677_v60 = vadd.f32 %v1676_v55, %v7573_v9  ;;  %v1619_v58 = vpop.f32.mrb[9].mxu0  ;;  %v4954_v61 = vpop.f32.mrb[9].mxu1  ;;  %4959 = vmatpush3.bf16.xpose.msra.mxu1 %v1928_v56 }
 0x5c7   : > { %v1620_v62 = vadd.f32 %v1619_v58, %v7577_v12  ;;  %v1621_v63 = vpop.f32.mrb[10].mxu0  ;;  %v1679_v59 = vpop.f32.mrb[10].mxu1 }
 0x5c8   : > { %v1687_v0 = vmul.f32 0.17677669, %v1618_v50  ;;  %v1622_v1 = vadd.f32 %v1621_v63, %v7571_v8  ;;  %v1623_v6 = vpop.f32.mrb[11].mxu0  ;;  %v4955_v7 = vpop.f32.mrb[11].mxu1  ;;  %v7622_v10 = vpack.i.bf16 %v1677_v60, %v1672_v57  ;;  %v7629_v20 = vpack.c.bf16 %v1677_v60, %v1672_v57 }
 0x5c9   : > { %v1624_v11 = vadd.f32 %v1623_v6, %v7577_v12  ;;  %v5466_v13 = vpack.i.bf16 %v7583_v23, %v1620_v62  ;;  %v1827_v14 = vpack.c.bf16 %v1620_v62, %v1614_v47  ;;  %v7666_v30 = vadd.f32 %v1679_v59, %v7573_v9 }
 0x5ca   : > { %v1688_v15 = vmul.f32 0.17677669, %v1622_v1  ;;  %v1751_v16 = vpack.c.bf16 %v1687_v0, %v1686_v51  ;;  %v5506_v17 = vpack.i.bf16 %v1687_v0, %v1686_v51 }
 0x5cb   : > { %5467 = vrot.lane.b32.xlu0 %v5466_v13, %s6592_s23  ;;  %5442 = vrot.lane.b32.xlu1 %v5466_v13, %s6591_s14  ;;  %v5456_v19 = vpack.i.bf16 %v1686_v51, %v1624_v11  ;;  %v1985_v12 = vsel %vm1917_vm2, %v1827_v14, 0  ;;  %v1828_v21 = vpack.c.bf16 %v1624_v11, %v1624_v11  ;;  %v5526_v31 = vpack.i.bf16 %v7666_v30, %v1677_v60 }
 0x5cc   : > { %5150 = vmatprep.subr.msk.bf16.mxu1 %vm1917_vm2, %v1827_v14  ;;  %v5471_v8 = vpack.i.bf16 %v1688_v15, %v1687_v0  ;;  %v1752_v25 = vpack.c.bf16 %v1688_v15, %v1688_v15 }
 0x5cd   : > { %4961 = vmatmul.mubr.msk.bf16.vlgmr.msra.gmra.mrb[12].mxu1 %vm1917_vm2, %v1750_v18  ;;  %v1988_v22 = vsel %vm1917_vm2, %v1828_v21, 0 }
 0x5ce   : > { %4965 = vmatpush3.bf16.xpose.msra.mxu1 %v1985_v12  ;;  %4968 = vmatprep.mubr.msk.bf16.mxu1 %vm1917_vm2, %v1751_v16 }
 0x5cf   : > { %5482 = vrot.lane.b32.xlu0 %v7591_v29, %s6593_s16  ;;  %5447 = vrot.lane.b32.xlu1 %v5446_v49, %s6591_s14  ;;  %v5516_v29 = vpack.i.bf16 %v1672_v57, %v7648_v26 }
 0x5d0   : > { %5151 = vmatprep.subr.msk.bf16.mxu1 %vm1917_vm2, %v1828_v21 }
 0x5d3   : > { %5492 = vrot.lane.b32.xlu0 %v5461_v52, %s6593_s16  ;;  %5457 = vrot.lane.b32.xlu1 %v5456_v19, %s6591_s14 }
 0x5d6   : > { %4967 = vmatpush3.bf16.xpose.msra.mxu1 %v1988_v22 }
 0x5d7   : > { %1815 = vrot.lane.b32.xlu0 %v1620_v62, %s6593_s16  ;;  %5472 = vrot.lane.b32.xlu1 %v5471_v8, %s6591_s14 }
 0x5db   : > { %1735 = vrot.lane.b32.xlu0 %v1685_v44, %s6593_s16  ;;  %5477 = vrot.lane.b32.xlu1 %v5446_v49, %s6592_s23 }
 0x5dd   : > { %4969 = vmatmul.mubr.msk.bf16.vlgmr.msra.gmra.mrb[16].mxu1 %vm1917_vm2, %v1752_v25 }
 0x5df   : > { %5507 = vrot.lane.b32.xlu0 %v5506_v17, %s6593_s16  ;;  %5487 = vrot.lane.b32.xlu1 %v5456_v19, %s6592_s23 }
 0x5e3   : > { %5517 = vrot.lane.b32.xlu0 %v5516_v29, %s6591_s14  ;;  %5497 = vrot.lane.b32.xlu1 %v5471_v8, %s6592_s23 }
 0x5e7   : > { %5522 = vrot.lane.b32.xlu0 %v7589_v28, %s6592_s23  ;;  %5502 = vrot.lane.b32.xlu1 %v5501_v32, %s6593_s16 }
 0x5eb   : > { %5537 = vrot.lane.b32.xlu0 %v7622_v10, %s6592_s23  ;;  %1817 = vrot.lane.b32.xlu1 %v1624_v11, %s6593_s16 }
 0x5ef   : > { %1741 = vrot.lane.b32.xlu1 %v1688_v15, %s6593_s16 }
 0x5f3   : > { %5512 = vrot.lane.b32.xlu1 %v7589_v28, %s6591_s14 }
 0x5f7   : > { %5527 = vrot.lane.b32.xlu1 %v5526_v31, %s6591_s14 }
 0x5fb   : > { %1869 = vrot.lane.b32.xlu1 %v7648_v26, %s6592_s23 }
 0x5ff   : > { %5532 = vrot.lane.b32.xlu1 %v7589_v28, %s6593_s16 }
 0x62f   : > { %v5433_v23 = vpop.permute.xlu0 %5432 }
 0x630   : > { %v5435_v27 = vunpack.i.h.bf16 %v5433_v23  ;;  %v5434_v32 = vunpack.i.l.bf16 %v5433_v23 }
 0x632   : > { %v1829_v34 = vpack.c.bf16 %v5435_v27, %v5434_v32 }
 0x633   : > { %v5453_v35 = vpop.permute.xlu0 %5452 }
 0x634   : > { %5152 = vmatprep.subr.msk.bf16.mxu0 %vm1917_vm2, %v1829_v34  ;;  %v2045_v9 = vsel %vm1917_vm2, %v1829_v34, 0  ;;  %v5455_v37 = vunpack.i.h.bf16 %v5453_v35  ;;  %v5454_v38 = vunpack.i.l.bf16 %v5453_v35 }
 0x635   : > { %4973 = vmatpush3.bf16.xpose.msra.mxu0 %v2045_v9 }
 0x636   : > { %v1833_v43 = vpack.c.bf16 %v5455_v37, %v5454_v38 }
 0x637   : > { %v5438_v36 = vpop.permute.xlu1 %5437  ;;  %v5463_v40 = vpop.permute.xlu0 %5462 }
 0x638   : > { %v5439_v39 = vunpack.i.l.bf16 %v5438_v36  ;;  %v5440_v46 = vunpack.i.h.bf16 %v5438_v36  ;;  %v5464_v55 = vunpack.i.l.bf16 %v5463_v40  ;;  %v2165_v59 = vsel %vm1917_vm2, %v1833_v43, 0 }
 0x639   : > { %v5465_v0 = vunpack.i.h.bf16 %v5463_v40 }
 0x63a   : > { %v1830_v42 = vpack.c.bf16 %v5439_v39, %v5439_v39  ;;  %v1834_v62 = vpack.c.bf16 %v5464_v55, %v5464_v55 }
 0x63c   : > { %5153 = vmatprep.subr.msk.bf16.mxu0 %vm1917_vm2, %v1830_v42  ;;  %v2048_v28 = vsel %vm1917_vm2, %v1830_v42, 0  ;;  %v2168_v25 = vsel %vm1917_vm2, %v1834_v62, 0 }
 0x63d   : > { %v5443_v44 = vpop.permute.xlu1 %5442  ;;  %v5468_v45 = vpop.permute.xlu0 %5467  ;;  %4975 = vmatpush3.bf16.xpose.msra.mxu0 %v2048_v28 }
 0x63e   : > { %v5444_v47 = vunpack.i.l.bf16 %v5443_v44  ;;  %5156 = vmatprep.subr.msk.bf16.mxu0 %vm1917_vm2, %v1833_v43  ;;  %v5445_v52 = vunpack.i.h.bf16 %v5443_v44  ;;  %v5469_v63 = vunpack.i.l.bf16 %v5468_v45  ;;  %v5470_v8 = vunpack.i.h.bf16 %v5468_v45 }
 0x640   : > { %v1831_v48 = vpack.c.bf16 %v5444_v47, %v5440_v46  ;;  %v1835_v14 = vpack.c.bf16 %v5469_v63, %v5465_v0 }
 0x641   : > { %v5448_v49 = vpop.permute.xlu1 %5447  ;;  %v5483_v56 = vpop.permute.xlu0 %5482 }
 0x642   : > { %v5450_v53 = vunpack.i.h.bf16 %v5448_v49  ;;  %v5449_v54 = vunpack.i.l.bf16 %v5448_v49  ;;  %5154 = vmatprep.subr.msk.bf16.mxu1 %vm1917_vm2, %v1831_v48  ;;  %v2105_v57 = vsel %vm1917_vm2, %v1831_v48, 0  ;;  %v5485_v15 = vunpack.i.h.bf16 %v5483_v56 }
 0x643   : > { %4981 = vmatpush3.bf16.xpose.msra.mxu1 %v2105_v57  ;;  %v5484_v16 = vunpack.i.l.bf16 %v5483_v56  ;;  %v2225_v35 = vsel %vm1917_vm2, %v1835_v14, 0 }
 0x644   : > { %v1754_v50 = vpack.c.bf16 %v5450_v53, %v5450_v53  ;;  %v1753_v60 = vpack.c.bf16 %v5449_v54, %v5445_v52 }
 0x645   : > { %v5458_v58 = vpop.permute.xlu1 %5457  ;;  %v5493_v1 = vpop.permute.xlu0 %5492  ;;  %v1837_v21 = vpack.c.bf16 %v5485_v15, %v5484_v16 }
 0x646   : > { %v5459_v61 = vunpack.i.l.bf16 %v5458_v58  ;;  %4976 = vmatprep.mubr.msk.bf16.mxu0 %vm1917_vm2, %v1753_v60  ;;  %v5460_v7 = vunpack.i.h.bf16 %v5458_v58  ;;  %v5494_v34 = vunpack.i.l.bf16 %v5493_v1  ;;  %v5495_v44 = vunpack.i.h.bf16 %v5493_v1 }
 0x647   : > { %4977 = vmatmul.mubr.msk.bf16.vlgmr.msra.gmra.mrb[12].mxu0 %vm1917_vm2, %v1754_v50  ;;  %v2285_v43 = vsel %vm1917_vm2, %v1837_v21, 0 }
 0x648   : > { %v1832_v51 = vpack.c.bf16 %v5459_v61, %v5459_v61  ;;  %4989 = vmatpush3.bf16.xpose.msra.mxu0 %v2165_v59  ;;  %v1838_v42 = vpack.c.bf16 %v5494_v34, %v5494_v34 }
 0x649   : > { %5157 = vmatprep.subr.msk.bf16.mxu0 %vm1917_vm2, %v1834_v62  ;;  %v5473_v6 = vpop.permute.xlu1 %5472  ;;  %v1816_v22 = vpop.permute.xlu0 %1815 }
 0x64a   : > { %v5474_v11 = vunpack.i.l.bf16 %v5473_v6  ;;  %5155 = vmatprep.subr.msk.bf16.mxu1 %vm1917_vm2, %v1832_v51  ;;  %v2108_v13 = vsel %vm1917_vm2, %v1832_v51, 0  ;;  %v5475_v18 = vunpack.i.h.bf16 %v5473_v6  ;;  %v1839_v48 = vpack.c.bf16 %v1816_v22, %v5495_v44 }
 0x64b   : > { %4983 = vmatpush3.bf16.xpose.msra.mxu1 %v2108_v13  ;;  %v2288_v50 = vsel %vm1917_vm2, %v1838_v42, 0  ;;  %v1902_v6 = vpack.c.bf16 %v7648_v26, %v7648_v26 }
 0x64c   : > { %v1755_v17 = vpack.c.bf16 %v5474_v11, %v5460_v7  ;;  %5158 = vmatprep.subr.msk.bf16.mxu1 %vm1917_vm2, %v1835_v14  ;;  %v1756_v31 = vpack.c.bf16 %v5475_v18, %v5475_v18  ;;  %v2345_v63 = vsel %vm1917_vm2, %v1839_v48, 0 }
 0x64d   : > { %v5478_v19 = vpop.permute.xlu1 %5477  ;;  %v1736_v37 = vpop.permute.xlu0 %1735  ;;  %v2716_v13 = vsel %vm2714_vm3, %v1902_v6, 0 }
 0x64e   : > { %v5479_v12 = vunpack.i.l.bf16 %v5478_v19  ;;  %4984 = vmatprep.mubr.msk.bf16.mxu1 %vm1917_vm2, %v1755_v17  ;;  %v5480_v23 = vunpack.i.h.bf16 %v5478_v19  ;;  %v1762_v59 = vpack.c.bf16 %v1736_v37, %v1736_v37  ;;  %v1904_v17 = vpack.c.bf16 %v7666_v30, %v7666_v30 }
 0x650   : > { %v1757_v29 = vpack.c.bf16 %v5479_v12, %v5470_v8  ;;  %4991 = vmatpush3.bf16.xpose.msra.mxu0 %v2168_v25  ;;  %v1758_v36 = vpack.c.bf16 %v5480_v23, %v5480_v23  ;;  %v2773_v8 = vsel %vm2714_vm3, %v1904_v17, 0  ;;  %v7737_v12 = vand.u32 127, %v1420_v4 }
 0x651   : > { %5160 = vmatprep.subr.msk.bf16.mxu0 %vm1917_vm2, %v1837_v21  ;;  %v5488_v27 = vpop.permute.xlu1 %5487  ;;  %v5508_v49 = vpop.permute.xlu0 %5507 }
 0x652   : > { %v5489_v32 = vunpack.i.l.bf16 %v5488_v27  ;;  %4992 = vmatprep.mubr.msk.bf16.mxu0 %vm1917_vm2, %v1757_v29  ;;  %4985 = vmatmul.mubr.msk.bf16.vlgmr.msra.gmra.mrb[20].mxu1 %vm1917_vm2, %v1756_v31  ;;  %v5490_v39 = vunpack.i.h.bf16 %v5488_v27  ;;  %v5510_v56 = vunpack.i.h.bf16 %v5508_v49  ;;  %v5509_v57 = vunpack.i.l.bf16 %v5508_v49 }
 0x653   : > { %4997 = vmatpush3.bf16.xpose.msra.mxu1 %v2225_v35  ;;  %vm2400_vm4 = vcmp.lt.s32.totalorder %v7737_v12, 17 }
 0x654   : > { %v1836_v9 = vpack.c.bf16 %v5489_v32, %v5489_v32  ;;  %v1763_v61 = vpack.c.bf16 %v5510_v56, %v5509_v57 }
 0x655   : > { %v5498_v38 = vpop.permute.xlu1 %5497  ;;  %v7723_v16 = vpop.permute.xlu0 %5517 }
 0x656   : > { %v5499_v40 = vunpack.i.l.bf16 %v5498_v38  ;;  %5159 = vmatprep.subr.msk.bf16.mxu1 %vm1917_vm2, %v1836_v9  ;;  %v2228_v52 = vsel %vm1917_vm2, %v1836_v9, 0  ;;  %v5500_v54 = vunpack.i.h.bf16 %v5498_v38  ;;  %v5520_v18 = vunpack.i.h.bf16 %v7723_v16 }
 0x657   : > { %4993 = vmatmul.mubr.msk.bf16.vlgmr.msra.gmra.mrb[16].mxu0 %vm1917_vm2, %v1758_v36 }
 0x658   : > { %v1759_v28 = vpack.c.bf16 %v5499_v40, %v5490_v39  ;;  %5005 = vmatpush3.bf16.xpose.msra.mxu0 %v2285_v43  ;;  %v1760_v60 = vpack.c.bf16 %v5500_v54, %v5500_v54 }
 0x659   : > { %5161 = vmatprep.subr.msk.bf16.mxu0 %vm1917_vm2, %v1838_v42  ;;  %v5503_v45 = vpop.permute.xlu1 %5502 }
 0x65a   : > { %v5505_v46 = vunpack.i.h.bf16 %v5503_v45  ;;  %v5504_v47 = vunpack.i.l.bf16 %v5503_v45  ;;  %5000 = vmatprep.mubr.msk.bf16.mxu1 %vm1917_vm2, %v1759_v28 }
 0x65b   : > { %4999 = vmatpush3.bf16.xpose.msra.mxu1 %v2228_v52 }
 0x65c   : > { %v1761_v53 = vpack.c.bf16 %v5505_v46, %v5504_v47  ;;  %5162 = vmatprep.subr.msk.bf16.mxu1 %vm1917_vm2, %v1839_v48 }
 0x65d   : > { %v1818_v55 = vpop.permute.xlu1 %1817 }
 0x65e   : > { %5008 = vmatprep.mubr.msk.bf16.mxu0 %vm1917_vm2, %v1761_v53  ;;  %v1840_v62 = vpack.c.bf16 %v1818_v55, %v1818_v55  ;;  %v7794_v55 = vpop.permute.xlu0 %5522 }
 0x660   : > { %5007 = vmatpush3.bf16.xpose.msra.mxu0 %v2288_v50  ;;  %v2348_v7 = vsel %vm1917_vm2, %v1840_v62, 0 }
 0x661   : > { %5020 = vmatprep.subr.bf16.mxu0 %v7597_v33  ;;  %v1742_v58 = vpop.permute.xlu1 %1741 }
 0x662   : > { %5001 = vmatmul.mubr.msk.bf16.vlgmr.msra.gmra.mrb[24].mxu1 %vm1917_vm2, %v1760_v60  ;;  %v1764_v15 = vpack.c.bf16 %v1742_v58, %v1742_v58 }
 0x663   : > { %5013 = vmatpush3.bf16.xpose.msra.mxu1 %v2345_v63  ;;  %5016 = vmatprep.mubr.msk.bf16.mxu1 %vm1917_vm2, %v1763_v61 }
 0x664   : > { %5163 = vmatprep.subr.msk.bf16.mxu1 %vm1917_vm2, %v1840_v62 }
 0x665   : > { %v5513_v51 = vpop.permute.xlu1 %5512 }
 0x666   : > { %v5515_v0 = vunpack.i.h.bf16 %v5513_v51  ;;  %v5514_v1 = vunpack.i.l.bf16 %v5513_v51 }
 0x667   : > { %5009 = vmatmul.mubr.msk.bf16.vlgmr.msra.gmra.mrb[20].mxu0 %vm1917_vm2, %v1762_v59 }
 0x668   : > { %5021 = vmatpush3.bf16.msra.mxu0 %v7597_v33  ;;  %v7716_v11 = vpack.c.bf16 %v5515_v0, %v5514_v1  ;;  %v7812_v1 = vpop.permute.xlu0 %5537 }
 0x669   : > { %5164 = vmatprep.subr.msk.bf16.mxu0 %vm2714_vm3, %v1902_v6  ;;  %v7721_v14 = vpop.permute.xlu1 %5527 }
 0x66a   : > { %v5529_v33 = vunpack.i.l.bf16 %v7721_v14 }
 0x66b   : > { %5015 = vmatpush3.bf16.xpose.msra.mxu1 %v2348_v7 }
 0x66c   : > { %5023 = vmatpush3.bf16.msra.mxu0 %v2716_v13  ;;  %5028 = vmatprep.subr.bf16.mxu1 %v7629_v20  ;;  %v7732_v19 = vpack.c.bf16 %v5529_v33, %v5520_v18 }
 0x66d   : > { %5036 = vmatprep.subr.bf16.mxu0 %v7716_v11  ;;  %v7806_v63 = vpop.permute.xlu1 %1869 }
 0x672   : > { %5017 = vmatmul.mubr.msk.bf16.vlgmr.msra.gmra.mrb[28].mxu1 %vm1917_vm2, %v1764_v15 }
 0x673   : > { %5029 = vmatpush3.bf16.msra.mxu1 %v7629_v20 }
 0x674   : > { %5165 = vmatprep.subr.msk.bf16.mxu1 %vm2714_vm3, %v1904_v17 }
 0x677   : > { %5031 = vmatpush3.bf16.msra.mxu1 %v2773_v8  ;;  %v7828_v8 = vpop.permute.xlu1 %5532 }
 0x678   : > { %5044 = vmatprep.subr.bf16.mxu1 %v7732_v19 }
 0x6a0   : > { %v4962_v21 = vpop.f32.mrb[12].mxu1 }
 0x6a1   : > { %v7742_v20 = vsel %vm2400_vm4, %v4962_v21, -1e+30  ;;  %v1964_v22 = vpop.f32.mrb[13].mxu1 }
 0x6a2   : > { %v4963_v25 = vpop.f32.mrb[14].mxu1  ;;  %v2434_v29 = vsel %vm2427_vm5, %v7742_v20, -inf  ;;  %v7748_v31 = vsel %vm2400_vm4, %v1964_v22, -1e+30 }
 0x6a3   : > { %v1967_v23 = vpop.f32.mrb[15].mxu1  ;;  %2435 = vmax.xlane.f32.xlu0 %v2434_v29  ;;  %v2428_v32 = vsel %vm2427_vm5, %v7748_v31, -inf }
 0x6a4   : > { %v7752_v4 = vsel %vm2400_vm4, %v1967_v23, -1e+30 }
 0x6a5   : > { %v2431_v27 = vsel %vm2427_vm5, %v7752_v4, -inf }
 0x6a6   : > { %2432 = vmax.xlane.f32.xlu1 %v2431_v27 }
 0x6a7   : > { %2429 = vmax.xlane.f32.xlu0 %v2428_v32 }
 0x6b0   : > { %v4970_v34 = vpop.f32.mrb[16].mxu1 }
 0x6b1   : > { %v7760_v35 = vsel %vm2400_vm4, %v4970_v34, -1e+30  ;;  %v2024_v9 = vpop.f32.mrb[17].mxu1 }
 0x6b2   : > { %v4971_v36 = vpop.f32.mrb[18].mxu1  ;;  %v2443_v37 = vsel %vm2427_vm5, %v7760_v35, -inf  ;;  %v7766_v38 = vsel %vm2400_vm4, %v2024_v9, -1e+30 }
 0x6b3   : > { %2444 = vmax.xlane.f32.xlu0 %v2443_v37  ;;  %v2027_v39 = vpop.f32.mrb[19].mxu1  ;;  %v2437_v43 = vsel %vm2427_vm5, %v7766_v38, -inf }
 0x6b4   : > { %v7770_v40 = vsel %vm2400_vm4, %v2027_v39, -1e+30 }
 0x6b5   : > { %v2440_v42 = vsel %vm2427_vm5, %v7770_v40, -inf }
 0x6b6   : > { %2441 = vmax.xlane.f32.xlu1 %v2440_v42 }
 0x6b7   : > { %2438 = vmax.xlane.f32.xlu0 %v2437_v43 }
 0x71a   : > { %v4978_v28 = vpop.f32.mrb[12].mxu0 }
 0x71b   : > { %v7778_v44 = vsel %vm2400_vm4, %v4978_v28, -1e+30  ;;  %v2084_v45 = vpop.f32.mrb[13].mxu0 }
 0x71c   : > { %v7782_v46 = vsel %vm2400_vm4, %v2084_v45, -1e+30  ;;  %v4979_v47 = vpop.f32.mrb[14].mxu0  ;;  %v2452_v48 = vsel %vm2427_vm5, %v7778_v44, -inf }
 0x71d   : > { %2453 = vmax.xlane.f32.xlu1 %v2452_v48  ;;  %v2087_v49 = vpop.f32.mrb[15].mxu0  ;;  %v2446_v52 = vsel %vm2427_vm5, %v7782_v46, -inf }
 0x71e   : > { %v7790_v53 = vsel %vm2400_vm4, %v2087_v49, -1e+30  ;;  %2447 = vmax.xlane.f32.xlu0 %v2446_v52 }
 0x71f   : > { %v2449_v54 = vsel %vm2427_vm5, %v7790_v53, -inf }
 0x722   : > { %2450 = vmax.xlane.f32.xlu0 %v2449_v54 }
 0x725   : > { %v4986_v56 = vpop.f32.mrb[20].mxu1 }
 0x726   : > { %v7798_v57 = vsel %vm2400_vm4, %v4986_v56, -1e+30  ;;  %v2144_v50 = vpop.f32.mrb[21].mxu1 }
 0x727   : > { %v4987_v60 = vpop.f32.mrb[22].mxu1  ;;  %v2461_v58 = vsel %vm2427_vm5, %v7798_v57, -inf  ;;  %v7804_v61 = vsel %vm2400_vm4, %v2144_v50, -1e+30 }
 0x728   : > { %v2147_v62 = vpop.f32.mrb[23].mxu1  ;;  %2462 = vmax.xlane.f32.xlu0 %v2461_v58  ;;  %v2455_v7 = vsel %vm2427_vm5, %v7804_v61, -inf }
 0x729   : > { %v7834_v25 = vsel %vm2400_vm4, %v2147_v62, -1e+30 }
 0x72a   : > { %v4994_v59 = vpop.f32.mrb[16].mxu0  ;;  %v2458_v34 = vsel %vm2427_vm5, %v7834_v25, -inf }
 0x72b   : > { %v7810_v51 = vsel %vm2400_vm4, %v4994_v59, -1e+30  ;;  %v2204_v0 = vpop.f32.mrb[17].mxu0 }
 0x72c   : > { %v4995_v6 = vpop.f32.mrb[18].mxu0  ;;  %v2470_v13 = vsel %vm2427_vm5, %v7810_v51, -inf  ;;  %v7820_v15 = vsel %vm2400_vm4, %v2204_v0, -1e+30  ;;  %2456 = vmax.xlane.f32.xlu0 %v2455_v7 }
 0x72d   : > { %2471 = vmax.xlane.f32.xlu1 %v2470_v13  ;;  %v2207_v33 = vpop.f32.mrb[19].mxu0  ;;  %v2464_v22 = vsel %vm2427_vm5, %v7820_v15, -inf }
 0x72e   : > { %v7824_v17 = vsel %vm2400_vm4, %v2207_v33, -1e+30 }
 0x72f   : > { %v2467_v18 = vsel %vm2427_vm5, %v7824_v17, -inf }
 0x730   : > { %v2436_v21 = vpop.xlane.xlu0 %2435  ;;  %2468 = vmax.xlane.f32.xlu0 %v2467_v18 }
 0x731   : > { %v2502_v29 = vsub.f32 %v7742_v20, %v2436_v21  ;;  %2465 = vmax.xlane.f32.xlu1 %v2464_v22 }
 0x733   : > { %v2528_v23 = vmul.f32 1.442695, %v2502_v29  ;;  %v2433_v27 = vpop.xlane.xlu1 %2432 }
 0x734   : > { %v2430_v32 = vpop.xlane.xlu0 %2429  ;;  %v2501_v37 = vsub.f32 %v7752_v4, %v2433_v27 }
 0x735   : > { %v2500_v9 = vsub.f32 %v7748_v31, %v2430_v32  ;;  %2459 = vmax.xlane.f32.xlu1 %v2458_v34  ;;  %v5002_v36 = vpop.f32.mrb[24].mxu1  ;;  %5683 = vpow2.f32 %v2528_v23 }
 0x736   : > { %v7843_v42 = vsel %vm2400_vm4, %v5002_v36, -1e+30  ;;  %v2264_v20 = vpop.f32.mrb[25].mxu1  ;;  %v2526_v48 = vmul.f32 1.442695, %v2501_v37 }
 0x737   : > { %v2524_v39 = vmul.f32 1.442695, %v2500_v9  ;;  %v5003_v43 = vpop.f32.mrb[26].mxu1  ;;  %v2479_v28 = vsel %vm2427_vm5, %v7843_v42, -inf  ;;  %v7849_v45 = vsel %vm2400_vm4, %v2264_v20, -1e+30 }
 0x738   : > { %v2267_v31 = vpop.f32.mrb[27].mxu1  ;;  %2480 = vmax.xlane.f32.xlu0 %v2479_v28  ;;  %v2473_v54 = vsel %vm2427_vm5, %v7849_v45, -inf }
 0x739   : > { %5685 = vpow2.f32 %v2524_v39  ;;  %v7875_v6 = vsel %vm2400_vm4, %v2267_v31, -1e+30 }
 0x73a   : > { %v5010_v47 = vpop.f32.mrb[20].mxu0  ;;  %5687 = vpow2.f32 %v2526_v48  ;;  %v2476_v7 = vsel %vm2427_vm5, %v7875_v6, -inf }
 0x73b   : > { %v7853_v4 = vsel %vm2400_vm4, %v5010_v47, -1e+30  ;;  %v2324_v49 = vpop.f32.mrb[21].mxu0 }
 0x73c   : > { %v5011_v52 = vpop.f32.mrb[22].mxu0  ;;  %v2488_v56 = vsel %vm2427_vm5, %v7853_v4, -inf  ;;  %v7861_v50 = vsel %vm2400_vm4, %v2324_v49, -1e+30  ;;  %2474 = vmax.xlane.f32.xlu0 %v2473_v54 }
 0x73d   : > { %2489 = vmax.xlane.f32.xlu1 %v2488_v56  ;;  %v2327_v60 = vpop.f32.mrb[23].mxu0  ;;  %v2482_v59 = vsel %vm2427_vm5, %v7861_v50, -inf }
 0x73e   : > { %v7865_v58 = vsel %vm2400_vm4, %v2327_v60, -1e+30 }
 0x73f   : > { %v2485_v62 = vsel %vm2427_vm5, %v7865_v58, -inf  ;;  %v7871_v0 = vpop.eup %5683 }
 0x740   : > { %2486 = vmax.xlane.f32.xlu0 %v2485_v62  ;;  %v2578_v13 = vsel %vm2427_vm5, %v7871_v0, 0.0  ;;  %v2445_v43 = vpop.xlane.xlu0 %2444 }
 0x741   : > { %2483 = vmax.xlane.f32.xlu1 %v2482_v59  ;;  %v2505_v28 = vsub.f32 %v7760_v35, %v2445_v43 }
 0x743   : > { %v7881_v33 = vpop.eup %5685  ;;  %v2442_v31 = vpop.xlane.xlu1 %2441  ;;  %v2534_v48 = vmul.f32 1.442695, %v2505_v28 }
 0x744   : > { %2579 = vadd.xlane.f32.xlu0 %v2578_v13  ;;  %v2572_v27 = vsel %vm2427_vm5, %v7881_v33, 0.0  ;;  %v7891_v32 = vpop.eup %5687  ;;  %v2439_v47 = vpop.xlane.xlu0 %2438  ;;  %v2504_v12 = vsub.f32 %v7770_v40, %v2442_v31 }
 0x745   : > { %2477 = vmax.xlane.f32.xlu1 %v2476_v7  ;;  %v5018_v18 = vpop.f32.mrb[28].mxu1  ;;  %v2575_v37 = vsel %vm2427_vm5, %v7891_v32, 0.0  ;;  %v2503_v49 = vsub.f32 %v7766_v38, %v2439_v47  ;;  %5689 = vpow2.f32 %v2534_v48 }
 0x746   : > { %v7885_v21 = vsel %vm2400_vm4, %v5018_v18, -1e+30  ;;  %v2384_v22 = vpop.f32.mrb[29].mxu1  ;;  %v2532_v52 = vmul.f32 1.442695, %v2504_v12 }
 0x747   : > { %v5019_v29 = vpop.f32.mrb[30].mxu1  ;;  %v2497_v23 = vsel %vm2427_vm5, %v7885_v21, -inf  ;;  %v7903_v39 = vsel %vm2400_vm4, %v2384_v22, -1e+30  ;;  %v2530_v54 = vmul.f32 1.442695, %v2503_v49 }
 0x748   : > { %v2387_v34 = vpop.f32.mrb[31].mxu1  ;;  %2573 = vadd.xlane.f32.xlu0 %v2572_v27  ;;  %v2491_v20 = vsel %vm2427_vm5, %v7903_v39, -inf  ;;  %5691 = vpow2.f32 %v2532_v52 }
 0x749   : > { %2498 = vmax.xlane.f32.xlu1 %v2497_v23  ;;  %v7895_v9 = vsel %vm2400_vm4, %v2387_v34, -1e+30  ;;  %5693 = vpow2.f32 %v2530_v54 }
 0x74a   : > { %v2494_v36 = vsel %vm2427_vm5, %v7895_v9, -inf }
 0x74c   : > { %2495 = vmax.xlane.f32.xlu0 %v2494_v36 }
 0x74d   : > { %2576 = vadd.xlane.f32.xlu1 %v2575_v37 }
 0x74f   : > { %v7914_v56 = vpop.eup %5689 }
 0x750   : > { %v2587_v60 = vsel %vm2427_vm5, %v7914_v56, 0.0 }
 0x751   : > { %2492 = vmax.xlane.f32.xlu1 %v2491_v20 }
 0x762   : > { %1887 = vrot.lane.b32.xlu1 %v7648_v26, %s6593_s16  ;;  %1875 = vrot.lane.b32.xlu0 %v7666_v30, %s6592_s23  ;;  %v7916_v26 = vpop.eup %5691 }
 0x763   : > { %v7920_v35 = vpop.eup %5693  ;;  %v2584_v40 = vsel %vm2427_vm5, %v7916_v26, 0.0 }
 0x764   : > { %v2581_v38 = vsel %vm2427_vm5, %v7920_v35, 0.0 }
 0x781   : > { %2588 = vadd.xlane.f32.xlu0 %v2587_v60 }
 0x785   : > { %2582 = vadd.xlane.f32.xlu0 %v2581_v38 }
 0x786   : > { %2585 = vadd.xlane.f32.xlu1 %v2584_v40 }
 0x7aa   : > { %v2454_v62 = vpop.xlane.xlu1 %2453 }
 0x7ab   : > { %v2508_v59 = vsub.f32 %v7778_v44, %v2454_v62  ;;  %v2448_v7 = vpop.xlane.xlu0 %2447 }
 0x7ac   : > { %v2506_v13 = vsub.f32 %v7782_v46, %v2448_v7 }
 0x7ad   : > { %v2540_v18 = vmul.f32 1.442695, %v2508_v59 }
 0x7ae   : > { %v2536_v22 = vmul.f32 1.442695, %v2506_v13 }
 0x7af   : > { %5695 = vpow2.f32 %v2540_v18  ;;  %v2451_v29 = vpop.xlane.xlu0 %2450 }
 0x7b0   : > { %v2507_v23 = vsub.f32 %v7790_v53, %v2451_v29  ;;  %5697 = vpow2.f32 %v2536_v22 }
 0x7b2   : > { %v2538_v27 = vmul.f32 1.442695, %v2507_v23 }
 0x7b4   : > { %5699 = vpow2.f32 %v2538_v27 }
 0x7b5   : > { %v2463_v34 = vpop.xlane.xlu0 %2462 }
 0x7b6   : > { %v2511_v36 = vsub.f32 %v7798_v57, %v2463_v34 }
 0x7b8   : > { %v2546_v20 = vmul.f32 1.442695, %v2511_v36 }
 0x7b9   : > { %v7930_v37 = vpop.eup %5695  ;;  %v2457_v43 = vpop.xlane.xlu0 %2456 }
 0x7ba   : > { %v2472_v44 = vpop.xlane.xlu1 %2471  ;;  %v2596_v46 = vsel %vm2427_vm5, %v7930_v37, 0.0  ;;  %v7934_v28 = vpop.eup %5697  ;;  %5701 = vpow2.f32 %v2546_v20  ;;  %v2509_v31 = vsub.f32 %v7804_v61, %v2457_v43 }
 0x7bb   : > { %v2514_v53 = vsub.f32 %v7810_v51, %v2472_v44  ;;  %2597 = vadd.xlane.f32.xlu1 %v2596_v46  ;;  %v2590_v52 = vsel %vm2427_vm5, %v7934_v28, 0.0 }
 0x7bc   : > { %v2542_v47 = vmul.f32 1.442695, %v2509_v31 }
 0x7bd   : > { %v2552_v12 = vmul.f32 1.442695, %v2514_v53  ;;  %v2469_v49 = vpop.xlane.xlu0 %2468 }
 0x7be   : > { %v7938_v48 = vpop.eup %5699  ;;  %v2466_v57 = vpop.xlane.xlu1 %2465  ;;  %5703 = vpow2.f32 %v2542_v47  ;;  %v2513_v60 = vsub.f32 %v7824_v17, %v2469_v49 }
 0x7bf   : > { %v2512_v54 = vsub.f32 %v7820_v15, %v2466_v57  ;;  %2591 = vadd.xlane.f32.xlu1 %v2590_v52  ;;  %v2593_v61 = vsel %vm2427_vm5, %v7938_v48, 0.0  ;;  %5705 = vpow2.f32 %v2552_v12 }
 0x7c0   : > { %2594 = vadd.xlane.f32.xlu0 %v2593_v61  ;;  %v2550_v40 = vmul.f32 1.442695, %v2513_v60 }
 0x7c1   : > { %v2548_v51 = vmul.f32 1.442695, %v2512_v54 }
 0x7c2   : > { %v2460_v38 = vpop.xlane.xlu1 %2459 }
 0x7c3   : > { %5707 = vpow2.f32 %v2548_v51  ;;  %v2510_v62 = vsub.f32 %v7834_v25, %v2460_v38 }
 0x7c4   : > { %5709 = vpow2.f32 %v2550_v40  ;;  %v7947_v59 = vpop.eup %5701 }
 0x7c5   : > { %v2544_v7 = vmul.f32 1.442695, %v2510_v62  ;;  %v2481_v13 = vpop.xlane.xlu0 %2480  ;;  %v2605_v15 = vsel %vm2427_vm5, %v7947_v59, 0.0 }
 0x7c6   : > { %v2517_v17 = vsub.f32 %v7843_v42, %v2481_v13  ;;  %2606 = vadd.xlane.f32.xlu0 %v2605_v15 }
 0x7c7   : > { %5711 = vpow2.f32 %v2544_v7 }
 0x7c8   : > { %v7952_v18 = vpop.eup %5703  ;;  %v2558_v22 = vmul.f32 1.442695, %v2517_v17 }
 0x7c9   : > { %v7954_v29 = vpop.eup %5705  ;;  %v2475_v23 = vpop.xlane.xlu0 %2474  ;;  %v2599_v25 = vsel %vm2427_vm5, %v7952_v18, 0.0 }
 0x7ca   : > { %v2490_v27 = vpop.xlane.xlu1 %2489  ;;  %5713 = vpow2.f32 %v2558_v22  ;;  %v2515_v34 = vsub.f32 %v7849_v45, %v2475_v23  ;;  %v2614_v20 = vsel %vm2427_vm5, %v7954_v29, 0.0  ;;  %2600 = vadd.xlane.f32.xlu0 %v2599_v25 }
 0x7cb   : > { %v2520_v36 = vsub.f32 %v7853_v4, %v2490_v27  ;;  %2615 = vadd.xlane.f32.xlu1 %v2614_v20 }
 0x7cc   : > { %v2554_v43 = vmul.f32 1.442695, %v2515_v34 }
 0x7cd   : > { %v7962_v42 = vpop.eup %5707  ;;  %v2564_v44 = vmul.f32 1.442695, %v2520_v36  ;;  %v2487_v53 = vpop.xlane.xlu0 %2486 }
 0x7ce   : > { %v7964_v46 = vpop.eup %5709  ;;  %v2484_v31 = vpop.xlane.xlu1 %2483  ;;  %v2608_v47 = vsel %vm2427_vm5, %v7962_v42, 0.0  ;;  %5715 = vpow2.f32 %v2554_v43  ;;  %v2519_v4 = vsub.f32 %v7865_v58, %v2487_v53 }
 0x7cf   : > { %v2518_v45 = vsub.f32 %v7861_v50, %v2484_v31  ;;  %v2611_v12 = vsel %vm2427_vm5, %v7964_v46, 0.0  ;;  %5717 = vpow2.f32 %v2564_v44  ;;  %2609 = vadd.xlane.f32.xlu1 %v2608_v47 }
 0x7d0   : > { %2612 = vadd.xlane.f32.xlu0 %v2611_v12  ;;  %v2562_v52 = vmul.f32 1.442695, %v2519_v4 }
 0x7d1   : > { %v7972_v57 = vpop.eup %5711  ;;  %v2560_v49 = vmul.f32 1.442695, %v2518_v45  ;;  %v2580_v60 = vpop.xlane.xlu0 %2579 }
 0x7d2   : > { %v2478_v54 = vpop.xlane.xlu1 %2477  ;;  %v2602_v61 = vsel %vm2427_vm5, %v7972_v57, 0.0 }
 0x7d3   : > { %5719 = vpow2.f32 %v2560_v49  ;;  %v2516_v50 = vsub.f32 %v7875_v6, %v2478_v54  ;;  %2603 = vadd.xlane.f32.xlu1 %v2602_v61  ;;  %v5519_v61 = vunpack.i.l.bf16 %v7723_v16 }
 0x7d4   : > { %5721 = vpow2.f32 %v2562_v52  ;;  %v7977_v58 = vpop.eup %5713 }
 0x7d5   : > { %v2556_v51 = vmul.f32 1.442695, %v2516_v50  ;;  %v2574_v38 = vpop.xlane.xlu0 %2573  ;;  %v2623_v62 = vsel %vm2427_vm5, %v7977_v58, 0.0 }
 0x7d6   : > { %v2499_v40 = vpop.xlane.xlu1 %2498  ;;  %2624 = vadd.xlane.f32.xlu0 %v2623_v62  ;;  %v5525_v62 = vunpack.i.h.bf16 %v7794_v55 }
 0x7d7   : > { %5723 = vpow2.f32 %v2556_v51  ;;  %v2523_v7 = vsub.f32 %v7885_v21, %v2499_v40 }
 0x7d8   : > { %v7982_v13 = vpop.eup %5715  ;;  %5725 = vrcp.f32 %v2580_v60 }
 0x7d9   : > { %v2570_v15 = vmul.f32 1.442695, %v2523_v7  ;;  %v7984_v17 = vpop.eup %5717  ;;  %5727 = vrcp.f32 %v2574_v38  ;;  %v2496_v22 = vpop.xlane.xlu0 %2495  ;;  %v2617_v23 = vsel %vm2427_vm5, %v7982_v13, 0.0 }
 0x7da   : > { %v2577_v6 = vpop.xlane.xlu1 %2576  ;;  %v2522_v27 = vsub.f32 %v7895_v9, %v2496_v22  ;;  %v2632_v25 = vsel %vm2427_vm5, %v7984_v17, 0.0  ;;  %2618 = vadd.xlane.f32.xlu0 %v2617_v23 }
 0x7db   : > { %5729 = vpow2.f32 %v2570_v15  ;;  %2633 = vadd.xlane.f32.xlu1 %v2632_v25 }
 0x7dc   : > { %5731 = vrcp.f32 %v2577_v6  ;;  %v2568_v34 = vmul.f32 1.442695, %v2522_v27 }
 0x7dd   : > { %v7991_v21 = vpop.eup %5719 }
 0x7de   : > { %v7993_v36 = vpop.eup %5721  ;;  %v2493_v20 = vpop.xlane.xlu1 %2492  ;;  %v2626_v43 = vsel %vm2427_vm5, %v7991_v21, 0.0  ;;  %5733 = vpow2.f32 %v2568_v34 }
 0x7df   : > { %v2521_v44 = vsub.f32 %v7903_v39, %v2493_v20  ;;  %v2629_v9 = vsel %vm2427_vm5, %v7993_v36, 0.0  ;;  %2627 = vadd.xlane.f32.xlu1 %v2626_v43 }
 0x7e0   : > { %2630 = vadd.xlane.f32.xlu0 %v2629_v9 }
 0x7e1   : > { %v8000_v31 = vpop.eup %5723  ;;  %v2566_v53 = vmul.f32 1.442695, %v2521_v44 }
 0x7e2   : > { %v2620_v47 = vsel %vm2427_vm5, %v8000_v31, 0.0  ;;  %v5726_v45 = vpop.eup %5725 }
 0x7e3   : > { %5735 = vpow2.f32 %v2566_v53  ;;  %v5728_v4 = vpop.eup %5727  ;;  %2621 = vadd.xlane.f32.xlu1 %v2620_v47  ;;  %v2670_v39 = vmul.f32 %v5726_v45, %v7871_v0  ;;  %v1906_v0 = vpack.c.bf16 %v5519_v61, %v5519_v61  ;;  %v5540_v53 = vunpack.i.h.bf16 %v7812_v1 }
 0x7e4   : > { %v2668_v54 = vmul.f32 %v5728_v4, %v7881_v33  ;;  %v5524_v33 = vunpack.i.l.bf16 %v7794_v55  ;;  %v8031_v55 = vpop.permute.xlu0 %1875  ;;  %v5539_v47 = vunpack.i.l.bf16 %v7812_v1 }
 0x7e5   : > { %v8004_v12 = vpop.eup %5729  ;;  %v2693_v40 = vpack.c.bf16 %v2670_v39, %v2670_v39  ;;  %v2830_v15 = vsel %vm2714_vm3, %v1906_v0, 0 }
 0x7e6   : > { %v5732_v49 = vpop.eup %5731  ;;  %v2641_v52 = vsel %vm2427_vm5, %v8004_v12, 0.0  ;;  %v1909_v7 = vpack.c.bf16 %v5525_v62, %v5524_v33  ;;  %v1910_v33 = vpack.c.bf16 %v7806_v63, %v7806_v63 }
 0x7e7   : > { %v2669_v60 = vmul.f32 %v5732_v49, %v7891_v32  ;;  %2642 = vadd.xlane.f32.xlu1 %v2641_v52 }
 0x7e8   : > { %v8012_v50 = vpop.eup %5733 }
 0x7e9   : > { %v2692_v51 = vpack.c.bf16 %v2669_v60, %v2668_v54  ;;  %v2638_v38 = vsel %vm2427_vm5, %v8012_v50, 0.0 }
 0x7ea   : > { %2639 = vadd.xlane.f32.xlu0 %v2638_v38 }
 0x7eb   : > { %5024 = vmatprep.mubr.msk.bf16.mxu0 %vm2427_vm5, %v2692_v51 }
 0x7ec   : > { %5025 = vmatmul.mubr.msk.bf16.vlgmr.msra.gmra.mrb[24].mxu0 %vm2427_vm5, %v2693_v40 }
 0x7ed   : > { %v8020_v32 = vpop.eup %5735  ;;  %5037 = vmatpush3.bf16.msra.mxu0 %v7716_v11  ;;  %v8033_v11 = vpop.permute.xlu1 %1887 }
 0x7ee   : > { %5166 = vmatprep.subr.msk.bf16.mxu0 %vm2714_vm3, %v1906_v0  ;;  %v2635_v16 = vsel %vm2427_vm5, %v8020_v32, 0.0 }
 0x7ef   : > { %2636 = vadd.xlane.f32.xlu1 %v2635_v16  ;;  %v5535_v16 = vunpack.i.h.bf16 %v7828_v8 }
 0x7f1   : > { %5039 = vmatpush3.bf16.msra.mxu0 %v2830_v15 }
 0x7f2   : > { %5052 = vmatprep.subr.bf16.mxu0 %v1909_v7 }
 0x800   : > { %5542 = vrot.lane.b32.xlu1 %v7622_v10, %s6593_s16  ;;  %1893 = vrot.lane.b32.xlu0 %v7666_v30, %s6593_s16  ;;  %v5530_v30 = vunpack.i.h.bf16 %v7721_v14 }
 0x802   : > { %v1908_v45 = vpack.c.bf16 %v5530_v30, %v5530_v30 }
 0x80e   : > { %v2589_v6 = vpop.xlane.xlu0 %2588 }
 0x80f   : > { %5737 = vrcp.f32 %v2589_v6 }
 0x812   : > { %v2583_v23 = vpop.xlane.xlu0 %2582 }
 0x813   : > { %v2586_v22 = vpop.xlane.xlu1 %2585 }
 0x814   : > { %5739 = vrcp.f32 %v2586_v22 }
 0x815   : > { %5741 = vrcp.f32 %v2583_v23 }
 0x819   : > { %v5738_v27 = vpop.eup %5737 }
 0x81a   : > { %v2673_v20 = vmul.f32 %v5738_v27, %v7914_v56  ;;  %v8045_v56 = vpack.c.bf16 %v5540_v53, %v5539_v47 }
 0x81c   : > { %v2695_v9 = vpack.c.bf16 %v2673_v20, %v2673_v20 }
 0x81e   : > { %v5740_v25 = vpop.eup %5739 }
 0x81f   : > { %v5742_v34 = vpop.eup %5741  ;;  %v2672_v10 = vmul.f32 %v5740_v25, %v7916_v26  ;;  %v2887_v26 = vsel %vm2714_vm3, %v1908_v45, 0 }
 0x820   : > { %v2671_v43 = vmul.f32 %v5742_v34, %v7920_v35 }
 0x822   : > { %v2694_v44 = vpack.c.bf16 %v2672_v10, %v2671_v43 }
 0x824   : > { %5032 = vmatprep.mubr.msk.bf16.mxu1 %vm2427_vm5, %v2694_v44 }
 0x825   : > { %5033 = vmatmul.mubr.msk.bf16.vlgmr.msra.gmra.mrb[32].mxu1 %vm2427_vm5, %v2695_v9 }
 0x826   : > { %5045 = vmatpush3.bf16.msra.mxu1 %v7732_v19 }
 0x827   : > { %5167 = vmatprep.subr.msk.bf16.mxu1 %vm2714_vm3, %v1908_v45 }
 0x82a   : > { %5047 = vmatpush3.bf16.msra.mxu1 %v2887_v26 }
 0x82b   : > { %5060 = vmatprep.subr.bf16.mxu1 %v8045_v56 }
 0x848   : > { %v2598_v14 = vpop.xlane.xlu1 %2597 }
 0x849   : > { %5743 = vrcp.f32 %v2598_v14 }
 0x84c   : > { %v2592_v35 = vpop.xlane.xlu1 %2591 }
 0x84d   : > { %5745 = vrcp.f32 %v2592_v35  ;;  %v2595_v4 = vpop.xlane.xlu0 %2594 }
 0x84e   : > { %5747 = vrcp.f32 %v2595_v4 }
 0x853   : > { %v2607_v1 = vpop.xlane.xlu0 %2606  ;;  %v5744_v49 = vpop.eup %5743 }
 0x854   : > { %v2676_v19 = vmul.f32 %v5744_v49, %v7930_v37  ;;  %v5534_v37 = vunpack.i.l.bf16 %v7828_v8 }
 0x856   : > { %v2697_v38 = vpack.c.bf16 %v2676_v19, %v2676_v19  ;;  %v1913_v15 = vpack.c.bf16 %v5535_v16, %v5534_v37 }
 0x857   : > { %v5746_v39 = vpop.eup %5745  ;;  %v2601_v54 = vpop.xlane.xlu0 %2600 }
 0x858   : > { %v5748_v52 = vpop.eup %5747  ;;  %v2674_v60 = vmul.f32 %v5746_v39, %v7934_v28  ;;  %v2616_v61 = vpop.xlane.xlu1 %2615 }
 0x859   : > { %v2675_v51 = vmul.f32 %v5748_v52, %v7938_v48  ;;  %5749 = vrcp.f32 %v2616_v61  ;;  %v2944_v48 = vsel %vm2714_vm3, %v1910_v33, 0 }
 0x85a   : > { %5751 = vrcp.f32 %v2607_v1 }
 0x85b   : > { %v2696_v40 = vpack.c.bf16 %v2675_v51, %v2674_v60 }
 0x85c   : > { %v2610_v0 = vpop.xlane.xlu1 %2609 }
 0x85d   : > { %v2613_v62 = vpop.xlane.xlu0 %2612  ;;  %5040 = vmatprep.mubr.msk.bf16.mxu0 %vm2427_vm5, %v2696_v40  ;;  %5753 = vrcp.f32 %v2610_v0 }
 0x85e   : > { %5041 = vmatmul.mubr.msk.bf16.vlgmr.msra.gmra.mrb[28].mxu0 %vm2427_vm5, %v2697_v38  ;;  %5755 = vrcp.f32 %v2613_v62 }
 0x85f   : > { %5053 = vmatpush3.bf16.msra.mxu0 %v1909_v7  ;;  %5757 = vrcp.f32 %v2601_v54 }
 0x860   : > { %5168 = vmatprep.subr.msk.bf16.mxu0 %vm2714_vm3, %v1910_v33  ;;  %v2604_v28 = vpop.xlane.xlu1 %2603 }
 0x861   : > { %5759 = vrcp.f32 %v2604_v28 }
 0x863   : > { %5055 = vmatpush3.bf16.msra.mxu0 %v2944_v48  ;;  %v2625_v63 = vpop.xlane.xlu0 %2624  ;;  %v5750_v6 = vpop.eup %5749 }
 0x864   : > { %5068 = vmatprep.subr.bf16.mxu0 %v1913_v15  ;;  %v5752_v22 = vpop.eup %5751  ;;  %v2682_v25 = vmul.f32 %v5750_v6, %v7954_v29  ;;  %v1914_v29 = vpack.c.bf16 %v8033_v11, %v8033_v11 }
 0x865   : > { %v2679_v30 = vmul.f32 %v5752_v22, %v7947_v59 }
 0x866   : > { %v2701_v47 = vpack.c.bf16 %v2682_v25, %v2682_v25 }
 0x867   : > { %v5754_v23 = vpop.eup %5753  ;;  %v2619_v8 = vpop.xlane.xlu0 %2618 }
 0x868   : > { %v5756_v27 = vpop.eup %5755  ;;  %v2634_v34 = vpop.xlane.xlu1 %2633  ;;  %v2680_v7 = vmul.f32 %v5754_v23, %v7962_v42  ;;  %v2699_v42 = vpack.c.bf16 %v2679_v30, %v2679_v30 }
 0x869   : > { %v5758_v20 = vpop.eup %5757  ;;  %v2681_v10 = vmul.f32 %v5756_v27, %v7964_v46  ;;  %5761 = vrcp.f32 %v2634_v34 }
 0x86a   : > { %5763 = vrcp.f32 %v2625_v63  ;;  %v2677_v45 = vmul.f32 %v5758_v20, %v7952_v18  ;;  %v1912_v18 = vpack.c.bf16 %v8031_v55, %v8031_v55  ;;  %v5623_v20 = vld [vmem:[%s7438_s28] sm:$0xff]  }
 0x86b   : > { %v5760_v43 = vpop.eup %5759  ;;  %v2700_v44 = vpack.c.bf16 %v2681_v10, %v2680_v7  ;;  %v5624_v10 = vld [vmem:[%s7438_s28 + $0x8] sm:$0xff]  }
 0x86c   : > { %v2628_v9 = vpop.xlane.xlu1 %2627  ;;  %v2678_v26 = vmul.f32 %v5760_v43, %v7972_v57  ;;  %v3058_v57 = vsel %vm2714_vm3, %v1914_v29, 0  ;;  %v3001_v14 = vsel %vm2714_vm3, %v1912_v18, 0 }
 0x86d   : > { %v2631_v53 = vpop.xlane.xlu0 %2630  ;;  %5765 = vrcp.f32 %v2628_v9  ;;  %5056 = vmatprep.mubr.msk.bf16.mxu0 %vm2427_vm5, %v2700_v44  ;;  %v5625_v44 = vld [vmem:[%s7438_s28 + $0x10] sm:$0xff]  }
 0x86e   : > { %5767 = vrcp.f32 %v2631_v53  ;;  %5057 = vmatmul.mubr.msk.bf16.vlgmr.msra.gmra.mrb[32].mxu0 %vm2427_vm5, %v2701_v47  ;;  %v2698_v59 = vpack.c.bf16 %v2678_v26, %v2677_v45  ;;  %v5626_v45 = vld [vmem:[%s7438_s28 + $0x18] sm:$0xff]   ;;  %v5627_v26 = vld [vmem:[%s7438_s28 + $0x20] sm:$0xff]  }
 0x86f   : > { %5769 = vrcp.f32 %v2619_v8  ;;  %5069 = vmatpush3.bf16.msra.mxu0 %v1913_v15 }
 0x870   : > { %5170 = vmatprep.subr.msk.bf16.mxu0 %vm2714_vm3, %v1914_v29  ;;  %v2622_v46 = vpop.xlane.xlu1 %2621  ;;  %5048 = vmatprep.mubr.msk.bf16.mxu1 %vm2427_vm5, %v2698_v59 }
 0x871   : > { %5771 = vrcp.f32 %v2622_v46  ;;  %5049 = vmatmul.mubr.msk.bf16.vlgmr.msra.gmra.mrb[36].mxu1 %vm2427_vm5, %v2699_v42  ;;  %v5628_v42 = vld [vmem:[%s7438_s28 + $0x28] sm:$0xff]  }
 0x872   : > { %5061 = vmatpush3.bf16.msra.mxu1 %v8045_v56 }
 0x873   : > { %5071 = vmatpush3.bf16.msra.mxu0 %v3058_v57  ;;  %5169 = vmatprep.subr.msk.bf16.mxu1 %vm2714_vm3, %v1912_v18  ;;  %v5762_v11 = vpop.eup %5761 }
 0x874   : > { %5084 = vmatprep.subr.bf16.mxu0 %v6588_v41  ;;  %v5764_v35 = vpop.eup %5763  ;;  %v2643_v4 = vpop.xlane.xlu1 %2642  ;;  %v2688_v39 = vmul.f32 %v5762_v11, %v7984_v17 }
 0x875   : > { %5773 = vrcp.f32 %v2643_v4  ;;  %v2685_v60 = vmul.f32 %v5764_v35, %v7977_v58 }
 0x876   : > { %5063 = vmatpush3.bf16.msra.mxu1 %v3001_v14  ;;  %v2705_v40 = vpack.c.bf16 %v2688_v39, %v2688_v39  ;;  %v5630_v39 = vld [vmem:[%s7438_s28 + $0x38] sm:$0xff]  }
 0x877   : > { %v5766_v1 = vpop.eup %5765  ;;  %v2640_v55 = vpop.xlane.xlu0 %2639  ;;  %v2703_v62 = vpack.c.bf16 %v2685_v60, %v2685_v60 }
 0x878   : > { %v5768_v49 = vpop.eup %5767  ;;  %v2686_v52 = vmul.f32 %v5766_v1, %v7991_v21  ;;  %5775 = vrcp.f32 %v2640_v55  ;;  %v5629_v1 = vld [vmem:[%s7438_s28 + $0x30] sm:$0xff]  }
 0x879   : > { %v5770_v19 = vpop.eup %5769  ;;  %v2687_v56 = vmul.f32 %v5768_v49, %v7993_v36 }
 0x87a   : > { %v2683_v38 = vmul.f32 %v5770_v19, %v7982_v13 }
 0x87b   : > { %v5772_v54 = vpop.eup %5771  ;;  %v2704_v51 = vpack.c.bf16 %v2687_v56, %v2686_v52  ;;  %v1894_v33 = vpop.permute.xlu0 %1893 }
 0x87c   : > { %v2637_v61 = vpop.xlane.xlu1 %2636  ;;  %v2684_v0 = vmul.f32 %v5772_v54, %v8000_v31  ;;  %v1916_v37 = vpack.c.bf16 %v1894_v33, %v1894_v33 }
 0x87d   : > { %5777 = vrcp.f32 %v2637_v61  ;;  %5072 = vmatprep.mubr.msk.bf16.mxu0 %vm2427_vm5, %v2704_v51 }
 0x87e   : > { %5073 = vmatmul.mubr.msk.bf16.vlgmr.msra.gmra.mrb[36].mxu0 %vm2427_vm5, %v2705_v40  ;;  %v2702_v17 = vpack.c.bf16 %v2684_v0, %v2683_v38  ;;  %v3115_v6 = vsel %vm2714_vm3, %v1916_v37, 0 }
 0x87f   : > { %5100 = vmatprep.mubr.msk.bf16.mxu0 %vm6590_vm1, %v6588_v41  ;;  %v5774_v16 = vpop.eup %5773  ;;  %5085 = vmatpush3.bf16.msra.mxu0 %v5623_v20 }
 0x880   : > { %v5543_v21 = vpop.permute.xlu1 %5542  ;;  %5064 = vmatprep.mubr.msk.bf16.mxu1 %vm2427_vm5, %v2702_v17  ;;  %v2691_v48 = vmul.f32 %v5774_v16, %v8004_v12  ;;  %5086 = vmatprep.subr.bf16.mxu0 %v6588_v41 }
 0x881   : > { %v5545_v36 = vunpack.i.h.bf16 %v5543_v21  ;;  %v5544_v58 = vunpack.i.l.bf16 %v5543_v21  ;;  %5065 = vmatmul.mubr.msk.bf16.vlgmr.msra.gmra.mrb[40].mxu1 %vm2427_vm5, %v2703_v62 }
 0x882   : > { %v5776_v31 = vpop.eup %5775  ;;  %v2707_v23 = vpack.c.bf16 %v2691_v48, %v2691_v48 }
 0x883   : > { %v1915_v13 = vpack.c.bf16 %v5545_v36, %v5544_v58  ;;  %v2690_v63 = vmul.f32 %v5776_v31, %v8012_v50  ;;  %5087 = vmatpush3.bf16.msra.mxu0 %v5624_v10 }
 0x884   : > { %5088 = vmatprep.subr.bf16.mxu0 %v6588_v41 }
 0x885   : > { %5076 = vmatprep.subr.bf16.mxu1 %v1915_v13 }
 0x886   : > { %5077 = vmatpush3.bf16.msra.mxu1 %v1915_v13 }
 0x887   : > { %v5778_v28 = vpop.eup %5777  ;;  %5171 = vmatprep.subr.msk.bf16.mxu1 %vm2714_vm3, %v1916_v37  ;;  %5089 = vmatpush3.bf16.msra.mxu0 %v5625_v44 }
 0x888   : > { %v2689_v15 = vmul.f32 %v5778_v28, %v8020_v32  ;;  %5090 = vmatprep.subr.bf16.mxu0 %v6588_v41 }
 0x88a   : > { %5079 = vmatpush3.bf16.msra.mxu1 %v3115_v6  ;;  %v2706_v22 = vpack.c.bf16 %v2690_v63, %v2689_v15 }
 0x88b   : > { %5091 = vmatpush3.bf16.msra.mxu0 %v5626_v45 }
 0x88c   : > { %5080 = vmatprep.mubr.msk.bf16.mxu1 %vm2427_vm5, %v2706_v22  ;;  %5092 = vmatprep.subr.bf16.mxu0 %v6588_v41 }
 0x88d   : > { %5081 = vmatmul.mubr.msk.bf16.vlgmr.msra.gmra.mrb[44].mxu1 %vm2427_vm5, %v2707_v23 }
 0x88e   : > { %3708 = vmatprep.mubr.bf16.mxu1 %v6589_v24 }
 0x88f   : > { %5093 = vmatpush3.bf16.msra.mxu0 %v5627_v26 }
 0x890   : > { %5094 = vmatprep.subr.bf16.mxu0 %v6588_v41 }
 0x893   : > { %5095 = vmatpush3.bf16.msra.mxu0 %v5628_v42 }
 0x894   : > { %5096 = vmatprep.subr.bf16.mxu0 %v6588_v41 }
 0x897   : > { %5097 = vmatpush3.bf16.msra.mxu0 %v5629_v1 }
 0x898   : > { %5098 = vmatprep.subr.bf16.mxu0 %v6588_v41 }
 0x89b   : > { %5099 = vmatpush3.bf16.msra.mxu0 %v5630_v39 }
 0x8bf   : > { %v8100_v12 = vpop.f32.mrb[24].mxu0 }
 0x8c0   : > { %v8102_v8 = vpop.f32.mrb[25].mxu0 }
 0x8c1   : > { %v5027_v32 = vpop.f32.mrb[26].mxu0 }
 0x8c2   : > { %v8104_v50 = vpop.f32.mrb[27].mxu0 }
 0x8f8   : > { %v8106_v27 = vpop.f32.mrb[32].mxu1 }
 0x8f9   : > { %v8108_v25 = vpop.f32.mrb[33].mxu1 }
 0x8fa   : > { %v5035_v34 = vpop.f32.mrb[34].mxu1 }
 0x8fb   : > { %v8110_v7 = vpop.f32.mrb[35].mxu1 }
 0x931   : > { %v5042_v43 = vpop.f32.mrb[28].mxu0 }
 0x932   : > { %v2866_v30 = vpop.f32.mrb[29].mxu0 }
 0x933   : > { %v5043_v9 = vpop.f32.mrb[30].mxu0 }
 0x934   : > { %v2869_v53 = vpop.f32.mrb[31].mxu0 }
 0x935   : > { %v5546_v47 = vpack.i.bf16 %v2869_v53, %v2866_v30 }
 0x937   : > { %5547 = vrot.lane.b32.xlu1 %v5546_v47, %s6593_s16 }
 0x941   : > { %v5058_v29 = vpop.f32.mrb[32].mxu0 }
 0x942   : > { %v2980_v59 = vpop.f32.mrb[33].mxu0 }
 0x943   : > { %v5059_v46 = vpop.f32.mrb[34].mxu0 }
 0x944   : > { %v2983_v18 = vpop.f32.mrb[35].mxu0  ;;  %v5050_v57 = vpop.f32.mrb[36].mxu1 }
 0x945   : > { %v5551_v11 = vpack.i.bf16 %v2983_v18, %v2980_v59  ;;  %v2923_v14 = vpop.f32.mrb[37].mxu1 }
 0x946   : > { %v5561_v35 = vpack.i.bf16 %v2923_v14, %v5042_v43  ;;  %v5051_v4 = vpop.f32.mrb[38].mxu1 }
 0x947   : > { %5552 = vrot.lane.b32.xlu0 %v5551_v11, %s6592_s23  ;;  %v2926_v55 = vpop.f32.mrb[39].mxu1 }
 0x948   : > { %v5576_v49 = vpack.i.bf16 %v5050_v57, %v2926_v55 }
 0x94b   : > { %5562 = vrot.lane.b32.xlu0 %v5561_v35, %s6593_s16 }
 0x951   : > { %v5074_v52 = vpop.f32.mrb[36].mxu0 }
 0x952   : > { %v3094_v19 = vpop.f32.mrb[37].mxu0 }
 0x953   : > { %v5075_v56 = vpop.f32.mrb[38].mxu0 }
 0x954   : > { %v3097_v54 = vpop.f32.mrb[39].mxu0  ;;  %v5066_v60 = vpop.f32.mrb[40].mxu1 }
 0x955   : > { %v5556_v61 = vpack.i.bf16 %v3097_v54, %v3094_v19  ;;  %v3037_v51 = vpop.f32.mrb[41].mxu1 }
 0x956   : > { %v5566_v40 = vpack.i.bf16 %v3037_v51, %v5058_v29  ;;  %v5067_v38 = vpop.f32.mrb[42].mxu1 }
 0x957   : > { %5557 = vrot.lane.b32.xlu1 %v5556_v61, %s6591_s14  ;;  %v3040_v0 = vpop.f32.mrb[43].mxu1 }
 0x958   : > { %v5581_v17 = vpack.i.bf16 %v5066_v60, %v3040_v0 }
 0x95b   : > { %5567 = vrot.lane.b32.xlu1 %v5566_v40, %s6592_s23 }
 0x95f   : > { %5577 = vrot.lane.b32.xlu1 %v5576_v49, %s6593_s16 }
 0x960   : > { %v5082_v21 = vpop.f32.mrb[44].mxu1 }
 0x961   : > { %v3151_v62 = vpop.f32.mrb[45].mxu1 }
 0x962   : > { %v5571_v36 = vpack.i.bf16 %v3151_v62, %v5074_v52  ;;  %v5083_v58 = vpop.f32.mrb[46].mxu1 }
 0x963   : > { %v3154_v33 = vpop.f32.mrb[47].mxu1 }
 0x964   : > { %v5586_v13 = vpack.i.bf16 %v5082_v21, %v3154_v33  ;;  %5572 = vrot.lane.b32.xlu0 %v5571_v36, %s6591_s14  ;;  %v5827_v21 = vld [vmem:[#allocation2] sm:$0xff]  ;;  %v5828_v33 = vld [vmem:[#allocation2 + $0x8] sm:$0xff] }
 0x966   : > { %5587 = vrot.lane.b32.xlu1 %v5586_v13, %s6591_s14 }
 0x968   : > { %5582 = vrot.lane.b32.xlu0 %v5581_v17, %s6592_s23 }
 0x9a9   : > { %v5548_v16 = vpop.permute.xlu1 %5547 }
 0x9aa   : > { %v5550_v37 = vunpack.i.h.bf16 %v5548_v16  ;;  %v5549_v28 = vunpack.i.l.bf16 %v5548_v16 }
 0x9ac   : > { %v3238_v6 = vsel %vm1917_vm2, %v8104_v50, %v5550_v37  ;;  %v3237_v22 = vsel %vm1917_vm2, %v8102_v8, %v5549_v28  ;;  %v5829_v28 = vld [vmem:[#allocation2 + $0x10] sm:$0xff] }
 0x9b9   : > { %v5553_v31 = vpop.permute.xlu0 %5552 }
 0x9ba   : > { %v5555_v48 = vunpack.i.h.bf16 %v5553_v31  ;;  %v5554_v15 = vunpack.i.l.bf16 %v5553_v31 }
 0x9bc   : > { %v3245_v34 = vsel %vm3243_vm6, %v3238_v6, %v5555_v48  ;;  %v3244_v20 = vsel %vm3243_vm6, %v3237_v22, %v5554_v15  ;;  %v5830_v6 = vld [vmem:[#allocation2 + $0x18] sm:$0xff] }
 0x9bd   : > { %v5563_v9 = vpop.permute.xlu0 %5562 }
 0x9be   : > { %v5565_v50 = vunpack.i.h.bf16 %v5563_v9  ;;  %v5564_v53 = vunpack.i.l.bf16 %v5563_v9  ;;  %v5832_v9 = vld [vmem:[#allocation2 + $0x28] sm:$0xff] }
 0x9c0   : > { %v3240_v29 = vsel %vm1917_vm2, %v8108_v25, %v5565_v50  ;;  %v3239_v59 = vsel %vm1917_vm2, %v8100_v12, %v5564_v53 }
 0x9c9   : > { %v5558_v63 = vpop.permute.xlu1 %5557 }
 0x9ca   : > { %v5560_v23 = vunpack.i.h.bf16 %v5558_v63  ;;  %v5559_v32 = vunpack.i.l.bf16 %v5558_v63 }
 0x9cc   : > { %v3251_v10 = vsel %vm3250_vm7, %v3244_v20, %v5559_v32  ;;  %v3252_v43 = vsel %vm3250_vm7, %v3245_v34, %v5560_v23 }
 0x9cd   : > { %v3257_v30 = vpack.c.bf16 %v3252_v43, %v3251_v10  ;;  %v5568_v44 = vpop.permute.xlu1 %5567  ;;  %v5831_v10 = vld [vmem:[#allocation2 + $0x20] sm:$0xff] }
 0x9ce   : > { %v5570_v8 = vunpack.i.h.bf16 %v5568_v44  ;;  %v5569_v47 = vunpack.i.l.bf16 %v5568_v44 }
 0x9cf   : > { %5101 = vmatmul.mubr.bf16.vlgmr.msra.gmra.mrb[40].mxu0 %v3257_v30 }
 0x9d0   : > { %5104 = vmatprep.mubr.msk.bf16.mxu0 %vm6590_vm1, %v6588_v41  ;;  %v3246_v18 = vsel %vm3243_vm6, %v3239_v59, %v5569_v47  ;;  %v3247_v57 = vsel %vm3243_vm6, %v3240_v29, %v5570_v8 }
 0x9d1   : > { %v5578_v45 = vpop.permute.xlu1 %5577 }
 0x9d2   : > { %v5580_v11 = vunpack.i.h.bf16 %v5578_v45  ;;  %v5579_v14 = vunpack.i.l.bf16 %v5578_v45 }
 0x9d4   : > { %v3242_v12 = vsel %vm1917_vm2, %v8106_v27, %v5580_v11  ;;  %v3241_v52 = vsel %vm1917_vm2, %v8110_v7, %v5579_v14  ;;  %v4695_v27 = vld [vmem:[%s961_s2] ss:$0 sm:$0xff] }
 0x9d6   : > { %v5573_v26 = vpop.permute.xlu0 %5572 }
 0x9d7   : > { %v5575_v42 = vunpack.i.h.bf16 %v5573_v26  ;;  %v5574_v46 = vunpack.i.l.bf16 %v5573_v26 }
 0x9d8   : > { %v5588_v35 = vpop.permute.xlu1 %5587 }
 0x9d9   : > { %v3253_v4 = vsel %vm3250_vm7, %v3246_v18, %v5574_v46  ;;  %v3254_v1 = vsel %vm3250_vm7, %v3247_v57, %v5575_v42  ;;  %v5590_v19 = vunpack.i.h.bf16 %v5588_v35  ;;  %v5589_v56 = vunpack.i.l.bf16 %v5588_v35 }
 0x9da   : > { %v5583_v55 = vpop.permute.xlu0 %5582  ;;  %v3258_v49 = vpack.c.bf16 %v3254_v1, %v3253_v4 }
 0x9db   : > { %v5585_v25 = vunpack.i.h.bf16 %v5583_v55  ;;  %v5584_v39 = vunpack.i.l.bf16 %v5583_v55 }
 0x9dc   : > { %5105 = vmatmul.mubr.bf16.gmra.mrb[44].mxu0 %v3258_v49 }
 0x9dd   : > { %v3249_v54 = vsel %vm3243_vm6, %v3242_v12, %v5585_v25  ;;  %v3248_v60 = vsel %vm3243_vm6, %v3241_v52, %v5584_v39  ;;  %5108 = vmatprep.mubr.msk.bf16.mxu0 %vm6590_vm1, %v6588_v41 }
 0x9de   : > { %v3255_v61 = vsel %vm3250_vm7, %v3248_v60, %v5589_v56  ;;  %v3256_v51 = vsel %vm3250_vm7, %v3249_v54, %v5590_v19 }
 0x9df   : > { %v3259_v40 = vpack.c.bf16 %v3256_v51, %v3255_v61 }
 0x9e4   : > { %5109 = vmatmul.mubr.bf16.gmra.mrb[48].mxu0 %v3259_v40 }
 0xaa2   : > { %v3365_v38 = vpop.f32.mrb[40].mxu0 }
 0xaa3   : > { %v3366_v7 = vadd.f32 %v4695_v27, %v3365_v38  ;;  %v5102_v0 = vpop.f32.mrb[41].mxu0 }
 0xaa4   : > { %v3368_v17 = vpop.f32.mrb[42].mxu0 }
 0xaa5   : > { %v8166_v62 = vadd.f32 %v5827_v21, %v3366_v7  ;;  %v3369_v36 = vadd.f32 %v4695_v27, %v3368_v17  ;;  %v5103_v58 = vpop.f32.mrb[43].mxu0  ;;  %v4704_v21 = vld [vmem:[%s926_s9] ss:$0 sm:$0xff]  ;;  %s8527_s9 = scalar_lea.vmem [#allocation18], %s7416_s12  ;;  %s8529_s12 = sld [smem:[#allocation49_spill]] }
 0xaa7   : > { %v8168_v13 = vadd.f32 %v5828_v33, %v3369_v36  ;;  %3394 = vadd.xlane.f32.xlu0 %v8166_v62 }
 0xaa9   : > { %3396 = vadd.xlane.f32.xlu1 %v8168_v13 }
 0xaab   : > { %p4740_p9 = scmp.ne.s32.totalorder %s8529_s12, 1 }
 0xaac   : > { %vm4016_vm8 = vcmask (!%p4740_p9), 1041409   ;;  %vm4019_vm9 = vcmask (!%p4740_p9), 1041408   ;;  %vm6595_vm10 = vmmov (!%p4740_p9), 0  }
 0xaaf   : > { %v3373_v41 = vpop.f32.mrb[44].mxu0 }
 0xab0   : > { %v3374_v16 = vadd.f32 %v4695_v27, %v3373_v41  ;;  %v5106_v31 = vpop.f32.mrb[45].mxu0 }
 0xab1   : > { %v3376_v37 = vpop.f32.mrb[46].mxu0 }
 0xab2   : > { %v8172_v48 = vadd.f32 %v5829_v28, %v3374_v16  ;;  %v3377_v15 = vadd.f32 %v4695_v27, %v3376_v37  ;;  %v5107_v63 = vpop.f32.mrb[47].mxu0 }
 0xab4   : > { %3398 = vadd.xlane.f32.xlu0 %v8172_v48  ;;  %v8175_v22 = vadd.f32 %v5830_v6, %v3377_v15 }
 0xab7   : > { %v3381_v23 = vpop.f32.mrb[48].mxu0 }
 0xab8   : > { %v3382_v32 = vadd.f32 %v4695_v27, %v3381_v23  ;;  %3400 = vadd.xlane.f32.xlu0 %v8175_v22  ;;  %v5110_v34 = vpop.f32.mrb[49].mxu0 }
 0xab9   : > { %v3384_v20 = vpop.f32.mrb[50].mxu0 }
 0xaba   : > { %v8178_v43 = vadd.f32 %v5831_v10, %v3382_v32  ;;  %v3385_v30 = vadd.f32 %v4695_v27, %v3384_v20  ;;  %v5111_v44 = vpop.f32.mrb[51].mxu0 }
 0xabc   : > { %v8180_v50 = vadd.f32 %v5832_v9, %v3385_v30  ;;  %3402 = vadd.xlane.f32.xlu0 %v8178_v43 }
 0xabe   : > { %3404 = vadd.xlane.f32.xlu1 %v8180_v50 }
 0xb34   : > { %v3395_v53 = vpop.xlane.xlu0 %3394 }
 0xb35   : > { %v3406_v8 = vmul.f32 0.0078125, %v3395_v53 }
 0xb36   : > { %v3397_v47 = vpop.xlane.xlu1 %3396 }
 0xb37   : > { %v3412_v45 = vsub.f32 %v8166_v62, %v3406_v8  ;;  %v3407_v26 = vmul.f32 0.0078125, %v3397_v47 }
 0xb39   : > { %v3413_v29 = vsub.f32 %v8168_v13, %v3407_v26  ;;  %v3418_v59 = vmul.f32 %v3412_v45, %v3412_v45 }
 0xb3b   : > { %3424 = vadd.xlane.f32.xlu0 %v3418_v59  ;;  %v3419_v42 = vmul.f32 %v3413_v29, %v3413_v29 }
 0xb3d   : > { %3426 = vadd.xlane.f32.xlu1 %v3419_v42  ;;  %v5631_v42 = vld [vmem:[%s7454_s5] ss:$8 sps:$4 sm:$0xff]  }
 0xb41   : > { %v3399_v46 = vpop.xlane.xlu0 %3398 }
 0xb42   : > { %v3408_v18 = vmul.f32 0.0078125, %v3399_v46  ;;  %v5633_v46 = vld [vmem:[%s7454_s5 + $0x4] ss:$8 sps:$4 sm:$0xff]  }
 0xb43   : > { %3676 = vmatprep.subr.bf16.mxu1 %v5633_v46 }
 0xb44   : > { %v3414_v57 = vsub.f32 %v8172_v48, %v3408_v18  ;;  %v5636_v18 = vld [vmem:[%s7454_s5 + $0x14] ss:$8 sps:$4 sm:$0xff]   ;;  %3677 = vmatpush1.bf16.msra.mxu1 %v5631_v42  ;;  %v4705_v42 = vld [vmem:[%s8527_s9] ss:$0 sm:$0xff] }
 0xb45   : > { %v3401_v11 = vpop.xlane.xlu0 %3400  ;;  %3678 = vmatprep.subr.bf16.mxu1 %v5636_v18 }
 0xb46   : > { %v3409_v14 = vmul.f32 0.0078125, %v3401_v11  ;;  %v3420_v35 = vmul.f32 %v3414_v57, %v3414_v57 }
 0xb48   : > { %v3415_v4 = vsub.f32 %v8175_v22, %v3409_v14  ;;  %3428 = vadd.xlane.f32.xlu0 %v3420_v35 }
 0xb49   : > { %v3403_v1 = vpop.xlane.xlu0 %3402 }
 0xb4a   : > { %v3410_v55 = vmul.f32 0.0078125, %v3403_v1  ;;  %v3421_v49 = vmul.f32 %v3415_v4, %v3415_v4 }
 0xb4b   : > { %v3405_v25 = vpop.xlane.xlu1 %3404 }
 0xb4c   : > { %v3416_v39 = vsub.f32 %v8178_v43, %v3410_v55  ;;  %v3411_v12 = vmul.f32 0.0078125, %v3405_v25  ;;  %3430 = vadd.xlane.f32.xlu1 %v3421_v49 }
 0xb4e   : > { %v3417_v52 = vsub.f32 %v8180_v50, %v3411_v12  ;;  %v3422_v19 = vmul.f32 %v3416_v39, %v3416_v39 }
 0xb50   : > { %3432 = vadd.xlane.f32.xlu0 %v3422_v19  ;;  %v3423_v56 = vmul.f32 %v3417_v52, %v3417_v52 }
 0xb52   : > { %3434 = vadd.xlane.f32.xlu1 %v3423_v56 }
 0xbc8   : > { %v3425_v54 = vpop.xlane.xlu0 %3424 }
 0xbc9   : > { %v3436_v60 = vmul.f32 0.0078125, %v3425_v54 }
 0xbca   : > { %v3427_v61 = vpop.xlane.xlu1 %3426 }
 0xbcb   : > { %v3442_v51 = vadd.f32 1e-05, %v3436_v60  ;;  %v3437_v40 = vmul.f32 0.0078125, %v3427_v61 }
 0xbcd   : > { %5779 = vrsqrt.f32 %v3442_v51  ;;  %v3443_v27 = vadd.f32 1e-05, %v3437_v40 }
 0xbcf   : > { %5781 = vrsqrt.f32 %v3443_v27 }
 0xbd5   : > { %v3429_v38 = vpop.xlane.xlu0 %3428 }
 0xbd6   : > { %v3438_v7 = vmul.f32 0.0078125, %v3429_v38  ;;  %v5639_v38 = vld [vmem:[%s7454_s5 + $0x24] ss:$8 sps:$4 sm:$0xff]  }
 0xbd7   : > { %v5780_v0 = vpop.eup %5779 }
 0xbd8   : > { %v3444_v17 = vadd.f32 1e-05, %v3438_v7  ;;  %v3454_v58 = vmul.f32 %v5780_v0, %v3412_v45 }
 0xbd9   : > { %v3431_v36 = vpop.xlane.xlu1 %3430  ;;  %v5782_v33 = vpop.eup %5781 }
 0xbda   : > { %5783 = vrsqrt.f32 %v3444_v17  ;;  %v3439_v41 = vmul.f32 0.0078125, %v3431_v36  ;;  %v3467_v16 = vmul.f32 %v4704_v21, %v3454_v58  ;;  %v3455_v31 = vmul.f32 %v5782_v33, %v3413_v29  ;;  %v5637_v17 = vld [vmem:[%s7454_s5 + $0x20] ss:$8 sps:$4 sm:$0xff]   ;;  %v5642_v58 = vld [vmem:[%s7454_s5 + $0x34] ss:$8 sps:$4 sm:$0xff]  }
 0xbdc   : > { %v3445_v37 = vadd.f32 1e-05, %v3439_v41  ;;  %3473 = vadd.xlane.f32.xlu0 %v3467_v16  ;;  %v3468_v15 = vmul.f32 %v4704_v21, %v3455_v31  ;;  %v5640_v41 = vld [vmem:[%s7454_s5 + $0x30] ss:$8 sps:$4 sm:$0xff]   ;;  %v5643_v31 = vld [vmem:[%s7454_s5 + $0x40] ss:$8 sps:$4 sm:$0xff]  }
 0xbdd   : > { %v3433_v28 = vpop.xlane.xlu0 %3432 }
 0xbde   : > { %5785 = vrsqrt.f32 %v3445_v37  ;;  %v3440_v63 = vmul.f32 0.0078125, %v3433_v28  ;;  %3475 = vadd.xlane.f32.xlu1 %v3468_v15  ;;  %v5648_v37 = vld [vmem:[%s7454_s5 + $0x54] ss:$8 sps:$4 sm:$0xff]   ;;  %v5646_v28 = vld [vmem:[%s7454_s5 + $0x50] ss:$8 sps:$4 sm:$0xff]  }
 0xbdf   : > { %v3435_v6 = vpop.xlane.xlu1 %3434 }
 0xbe0   : > { %v3446_v23 = vadd.f32 1e-05, %v3440_v63  ;;  %v3441_v32 = vmul.f32 0.0078125, %v3435_v6  ;;  %v5651_v63 = vld [vmem:[%s7454_s5 + $0x64] ss:$8 sps:$4 sm:$0xff]  }
 0xbe1   : > { %v5652_v6 = vld [vmem:[%s7454_s5 + $0x70] ss:$8 sps:$4 sm:$0xff]  }
 0xbe2   : > { %5787 = vrsqrt.f32 %v3446_v23  ;;  %v3447_v34 = vadd.f32 1e-05, %v3441_v32  ;;  %v5654_v23 = vld [vmem:[%s7454_s5 + $0x74] ss:$8 sps:$4 sm:$0xff]   ;;  %v5655_v32 = vld [vmem:[%s7464_s4 + $0x40] sm:$0xff]  }
 0xbe3   : > { %4857 = vmatprep.subr.bf16.mxu0 %v5655_v32  ;;  %v5662_v32 = vld [vmem:[%s7464_s4 + $0x18] sm:$0xff]  }
 0xbe4   : > { %v5784_v20 = vpop.eup %5783  ;;  %5789 = vrsqrt.f32 %v3447_v34  ;;  %v5656_v34 = vld [vmem:[%s7464_s4] sm:$0xff]  }
 0xbe5   : > { %v3456_v10 = vmul.f32 %v5784_v20, %v3414_v57  ;;  %v5634_v57 = vld [vmem:[%s7454_s5 + $0x10] ss:$8 sps:$4 sm:$0xff]   ;;  %4858 = vmatpush3.bf16.msra.mxu0 %v5656_v34  ;;  %v5663_v34 = vld [vmem:[%s7464_s4 + $0x60] sm:$0xff]  }
 0xbe6   : > { %3679 = vmatpush1.bf16.msra.mxu1 %v5634_v57  ;;  %v5657_v20 = vld [vmem:[%s7464_s4 + $0x48] sm:$0xff]  }
 0xbe7   : > { %v3469_v30 = vmul.f32 %v4704_v21, %v3456_v10  ;;  %3680 = vmatprep.subr.bf16.mxu1 %v5639_v38  ;;  %v5658_v10 = vld [vmem:[%s7464_s4 + $0x8] sm:$0xff]   ;;  %4859 = vmatprep.subr.bf16.mxu0 %v5657_v20 }
 0xbe8   : > { %v5786_v44 = vpop.eup %5785  ;;  %v5665_v20 = vld [vmem:[%s7464_s4 + $0x68] sm:$0xff]  }
 0xbe9   : > { %3477 = vadd.xlane.f32.xlu0 %v3469_v30  ;;  %v3457_v9 = vmul.f32 %v5786_v44, %v3415_v4  ;;  %4860 = vmatpush3.bf16.msra.mxu0 %v5658_v10  ;;  %v5666_v10 = vld [vmem:[%s7464_s4 + $0x28] sm:$0xff]  }
 0xbea   : > { %3681 = vmatpush1.bf16.msra.mxu1 %v5637_v17 }
 0xbeb   : > { %v3470_v53 = vmul.f32 %v4704_v21, %v3457_v9  ;;  %3682 = vmatprep.subr.bf16.mxu1 %v5642_v58 }
 0xbec   : > { %v5788_v8 = vpop.eup %5787 }
 0xbed   : > { %3479 = vadd.xlane.f32.xlu1 %v3470_v53  ;;  %v3458_v47 = vmul.f32 %v5788_v8, %v3416_v39 }
 0xbee   : > { %v5790_v45 = vpop.eup %5789  ;;  %3683 = vmatpush1.bf16.msra.mxu1 %v5640_v41 }
 0xbef   : > { %v3471_v26 = vmul.f32 %v4704_v21, %v3458_v47  ;;  %v3459_v29 = vmul.f32 %v5790_v45, %v3417_v52 }
 0xbf1   : > { %3481 = vadd.xlane.f32.xlu0 %v3471_v26  ;;  %v3472_v59 = vmul.f32 %v4704_v21, %v3459_v29 }
 0xbf3   : > { %3483 = vadd.xlane.f32.xlu1 %v3472_v59 }
 0xc69   : > { %v3474_v11 = vpop.xlane.xlu0 %3473 }
 0xc6a   : > { %v3485_v14 = vmul.f32 0.0078125, %v3474_v11 }
 0xc6b   : > { %v3476_v35 = vpop.xlane.xlu1 %3475 }
 0xc6c   : > { %v8196_v4 = vsub.f32 %v3467_v16, %v3485_v14  ;;  %v3486_v1 = vmul.f32 0.0078125, %v3476_v35  ;;  %v5645_v16 = vld [vmem:[%s7454_s5 + $0x44] ss:$8 sps:$4 sm:$0xff]  }
 0xc6d   : > { %3684 = vmatprep.subr.bf16.mxu1 %v5645_v16 }
 0xc6e   : > { %v8198_v55 = vsub.f32 %v3468_v15, %v3486_v1  ;;  %v3497_v49 = vmul.f32 %v8196_v4, %v8196_v4  ;;  %3685 = vmatpush1.bf16.msra.mxu1 %v5643_v31  ;;  %v5649_v15 = vld [vmem:[%s7454_s5 + $0x60] ss:$8 sps:$4 sm:$0xff]  }
 0xc6f   : > { %3686 = vmatprep.subr.bf16.mxu1 %v5648_v37 }
 0xc70   : > { %3503 = vadd.xlane.f32.xlu0 %v3497_v49  ;;  %v3498_v25 = vmul.f32 %v8198_v55, %v8198_v55  ;;  %v4706_v49 = vld [vmem:[%s8528_s22] ss:$0 sm:$0xff] }
 0xc72   : > { %3505 = vadd.xlane.f32.xlu1 %v3498_v25  ;;  %3687 = vmatpush1.bf16.msra.mxu1 %v5646_v28 }
 0xc73   : > { %3688 = vmatprep.subr.bf16.mxu1 %v5651_v63 }
 0xc76   : > { %v3478_v39 = vpop.xlane.xlu0 %3477  ;;  %3689 = vmatpush1.bf16.msra.mxu1 %v5649_v15 }
 0xc77   : > { %v3487_v12 = vmul.f32 0.0078125, %v3478_v39  ;;  %3690 = vmatprep.subr.bf16.mxu1 %v5654_v23  ;;  %v5660_v23 = vld [vmem:[%s7464_s4 + $0x10] sm:$0xff]  }
 0xc79   : > { %v8204_v52 = vsub.f32 %v3469_v30, %v3487_v12 }
 0xc7a   : > { %v3480_v19 = vpop.xlane.xlu1 %3479  ;;  %3691 = vmatpush1.bf16.msra.mxu1 %v5652_v6 }
 0xc7b   : > { %v3488_v56 = vmul.f32 0.0078125, %v3480_v19  ;;  %v3499_v54 = vmul.f32 %v8204_v52, %v8204_v52 }
 0xc7d   : > { %v8208_v60 = vsub.f32 %v3470_v53, %v3488_v56  ;;  %3507 = vadd.xlane.f32.xlu0 %v3499_v54 }
 0xc7e   : > { %v3482_v61 = vpop.xlane.xlu0 %3481 }
 0xc7f   : > { %v3489_v51 = vmul.f32 0.0078125, %v3482_v61  ;;  %v3500_v40 = vmul.f32 %v8208_v60, %v8208_v60 }
 0xc80   : > { %v3484_v27 = vpop.xlane.xlu1 %3483 }
 0xc81   : > { %v8213_v7 = vsub.f32 %v3471_v26, %v3489_v51  ;;  %v3490_v0 = vmul.f32 0.0078125, %v3484_v27  ;;  %3509 = vadd.xlane.f32.xlu1 %v3500_v40 }
 0xc83   : > { %v8216_v21 = vsub.f32 %v3472_v59, %v3490_v0  ;;  %v3501_v36 = vmul.f32 %v8213_v7, %v8213_v7 }
 0xc85   : > { %3511 = vadd.xlane.f32.xlu0 %v3501_v36  ;;  %v3502_v33 = vmul.f32 %v8216_v21, %v8216_v21 }
 0xc87   : > { %3513 = vadd.xlane.f32.xlu1 %v3502_v33 }
 0xcfd   : > { %v3504_v30 = vpop.xlane.xlu0 %3503 }
 0xcfe   : > { %v3515_v44 = vmul.f32 0.0078125, %v3504_v30  ;;  %v5667_v30 = vld [vmem:[%s7464_s4 + $0x70] sm:$0xff]  }
 0xcff   : > { %v3506_v9 = vpop.xlane.xlu1 %3505 }
 0xd00   : > { %v3521_v53 = vadd.f32 1e-05, %v3515_v44  ;;  %v3516_v8 = vmul.f32 0.0078125, %v3506_v9  ;;  %v5668_v44 = vld [vmem:[%s7464_s4 + $0x30] sm:$0xff]   ;;  %v5669_v9 = vld [vmem:[%s7464_s4 + $0x78] sm:$0xff]  }
 0xd02   : > { %5791 = vrsqrt.f32 %v3521_v53  ;;  %v3522_v47 = vadd.f32 1e-05, %v3516_v8  ;;  %v5670_v53 = vld [vmem:[%s7464_s4 + $0x38] sm:$0xff]  }
 0xd03   : > { %v3584_v8 = vld [vmem:[%s7461_s0] sm:$0x3] }
 0xd04   : > { %5793 = vrsqrt.f32 %v3522_v47  ;;  %v3589_v47 = vrot.slane %v3584_v8, %v1422_v3 }
 0xd0a   : > { %v3508_v45 = vpop.xlane.xlu0 %3507 }
 0xd0b   : > { %v3517_v26 = vmul.f32 0.0078125, %v3508_v45  ;;  %v3593_v45 = vrot.slane %v3584_v8, %v1426_v2 }
 0xd0c   : > { %v5792_v29 = vpop.eup %5791 }
 0xd0d   : > { %v3523_v59 = vadd.f32 1e-05, %v3517_v26  ;;  %v3533_v46 = vmul.f32 %v5792_v29, %v8196_v4 }
 0xd0e   : > { %v3510_v18 = vpop.xlane.xlu1 %3509  ;;  %v5794_v57 = vpop.eup %5793 }
 0xd0f   : > { %5795 = vrsqrt.f32 %v3523_v59  ;;  %v3518_v11 = vmul.f32 0.0078125, %v3510_v18  ;;  %v3534_v14 = vmul.f32 %v5794_v57, %v8198_v55  ;;  %v3546_v35 = vmul.f32 %v4705_v42, %v3533_v46 }
 0xd11   : > { %v3524_v1 = vadd.f32 1e-05, %v3518_v11  ;;  %v3547_v39 = vmul.f32 %v4705_v42, %v3534_v14  ;;  %v3559_v56 = vadd.f32 %v4706_v49, %v3546_v35 }
 0xd12   : > { %v3512_v25 = vpop.xlane.xlu0 %3511 }
 0xd13   : > { %5797 = vrsqrt.f32 %v3524_v1  ;;  %v3519_v12 = vmul.f32 0.0078125, %v3512_v25  ;;  %v3560_v54 = vadd.f32 %v4706_v49, %v3547_v39 }
 0xd14   : > { %v3514_v19 = vpop.xlane.xlu1 %3513 }
 0xd15   : > { %v3525_v61 = vadd.f32 1e-05, %v3519_v12  ;;  %v3520_v51 = vmul.f32 0.0078125, %v3514_v19  ;;  %v3565_v4 = vpack.c.bf16 %v3560_v54, %v3559_v56 }
 0xd17   : > { %5799 = vrsqrt.f32 %v3525_v61  ;;  %v3526_v40 = vadd.f32 1e-05, %v3520_v51  ;;  %3709 = vmatmul.mubr.bf16.vlgmr.msra.gmra.mrb[48].mxu1 %v3565_v4 }
 0xd18   : > { %3718 = vmatprep.mubr.bf16.mxu1 %v6589_v24 }
 0xd19   : > { %v5796_v27 = vpop.eup %5795  ;;  %5801 = vrsqrt.f32 %v3526_v40 }
 0xd1a   : > { %v3535_v55 = vmul.f32 %v5796_v27, %v8204_v52 }
 0xd1c   : > { %v3548_v17 = vmul.f32 %v4705_v42, %v3535_v55 }
 0xd1d   : > { %v5798_v38 = vpop.eup %5797 }
 0xd1e   : > { %v3536_v0 = vmul.f32 %v5798_v38, %v8208_v60  ;;  %v3561_v33 = vadd.f32 %v4706_v49, %v3548_v17 }
 0xd20   : > { %v3549_v36 = vmul.f32 %v4705_v42, %v3536_v0 }
 0xd21   : > { %v5800_v58 = vpop.eup %5799 }
 0xd22   : > { %v3562_v41 = vadd.f32 %v4706_v49, %v3549_v36  ;;  %v3537_v16 = vmul.f32 %v5800_v58, %v8213_v7  ;;  %v5659_v7 = vld [vmem:[%s7464_s4 + $0x50] sm:$0xff]  }
 0xd23   : > { %v5802_v31 = vpop.eup %5801  ;;  %4861 = vmatprep.subr.bf16.mxu0 %v5659_v7 }
 0xd24   : > { %v3566_v37 = vpack.c.bf16 %v3562_v41, %v3561_v33  ;;  %v3538_v28 = vmul.f32 %v5802_v31, %v8216_v21  ;;  %v3550_v52 = vmul.f32 %v4705_v42, %v3537_v16  ;;  %4862 = vmatpush3.bf16.msra.mxu0 %v5660_v23  ;;  %v5661_v21 = vld [vmem:[%s7464_s4 + $0x58] sm:$0xff]  }
 0xd25   : > { %4863 = vmatprep.subr.bf16.mxu0 %v5661_v21 }
 0xd26   : > { %3719 = vmatmul.mubr.bf16.gmra.mrb[52].mxu1 %v3566_v37  ;;  %v3551_v60 = vmul.f32 %v4705_v42, %v3538_v28  ;;  %v3563_v63 = vadd.f32 %v4706_v49, %v3550_v52 }
 0xd27   : > { %3728 = vmatprep.mubr.bf16.mxu1 %v6589_v24  ;;  %v5664_v24 = vld [vmem:[%s7464_s4 + $0x20] sm:$0xff]  }
 0xd28   : > { %v3564_v15 = vadd.f32 %v4706_v49, %v3551_v60  ;;  %4864 = vmatpush3.bf16.msra.mxu0 %v5662_v32 }
 0xd29   : > { %4865 = vmatprep.subr.bf16.mxu0 %v5663_v34 }
 0xd2a   : > { %v3567_v6 = vpack.c.bf16 %v3564_v15, %v3563_v63 }
 0xd2c   : > { %4866 = vmatpush3.bf16.msra.mxu0 %v5664_v24 }
 0xd2d   : > { %4867 = vmatprep.subr.bf16.mxu0 %v5665_v20 }
 0xd2e   : > { %3729 = vmatmul.mubr.bf16.gmra.mrb[56].mxu1 %v3567_v6 }
 0xd30   : > { %4868 = vmatpush3.bf16.msra.mxu0 %v5666_v10 }
 0xd31   : > { %4869 = vmatprep.subr.bf16.mxu0 %v5667_v30 }
 0xd34   : > { %4870 = vmatpush3.bf16.msra.mxu0 %v5668_v44 }
 0xd35   : > { %4871 = vmatprep.subr.bf16.mxu0 %v5669_v9 }
 0xd38   : > { %4872 = vmatpush3.bf16.msra.mxu0 %v5670_v53 }
 0xdea   : > { %v3710_v26 = vpop.f32.mrb[48].mxu1 }
 0xdeb   : > { %v3711_v29 = vadd.f32 %v3710_v26, %v3589_v47  ;;  %v3712_v59 = vpop.f32.mrb[49].mxu1 }
 0xdec   : > { %v3713_v42 = vadd.f32 %v3712_v59, %v3593_v45  ;;  %v3714_v46 = vpop.f32.mrb[50].mxu1 }
 0xded   : > { %v3751_v18 = vmul.f32 0.70710677, %v3711_v29  ;;  %v3715_v57 = vadd.f32 %v3714_v46, %v3589_v47  ;;  %v3716_v11 = vpop.f32.mrb[51].mxu1  ;;  %v3739_v61 = vmul.f32 0.5, %v3711_v29 }
 0xdee   : > { %v3752_v14 = vmul.f32 0.70710677, %v3713_v42  ;;  %v3717_v35 = vadd.f32 %v3716_v11, %v3593_v45  ;;  %v3740_v38 = vmul.f32 0.5, %v3713_v42 }
 0xdef   : > { %5803 = verf.f32 %v3751_v18  ;;  %v3753_v1 = vmul.f32 0.70710677, %v3715_v57  ;;  %v3741_v0 = vmul.f32 0.5, %v3715_v57 }
 0xdf0   : > { %5805 = verf.f32 %v3752_v14  ;;  %v3754_v49 = vmul.f32 0.70710677, %v3717_v35  ;;  %v3742_v33 = vmul.f32 0.5, %v3717_v35 }
 0xdf1   : > { %5807 = verf.f32 %v3753_v1 }
 0xdf2   : > { %5809 = verf.f32 %v3754_v49 }
 0xdf9   : > { %v3720_v3 = vpop.f32.mrb[52].mxu1  ;;  %v5804_v25 = vpop.eup %5803 }
 0xdfa   : > { %v3721_v5 = vadd.f32 %v3720_v3, %v3589_v47  ;;  %v3722_v2 = vpop.f32.mrb[53].mxu1  ;;  %v5806_v39 = vpop.eup %5805  ;;  %v3775_v12 = vadd.f32 1.0, %v5804_v25 }
 0xdfb   : > { %v3723_v19 = vadd.f32 %v3722_v2, %v3593_v45  ;;  %v3724_v56 = vpop.f32.mrb[54].mxu1  ;;  %v5808_v54 = vpop.eup %5807  ;;  %v3776_v51 = vadd.f32 1.0, %v5806_v39 }
 0xdfc   : > { %v3755_v4 = vmul.f32 0.70710677, %v3721_v5  ;;  %v3725_v40 = vadd.f32 %v3724_v56, %v3589_v47  ;;  %v3726_v27 = vpop.f32.mrb[55].mxu1  ;;  %v5810_v55 = vpop.eup %5809  ;;  %v3777_v17 = vadd.f32 1.0, %v5808_v54  ;;  %v3787_v58 = vmul.f32 %v3775_v12, %v3739_v61 }
 0xdfd   : > { %v3756_v36 = vmul.f32 0.70710677, %v3723_v19  ;;  %v3778_v41 = vadd.f32 1.0, %v5810_v55  ;;  %v3727_v37 = vadd.f32 %v3726_v27, %v3593_v45  ;;  %v3788_v28 = vmul.f32 %v3776_v51, %v3740_v38 }
 0xdfe   : > { %5811 = verf.f32 %v3755_v4  ;;  %v3789_v16 = vmul.f32 %v3777_v17, %v3741_v0  ;;  %v3757_v31 = vmul.f32 0.70710677, %v3725_v40  ;;  %v3743_v59 = vmul.f32 0.5, %v3721_v5 }
 0xdff   : > { %5813 = verf.f32 %v3756_v36  ;;  %v3790_v52 = vmul.f32 %v3778_v41, %v3742_v33  ;;  %v3758_v15 = vmul.f32 0.70710677, %v3727_v37  ;;  %v3745_v46 = vmul.f32 0.5, %v3725_v40  ;;  %v4723_v41 = vld [vmem:[%s1012_s8] ss:$0 sm:$0xff] }
 0xe00   : > { %v3799_v60 = vpack.c.bf16 %v3789_v16, %v3787_v58  ;;  %5815 = verf.f32 %v3757_v31  ;;  %v3746_v35 = vmul.f32 0.5, %v3727_v37 }
 0xe01   : > { %v3730_v63 = vpop.f32.mrb[56].mxu1  ;;  %v3800_v23 = vpack.c.bf16 %v3790_v52, %v3788_v28  ;;  %5817 = verf.f32 %v3758_v15 }
 0xe02   : > { %v3731_v6 = vadd.f32 %v3730_v63, %v3589_v47  ;;  %v3732_v7 = vpop.f32.mrb[57].mxu1 }
 0xe03   : > { %v3733_v21 = vadd.f32 %v3732_v7, %v3593_v45  ;;  %v3734_v32 = vpop.f32.mrb[58].mxu1  ;;  %3972 = vmatprep.mubr.bf16.mxu0 %v3800_v23 }
 0xe04   : > { %v3759_v34 = vmul.f32 0.70710677, %v3731_v6  ;;  %v3735_v24 = vadd.f32 %v3734_v32, %v3589_v47  ;;  %v3736_v20 = vpop.f32.mrb[59].mxu1  ;;  %3973 = vmatmul.mubr.bf16.vlgmr.msra.gmra.mrb[52].mxu0 %v3799_v60  ;;  %v3744_v47 = vmul.f32 0.5, %v3723_v19  ;;  %v3747_v5 = vmul.f32 0.5, %v3731_v6 }
 0xe05   : > { %v3760_v10 = vmul.f32 0.70710677, %v3733_v21  ;;  %v3737_v30 = vadd.f32 %v3736_v20, %v3593_v45  ;;  %v3748_v40 = vmul.f32 0.5, %v3733_v21 }
 0xe06   : > { %5819 = verf.f32 %v3759_v34  ;;  %v3761_v44 = vmul.f32 0.70710677, %v3735_v24  ;;  %v3749_v51 = vmul.f32 0.5, %v3735_v24 }
 0xe07   : > { %5821 = verf.f32 %v3760_v10  ;;  %v3762_v9 = vmul.f32 0.70710677, %v3737_v30  ;;  %v3750_v19 = vmul.f32 0.5, %v3737_v30 }
 0xe08   : > { %v5812_v53 = vpop.eup %5811  ;;  %5823 = verf.f32 %v3761_v44 }
 0xe09   : > { %v5814_v8 = vpop.eup %5813  ;;  %5825 = verf.f32 %v3762_v9  ;;  %v3779_v26 = vadd.f32 1.0, %v5812_v53 }
 0xe0a   : > { %v5816_v29 = vpop.eup %5815  ;;  %v3780_v42 = vadd.f32 1.0, %v5814_v8 }
 0xe0b   : > { %v3781_v18 = vadd.f32 1.0, %v5816_v29  ;;  %v5818_v57 = vpop.eup %5817  ;;  %v3791_v11 = vmul.f32 %v3779_v26, %v3743_v59 }
 0xe0c   : > { %v3782_v45 = vadd.f32 1.0, %v5818_v57  ;;  %v3792_v49 = vmul.f32 %v3780_v42, %v3744_v47 }
 0xe0d   : > { %v3793_v14 = vmul.f32 %v3781_v18, %v3745_v46 }
 0xe0e   : > { %v3794_v3 = vmul.f32 %v3782_v45, %v3746_v35 }
 0xe0f   : > { %v3801_v25 = vpack.c.bf16 %v3793_v14, %v3791_v11 }
 0xe10   : > { %v5820_v1 = vpop.eup %5819  ;;  %v3802_v54 = vpack.c.bf16 %v3794_v3, %v3792_v49  ;;  %v5833_v3 = vld [vmem:[#allocation30] sm:$0xff] (!%p4740_p9)  }
 0xe11   : > { %v5822_v2 = vpop.eup %5821  ;;  %v3783_v39 = vadd.f32 1.0, %v5820_v1 }
 0xe12   : > { %v5824_v12 = vpop.eup %5823  ;;  %v3784_v56 = vadd.f32 1.0, %v5822_v2  ;;  %3980 = vmatprep.mubr.bf16.mxu0 %v3802_v54  ;;  %v5834_v2 = vld [vmem:[#allocation30 + $0x8] sm:$0xff] (!%p4740_p9)  }
 0xe13   : > { %v5826_v61 = vpop.eup %5825  ;;  %v3785_v4 = vadd.f32 1.0, %v5824_v12  ;;  %v3795_v55 = vmul.f32 %v3783_v39, %v3747_v5  ;;  %3981 = vmatmul.mubr.bf16.gmra.mrb[56].mxu0 %v3801_v25  ;;  %v6594_v25 = vmov (!%p4740_p9), 0.0   ;;  %v5835_v39 = vld [vmem:[#allocation30 + $0x10] sm:$0xff] (!%p4740_p9)   ;;  %v5836_v12 = vld [vmem:[#allocation30 + $0x18] sm:$0xff] (!%p4740_p9)   ;;  %v5838_v54 = vld [vmem:[#allocation30 + $0x28] sm:$0xff] (!%p4740_p9)  }
 0xe14   : > { %v3786_v27 = vadd.f32 1.0, %v5826_v61  ;;  %v3796_v0 = vmul.f32 %v3784_v56, %v3748_v40  ;;  %5112 = vmatprep.subr.bf16.mxu0 (!%p4740_p9), %v6594_v25  ;;  %v5837_v56 = vld [vmem:[#allocation30 + $0x20] sm:$0xff] (!%p4740_p9)   ;;  %v5839_v61 = vld [vmem:[#allocation30 + $0x30] sm:$0xff] (!%p4740_p9)   ;;  %v5840_v5 = vld [vmem:[#allocation30 + $0x38] sm:$0xff] (!%p4740_p9)  }
 0xe15   : > { %v3797_v38 = vmul.f32 %v3785_v4, %v3749_v51  ;;  %5113 = vmatpush3.bf16.msra.mxu0 (!%p4740_p9), %v5833_v3 }
 0xe16   : > { %v3798_v17 = vmul.f32 %v3786_v27, %v3750_v19  ;;  %5114 = vmatprep.subr.bf16.mxu0 (!%p4740_p9), %v6594_v25  ;;  %v4741_v27 = vld [vmem:[#allocation27] ss:$0 sm:$0xff] (!%p4740_p9) }
 0xe17   : > { %v3803_v36 = vpack.c.bf16 %v3797_v38, %v3795_v55 }
 0xe18   : > { %v3804_v58 = vpack.c.bf16 %v3798_v17, %v3796_v0  ;;  %v4742_v0 = vld [vmem:[#allocation29] ss:$0 sm:$0xff] (!%p4740_p9) }
 0xe19   : > { %5115 = vmatpush3.bf16.msra.mxu0 (!%p4740_p9), %v5834_v2 }
 0xe1a   : > { %3988 = vmatprep.mubr.bf16.mxu0 %v3804_v58  ;;  %5116 = vmatprep.subr.bf16.mxu0 (!%p4740_p9), %v6594_v25 }
 0xe1b   : > { %3989 = vmatmul.mubr.bf16.gmra.mrb[60].mxu0 %v3803_v36 }
 0xe1c   : > { %5128 = vmatprep.mubr.msk.bf16.mxu0 (!%p4740_p9), %vm6595_vm10, %v6594_v25 }
 0xe1d   : > { %5117 = vmatpush3.bf16.msra.mxu0 (!%p4740_p9), %v5835_v39 }
 0xe1e   : > { %5118 = vmatprep.subr.bf16.mxu0 (!%p4740_p9), %v6594_v25 }
 0xe21   : > { %5119 = vmatpush3.bf16.msra.mxu0 (!%p4740_p9), %v5836_v12 }
 0xe22   : > { %5120 = vmatprep.subr.bf16.mxu0 (!%p4740_p9), %v6594_v25 }
 0xe25   : > { %5121 = vmatpush3.bf16.msra.mxu0 (!%p4740_p9), %v5837_v56 }
 0xe26   : > { %5122 = vmatprep.subr.bf16.mxu0 (!%p4740_p9), %v6594_v25 }
 0xe29   : > { %5123 = vmatpush3.bf16.msra.mxu0 (!%p4740_p9), %v5838_v54 }
 0xe2a   : > { %5124 = vmatprep.subr.bf16.mxu0 (!%p4740_p9), %v6594_v25 }
 0xe2d   : > { %5125 = vmatpush3.bf16.msra.mxu0 (!%p4740_p9), %v5839_v61 }
 0xe2e   : > { %5126 = vmatprep.subr.bf16.mxu0 (!%p4740_p9), %v6594_v25 }
 0xe31   : > { %5127 = vmatpush3.bf16.msra.mxu0 (!%p4740_p9), %v5840_v5 }
 0xed7   : > { %v4873_v33 = vpop.f32.mrb[52].mxu0 }
 0xed8   : > { %v4874_v16 = vpop.f32.mrb[53].mxu0 }
 0xed9   : > { %v4875_v31 = vadd.f32 %v4874_v16, %v4873_v33  ;;  %v4876_v37 = vpop.f32.mrb[54].mxu0 }
 0xeda   : > { %v4877_v28 = vpop.f32.mrb[55].mxu0 }
 0xedb   : > { %v3975_v52 = vadd.f32 %v4875_v31, %v4723_v41  ;;  %v4878_v60 = vadd.f32 %v4877_v28, %v4876_v37 }
 0xedd   : > { %v3997_v15 = vadd.f32 %v3975_v52, %v8166_v62  ;;  %v3978_v63 = vadd.f32 %v4878_v60, %v4723_v41 }
 0xedf   : > { %4003 = vst [vmem:[#allocation2] sm:$0xff] %v3997_v15  ;;  %v3998_v6 = vadd.f32 %v3978_v63, %v8168_v13  ;;  %v4743_v63 = vld [vmem:[#allocation32] ss:$0 sm:$0xff] (!%p4740_p9) }
 0xee1   : > { %4004 = vst [vmem:[#allocation2 + $0x8] sm:$0xff] %v3998_v6 }
 0xee6   : > { %v4879_v7 = vpop.f32.mrb[56].mxu0 }
 0xee7   : > { %v4880_v23 = vpop.f32.mrb[57].mxu0 }
 0xee8   : > { %v4881_v21 = vadd.f32 %v4880_v23, %v4879_v7  ;;  %v4882_v32 = vpop.f32.mrb[58].mxu0 }
 0xee9   : > { %v4883_v34 = vpop.f32.mrb[59].mxu0 }
 0xeea   : > { %v3983_v24 = vadd.f32 %v4881_v21, %v4723_v41  ;;  %v4884_v20 = vadd.f32 %v4883_v34, %v4882_v32 }
 0xeec   : > { %v3999_v10 = vadd.f32 %v3983_v24, %v8172_v48  ;;  %v3986_v30 = vadd.f32 %v4884_v20, %v4723_v41 }
 0xeee   : > { %4005 = vst [vmem:[#allocation2 + $0x10] sm:$0xff] %v3999_v10  ;;  %v4000_v44 = vadd.f32 %v3986_v30, %v8175_v22  ;;  %v4885_v9 = vpop.f32.mrb[60].mxu0 }
 0xeef   : > { %v4886_v62 = vpop.f32.mrb[61].mxu0 }
 0xef0   : > { %4006 = vst [vmem:[#allocation2 + $0x18] sm:$0xff] %v4000_v44  ;;  %v4887_v53 = vadd.f32 %v4886_v62, %v4885_v9  ;;  %v4888_v8 = vpop.f32.mrb[62].mxu0  ;;  %v4015_v48 = vrot.slane (!%p4740_p9), %v4000_v44, 7 }
 0xef1   : > { %v4889_v13 = vpop.f32.mrb[63].mxu0 }
 0xef2   : > { %v3991_v26 = vadd.f32 %v4887_v53, %v4723_v41  ;;  %v4890_v29 = vadd.f32 %v4889_v13, %v4888_v8  ;;  %4012 = sbr.rel (%p4740_p9) target bundleno = 4371 (0x1113), region = 180  ;;  %v4017_v22 = vsel (!%p4740_p9), %vm4016_vm8, %v4015_v48, %v3997_v15 }
 0xef3   : > { %v4020_v18 = vsel (!%p4740_p9), %vm4019_vm9, %v4017_v22, 0.0 }
 0xef4   : > { %v4001_v59 = vadd.f32 %v3991_v26, %v8178_v43  ;;  %v3994_v42 = vadd.f32 %v4890_v29, %v4723_v41  ;;  %4021 = vadd.xlane.f32.xlu0 (!%p4740_p9), %v4020_v18 }
 0xef6   : > { %4007 = vst [vmem:[#allocation2 + $0x20] sm:$0xff] %v4001_v59  ;;  %v4002_v46 = vadd.f32 %v3994_v42, %v8180_v50 }
 0xef8   : > { %4008 = vst [vmem:[#allocation2 + $0x28] sm:$0xff] %v4002_v46 }
 0xf81   : > { %v4022_v57 = vpop.xlane.xlu0 %4021 }
 0xf82   : > { %v4023_v47 = vmul.f32 0.0078125, %v4022_v57 }
 0xf84   : > { %v4025_v11 = vrot.slane %v4023_v47, 1  ;;  %v4028_v14 = vsub.f32 %v3997_v15, %v4023_v47 }
 0xf86   : > { %v4029_v43 = vsub.f32 %v4000_v44, %v4025_v11  ;;  %v4030_v45 = vmul.f32 %v4028_v14, %v4028_v14 }
 0xf88   : > { %v4031_v35 = vmul.f32 %v4029_v43, %v4029_v43 }
 0xf8a   : > { %v4034_v1 = vrot.slane %v4031_v35, 7 }
 0xf8c   : > { %v4035_v50 = vsel %vm4016_vm8, %v4034_v1, %v4030_v45 }
 0xf8d   : > { %v4037_v49 = vsel %vm4019_vm9, %v4035_v50, 0.0 }
 0xf8e   : > { %4038 = vadd.xlane.f32.xlu0 %v4037_v49 }
0x101b   : > { %v4039_v51 = vpop.xlane.xlu0 %4038 }
0x101c   : > { %v4040_v4 = vmul.f32 0.0078125, %v4039_v51 }
0x101e   : > { %v4041_v40 = vadd.f32 1e-06, %v4040_v4 }
0x1020   : > { %5841 = vrsqrt.f32 %v4041_v40 }
0x102a   : > { %v5842_v19 = vpop.eup %5841 }
0x102b   : > { %v4044_v55 = vrot.slane %v5842_v19, 1  ;;  %v4047_v38 = vmul.f32 %v5842_v19, %v4028_v14 }
0x102d   : > { %v4048_v17 = vmul.f32 %v4044_v55, %v4029_v43  ;;  %v4056_v36 = vmul.f32 %v4741_v27, %v4047_v38 }
0x102f   : > { %v4057_v58 = vmul.f32 %v4741_v27, %v4048_v17  ;;  %v4065_v33 = vadd.f32 %v4742_v0, %v4056_v36 }
0x1031   : > { %v4066_v41 = vadd.f32 %v4742_v0, %v4057_v58  ;;  %v4067_v16 = vpack.c.bf16 %v4065_v33, %v4065_v33 }
0x1033   : > { %v4068_v31 = vpack.c.bf16 %v4066_v41, %v4066_v41  ;;  %v4094_v28 = vunpack.c.l.b16 %v4067_v16 }
0x1035   : > { %v4095_v37 = vunpack.c.l.b16 %v4068_v31 }
0x1037   : > { %v4096_v52 = vrot.slane %v4095_v37, 7 }
0x1039   : > { %v4097_v60 = vsel %vm4016_vm8, %v4096_v52, %v4094_v28 }
0x103a   : > { %v4098_v15 = vpack.c.b16 %v4097_v60, %v4097_v60 }
0x103c   : > { %5129 = vmatmul.mubr.bf16.vlgmr.msra.gmra.mrb[0].mxu0 %v4098_v15 }
0x110f   : > { %v4182_v6 = vpop.f32.mrb[0].mxu0 }
0x1110   : > { %v4183_v7 = vadd.f32 %v4743_v63, %v4182_v6  ;;  %v5130_v23 = vpop.f32.mrb[1].mxu0 }
0x1111   : > { %v4185_v21 = vpop.f32.mrb[2].mxu0 }
0x1112   : > { %4188 = vst [vmem:[%s7480_s30] sm:$0x3] %v4183_v7  ;;  %v5131_v32 = vpop.f32.mrb[3].mxu0 }
0x1113 PF: > { %s8530_s19 = sld [smem:[#allocation50_spill]]  ;;  %s8531_s8 = sld [smem:[#allocation76_spill]] }
0x1114   : > { %s4203_s5 = sshll.u32 %s7480_s30, 4  ;;  %s4190_s29 = scalar_lea.sflag [#allocation5], %s7398_s6  ;;  %s4204_s5 = int_to_ptr.vmem [resolvable:$true] %s4203_s5 }
0x1115   : > { %s6401_s0 = scalar_lea.vmem %s4204_s5, 32  ;;  %p8532_p5 = scmp.ne.s32.totalorder %s8486_s11, 0 }
0x1116   : > { %p6402_p2 = scmp.ne.s32.totalorder %s4204_s5, %s6401_s0  ;;  %s6596_s17 = smov [#allocation33]  }
0x1117   : > { %s6405_s25 = sshll.u32 %s6596_s17, 4  ;;  %s6406_s25 = int_to_ptr.vmem [resolvable:$false] %s6405_s25 }
0x1118   : > { %p6403_p11 = pnand %p6402_p2, %p8532_p5  ;;  %s6407_s27 = scalar_lea.vmem %s6406_s25, 64 }
0x1119   : > { %s4753_s28 = sshll.u32 %s8530_s19, 5  ;;  %p6408_p0 = scmp.lt.s32.totalorder %s4204_s5, %s6406_s25 }
0x111a   : > { %s8282_s1 = scalar_lea.hbm %s8531_s8, %s4753_s28  ;;  %p6404_p6 = pneg %p6403_p11 }
0x111b   : > { %p6409_p7 = scmp.lt.s32.totalorder %s6407_s27, %s6401_s0 }
0x111d   : > { %p6410_p3 = por %p6409_p7, %p6408_p0 }
0x111f   : > { %p6411_p13 = pnand %p6410_p3, %p6404_p6 }
0x1121   : > { %6414 = shalt.err (!%p6411_p13)
}
0x1122   : > { %s6415_s6 = scalar_lea.hbm %s8282_s1, 32  ;;  %s6419_s23 = scalar_lea.hbm %s8531_s8, 64 }
0x1123   : > { %p6416_p10 = scmp.ne.s32.totalorder %s8282_s1, %s6415_s6  ;;  %p6420_p4 = scmp.lt.u32.totalorder %s8282_s1, %s8531_s8 }
0x1124   : > { %p6421_p1 = scmp.lt.u32.totalorder %s6419_s23, %s6415_s6  ;;  %p6423_p2 = scmp.lt.u32.totalorder %s6415_s6, %s8282_s1 }
0x1125   : > { %p6417_p8 = pnand %p6416_p10, %p8532_p5 }
0x1126   : > { %p6422_p9 = por %p6421_p1, %p6420_p4 }
0x1127   : > { %p6418_p12 = pneg %p6417_p8 }
0x1128   : > { %p6424_p11 = por %p6423_p2, %p6422_p9 }
0x112a   : > { %p6425_p6 = pnand %p6424_p11, %p6418_p12 }
0x112c   : > { %6428 = shalt.err (!%p6425_p6)
}
0x112d   : > { %5231 = dma.vmem_to_hbm [thread:$0]  (%p8532_p5), %s4204_s5, 32, %s8282_s1, %s4190_s29  }
0x112e PF: > { %s8533_s22 = sld [smem:[#allocation46_spill]]  ;;  %p5309_p0 = scmp.ge.s32.totalorder %s6559_s3, 2 }
0x112f   : > { %p8534_p7 = scmp.ne.s32.totalorder %s8487_s21, 0 }
0x1131   : > { %p5293_p3 = pnand %p5309_p0, %p8534_p7 }
0x1134   : > { %s4215_s12 = sand.u32 1, %s8533_s22  }
0x1135   : > { %s4216_s19 = scalar_lea.sflag [#allocation5], %s4215_s12 }
0x1136   : > { %6514 = dma.done.wait (!%p5293_p3), %s4216_s19, 32  }
0x1137   : > { %6516 = vsyncadd (!%p5293_p3), %s4216_s19, 4294967264  ;;  %s56_s3 = sadd.s32 1, %s6559_s3   ;;  %s8535_s0 = sld [smem:[#allocation45_spill]] }
0x1138   : > { %p53_p13 = scmp.ge.s32.totalorder %s56_s3, 6   ;;  %s8536_s21 = sld [smem:[#allocation47_spill]] }
0x1139   : > { %s8537_s1 = sld [smem:[#allocation48_spill]]  ;;  %s8538_s23 = sld [smem:[#allocation51_spill]] }
0x113a   : > { %s8539_s11 = sld [smem:[#allocation55_spill]]  ;;  %s8540_s25 = sld [smem:[#allocation56_spill]] }
0x113b   : > { %s8541_s30 = smov %s6527_s20  ;;  %s8542_s20 = smov %s7172_s18 }
0x113c   : > { %s8543_s22 = smov %s8553_s13  ;;  %s8544_s2 = smov %s6551_s24 }
0x113d   :  { %55 = sbr.rel (!%p53_p13) target bundleno = 45 (0x2d), region = 317 }
0x1140   : > { %s8545_s24 = smov %s8539_s11 }
0x1144   :  { %4221 = vsyncpa [#allocation4], 1 }
0x1145   :  { %4223 = vsyncpa [#allocation4 + $0x1], 1 }
0x1146   :  { %4224 = vsyncpa [#allocation7], 1 }
0x1147   :  { %4225 = vsyncpa [#allocation10], 1 }
0x1148   :  { %4227 = vsyncpa [#allocation10 + $0x1], 1 }
0x1149   :  { %4228 = vsyncpa [#allocation13], 1 }
0x114a   :  { %4230 = vsyncpa [#allocation13 + $0x1], 1 }
0x114b   :  { %4231 = vsyncpa [#allocation16], 1 }
0x114c   :  { %4233 = vsyncpa [#allocation16 + $0x1], 1 }
0x114d   :  { %4234 = vsyncpa [#allocation19], 1 }
0x114e   :  { %4236 = vsyncpa [#allocation19 + $0x1], 1 }
0x114f   :  { %4237 = vsyncpa [#allocation22], 1 }
0x1150   :  { %4239 = vsyncpa [#allocation22 + $0x1], 1 }
0x1151   :  { %4240 = vsyncpa [#allocation25], 1 }
0x1152   :  { %4242 = vsyncpa [#allocation25 + $0x1], 1 }
0x1153   :  { %4243 = vsyncpa [#allocation28], 1 }
0x1154   :  { %4244 = vsyncpa [#allocation31], 1 }
0x1155   :  { %4245 = vsyncpa [#allocation5], 1 }
0x1156   :  { %4247 = vsyncpa [#allocation5 + $0x1], 1 }

</bundles_post_ra>
